<compile_context>
chip_gen: v6e
topology: v6e:2x2x1
jax: 0.10.0
libtpu: 0.0.40
codegen_flags: <defaults>
</compile_context>

<pallas_src>
import functools

import jax
import jax.numpy as jnp
from jax.experimental import pallas as pl
from jax.experimental.pallas import tpu as pltpu


def _layer_norm(x, gamma, beta, eps=1e-5):
    mean = jnp.mean(x, axis=-1, keepdims=True)
    var = jnp.mean(jnp.square(x - mean), axis=-1, keepdims=True)
    return (x - mean) * jax.lax.rsqrt(var + eps) * gamma + beta


def _modular_attention_unit(q, kv, wqkv, wo, ln, w1, b1, w2, b2, *,
                            batch, num_heads):
    """One ModularAttentionUnit, batched over the whole (batch*seq) slab.

    q:    (B*Lq, E) flattened query activations (f32)
    kv:   (B*Lk, E) flattened key/value activations (f32)
    wqkv: (3, E, E) "x @ W" projections [Wq^T/sqrt(d), Wk^T, Wv^T]
    wo:   (E, E)    fused output projection (head-concat folded in): Wo^T
    ln:   (4, E)    rows = [ln1_gamma, ln1_beta, ln2_gamma, ln2_beta]
    w1/b1/w2/b2: MLP params in "x @ W" layout.
    Returns (B*Lq, E).
    """
    B, H = batch, num_heads
    BLq, E = q.shape
    BLk = kv.shape[0]
    Lq, Lk = BLq // B, BLk // B
    d = E // H

    # --- nn.MultiheadAttention (bias=False, batch_first=True), eval mode ---
    # Full-depth (E x E) projections: one lane-dense MXU contraction each.
    qp = jnp.dot(q, wqkv[0], preferred_element_type=jnp.float32)    # (B*Lq, E)
    kp = jnp.dot(kv, wqkv[1], preferred_element_type=jnp.float32)   # (B*Lk, E)
    vp = jnp.dot(kv, wqkv[2], preferred_element_type=jnp.float32)   # (B*Lk, E)

    # Heads: lane dim -> leading batch dim using only static lane slices,
    # leading-dim reshapes and a major-dim concat (no transposes).
    def to_heads(x, L):
        return jnp.concatenate(
            [x[:, h * d:(h + 1) * d].reshape(B, L, d) for h in range(H)], axis=0)

    qh = to_heads(qp, Lq)                                            # (H*B, Lq, d)
    kh = to_heads(kp, Lk)                                            # (H*B, Lk, d)
    vh = to_heads(vp, Lk)                                            # (H*B, Lk, d)

    # Scores / softmax / context for all (head, batch) pairs in one batched chain.
    # (scale already folded into Wq)
    s = jnp.einsum('bqd,bkd->bqk', qh, kh, preferred_element_type=jnp.float32)
    s = s - jnp.max(s, axis=-1, keepdims=True)
    p = jnp.exp(s)
    p = p * pl.reciprocal(jnp.sum(p, axis=-1, keepdims=True), approx=True)
    ctx = jnp.einsum('bqk,bkd->bqd', p, vh, preferred_element_type=jnp.float32)

    # Heads back to the lane dim, then ONE fused full-depth output projection
    # (the per-head matmuls + serial head-sum are folded into wo).
    ctx_flat = jnp.concatenate(
        [ctx[h * B:(h + 1) * B].reshape(BLq, d) for h in range(H)], axis=-1)
    values = jnp.dot(ctx_flat, wo, preferred_element_type=jnp.float32)  # (B*Lq, E)

    # --- Add & LayerNorm ---
    x = q + values
    x = _layer_norm(x, ln[0:1, :], ln[1:2, :])

    # --- MLP: Linear(E,4E) -> LeakyReLU(0.01) -> Dropout(id) -> Linear(4E,E) ---
    h1 = jnp.dot(x, w1, preferred_element_type=jnp.float32) + b1
    h1 = jnp.where(h1 > 0, h1, jnp.float32(0.01) * h1)
    mlp = jnp.dot(h1, w2, preferred_element_type=jnp.float32) + b2

    # --- Add & LayerNorm (out) ---
    return _layer_norm(x + mlp, ln[2:3, :], ln[3:4, :])


def co_attention_layer_kernel(x_ref, y_ref,
                              wqkv_ref, wo_ref, ln_ref,
                              w1_ref, b1_ref, w2_ref, b2_ref,
                              out_ref, *, batch, num_heads):
    """Fused CoAttentionLayer: out = GA(SA(X), SA(Y)); intermediates stay in VMEM."""
    def unit(u, q, kv):
        return _modular_attention_unit(
            q, kv,
            wqkv_ref[u].astype(jnp.float32),
            wo_ref[u].astype(jnp.float32),
            ln_ref[u],
            w1_ref[u].astype(jnp.float32), b1_ref[u],
            w2_ref[u].astype(jnp.float32), b2_ref[u],
            batch=batch, num_heads=num_heads)

    X = x_ref[...].astype(jnp.float32)      # (B*Lx, E)
    Y = y_ref[...].astype(jnp.float32)      # (B*Ly, E)

    # TODO(synk): on v7x the independent SA(X)/SA(Y) could run on separate
    # TensorCores (core_map + core_barrier); kept single-core pending measurement.
    sa_x = unit(0, X, X)                    # self-attention on X
    sa_y = unit(1, Y, Y)                    # self-attention on Y
    ga = unit(2, sa_x, sa_y)                # guided attention of SA(X) by SA(Y)

    out_ref[...] = ga.astype(out_ref.dtype)


def co_attention_layer(x, y, packed, num_heads):
    """CA(X, Y) = GA(SA(X), SA(Y)) — one fused, single-program pallas_call."""
    B, Lx, E = x.shape
    _, Ly, _ = y.shape
    kernel = functools.partial(co_attention_layer_kernel, batch=B, num_heads=num_heads)
    names = ("wqkv", "wo", "ln", "w1", "b1", "w2", "b2")
    args = (x.reshape(B * Lx, E), y.reshape(B * Ly, E)) + tuple(packed[n] for n in names)
    vmem = lambda: pl.BlockSpec(memory_space=pltpu.MemorySpace.VMEM)
    out = pl.pallas_call(
        kernel,
        out_shape=jax.ShapeDtypeStruct((B * Lx, E), x.dtype),
        in_specs=[vmem() for _ in args],
        out_specs=vmem(),
    )(*args)
    return out.reshape(B, Lx, E)


def init_unit_params(key, feats, num_heads):
    """Deterministic synthetic init matching ModularAttentionUnit shapes (eval mode)."""
    E, H4 = feats, 4 * feats
    d = E // num_heads
    ks = jax.random.split(key, 6)
    s = 0.1
    in_proj = jax.random.normal(ks[0], (3 * E, E), jnp.float32) * s   # MHA in_proj_weight
    wq, wk, wv = in_proj[:E], in_proj[E:2 * E], in_proj[2 * E:]
    wo = jax.random.normal(ks[1], (E, E), jnp.float32) * s            # MHA out_proj.weight
    w1 = jax.random.normal(ks[2], (H4, E), jnp.float32) * s           # Linear(E, 4E).weight
    b1 = jax.random.normal(ks[3], (H4,), jnp.float32) * s
    w2 = jax.random.normal(ks[4], (E, H4), jnp.float32) * s           # Linear(4E, E).weight
    b2 = jax.random.normal(ks[5], (E,), jnp.float32) * s

    # "x @ W" layouts.  PyTorch computes q' = q @ Wq.T; head h uses lane columns
    # h*d:(h+1)*d of q', so the full-depth projection weight is just Wq.T; the
    # softmax scale 1/sqrt(d) is folded into Wq.  The output projection with the
    # head-concat folded in is Wo.T (rows are head-major d-blocks).
    wqkv = jnp.stack([wq.T * (1.0 / d ** 0.5), wk.T, wv.T], axis=0)   # (3, E, E)

    ones, zeros = jnp.ones((E,), jnp.float32), jnp.zeros((E,), jnp.float32)
    ln = jnp.stack([ones, zeros, ones, zeros], axis=0)                # LN default init

    # bf16 storage for matmul weights (halved DMA/VMEM); LN/bias stay f32.
    return dict(
        wqkv=wqkv.astype(jnp.bfloat16),
        wo=wo.T.astype(jnp.bfloat16),
        ln=ln,
        w1=w1.T.astype(jnp.bfloat16), b1=b1.reshape(1, H4),
        w2=w2.T.astype(jnp.bfloat16), b2=b2.reshape(1, E),
    )


def pack_layer_params(sa_x, sa_y, ga_xy):
    """Stack the three units' params on a leading axis of size 3 (sa_x, sa_y, ga_xy)."""
    return {k: jnp.stack([sa_x[k], sa_y[k], ga_xy[k]], axis=0) for k in sa_x}


@functools.partial(jax.jit, static_argnames=("num_heads",))
def stacked_co_attention(x, y, layers_params, num_heads):
    # Faithful to the PyTorch forward: `x, y = ca(X=x, Y=y)` tuple-unpacks the single
    # (B, Lx, E) tensor returned by CoAttentionLayer along the batch dim, so batch
    # must equal 2; the trailing nn.Dropout calls are identity in eval mode.
    # TODO(synk): for num_layers > 1 the PyTorch model feeds the unpacked 2-D tensors
    # back into batched MHA (a degenerate path); not replicated here.
    for p in layers_params:
        out = co_attention_layer(x, y, p, num_heads)
        assert out.shape[0] == 2, "tuple-unpack in the reference forward requires batch == 2"
        x, y = out[0], out[1]
    return x, y


if __name__ == "__main__":
    feats, num_heads, num_layers = 32, 4, 1
    B, Lx, Ly = 2, 8, 16

    key = jax.random.PRNGKey(0)
    kx, ky, kp = jax.random.split(key, 3)
    X = jax.random.normal(kx, (B, Lx, feats), jnp.float32)
    Y = jax.random.normal(ky, (B, Ly, feats), jnp.float32)

    layers_params = []
    for lk in jax.random.split(kp, num_layers):
        k1, k2, k3 = jax.random.split(lk, 3)
        layers_params.append(pack_layer_params(
            init_unit_params(k1, feats, num_heads),   # sa_x
            init_unit_params(k2, feats, num_heads),   # sa_y
            init_unit_params(k3, feats, num_heads),   # ga_xy
        ))

    x_out, y_out = stacked_co_attention(X, Y, layers_params, num_heads=num_heads)
    jax.block_until_ready((x_out, y_out))
    assert x_out.shape == (Lx, feats) and y_out.shape == (Lx, feats)
    print("KERNEL_OK")
</pallas_src>

<mosaic_0001>
module attributes {stable_mosaic.version = 11 : i64} {
  func.func @co_attention_layer_kernel(%arg0: memref<16x32xf32, #tpu.memory_space<vmem>>, %arg1: memref<32x32xf32, #tpu.memory_space<vmem>>, %arg2: memref<3x3x32x32xbf16, #tpu.memory_space<vmem>>, %arg3: memref<3x32x32xbf16, #tpu.memory_space<vmem>>, %arg4: memref<3x4x32xf32, #tpu.memory_space<vmem>>, %arg5: memref<3x32x128xbf16, #tpu.memory_space<vmem>>, %arg6: memref<3x1x128xf32, #tpu.memory_space<vmem>>, %arg7: memref<3x128x32xbf16, #tpu.memory_space<vmem>>, %arg8: memref<3x1x32xf32, #tpu.memory_space<vmem>>, %arg9: memref<16x32xf32, #tpu.memory_space<vmem>>) attributes {dimension_semantics = [], scalar_prefetch = 0 : i64, scratch_operands = 0 : i64, tpu.core_type = #tpu.core_type<tc>} {
    %c0 = arith.constant 0 : index
    %c0_0 = arith.constant 0 : index
    %0 = vector.load %arg0[%c0, %c0_0] : memref<16x32xf32, #tpu.memory_space<vmem>>, vector<16x32xf32>
    %c0_1 = arith.constant 0 : index
    %c0_2 = arith.constant 0 : index
    %1 = vector.load %arg1[%c0_1, %c0_2] : memref<32x32xf32, #tpu.memory_space<vmem>>, vector<32x32xf32>
    %c0_3 = arith.constant 0 : index
    %c0_4 = arith.constant 0 : index
    %c0_5 = arith.constant 0 : index
    %c0_6 = arith.constant 0 : index
    %2 = vector.load %arg2[%c0_3, %c0_4, %c0_5, %c0_6] : memref<3x3x32x32xbf16, #tpu.memory_space<vmem>>, vector<1x3x32x32xbf16>
    %3 = vector.shape_cast %2 : vector<1x3x32x32xbf16> to vector<3x32x32xbf16>
    %4 = arith.extf %3 : vector<3x32x32xbf16> to vector<3x32x32xf32>
    %c0_7 = arith.constant 0 : index
    %c0_8 = arith.constant 0 : index
    %c0_9 = arith.constant 0 : index
    %5 = vector.load %arg3[%c0_7, %c0_8, %c0_9] : memref<3x32x32xbf16, #tpu.memory_space<vmem>>, vector<1x32x32xbf16>
    %6 = vector.shape_cast %5 : vector<1x32x32xbf16> to vector<32x32xbf16>
    %7 = arith.extf %6 : vector<32x32xbf16> to vector<32x32xf32>
    %c0_10 = arith.constant 0 : index
    %c0_11 = arith.constant 0 : index
    %c0_12 = arith.constant 0 : index
    %8 = vector.load %arg4[%c0_10, %c0_11, %c0_12] : memref<3x4x32xf32, #tpu.memory_space<vmem>>, vector<1x4x32xf32>
    %9 = vector.shape_cast %8 : vector<1x4x32xf32> to vector<4x32xf32>
    %c0_13 = arith.constant 0 : index
    %c0_14 = arith.constant 0 : index
    %c0_15 = arith.constant 0 : index
    %10 = vector.load %arg5[%c0_13, %c0_14, %c0_15] : memref<3x32x128xbf16, #tpu.memory_space<vmem>>, vector<1x32x128xbf16>
    %11 = vector.shape_cast %10 : vector<1x32x128xbf16> to vector<32x128xbf16>
    %12 = arith.extf %11 : vector<32x128xbf16> to vector<32x128xf32>
    %c0_16 = arith.constant 0 : index
    %c0_17 = arith.constant 0 : index
    %c0_18 = arith.constant 0 : index
    %13 = vector.load %arg6[%c0_16, %c0_17, %c0_18] : memref<3x1x128xf32, #tpu.memory_space<vmem>>, vector<1x1x128xf32>
    %14 = vector.shape_cast %13 : vector<1x1x128xf32> to vector<1x128xf32>
    %c0_19 = arith.constant 0 : index
    %c0_20 = arith.constant 0 : index
    %c0_21 = arith.constant 0 : index
    %15 = vector.load %arg7[%c0_19, %c0_20, %c0_21] : memref<3x128x32xbf16, #tpu.memory_space<vmem>>, vector<1x128x32xbf16>
    %16 = vector.shape_cast %15 : vector<1x128x32xbf16> to vector<128x32xbf16>
    %17 = arith.extf %16 : vector<128x32xbf16> to vector<128x32xf32>
    %c0_22 = arith.constant 0 : index
    %c0_23 = arith.constant 0 : index
    %c0_24 = arith.constant 0 : index
    %18 = vector.load %arg8[%c0_22, %c0_23, %c0_24] : memref<3x1x32xf32, #tpu.memory_space<vmem>>, vector<1x1x32xf32>
    %19 = vector.shape_cast %18 : vector<1x1x32xf32> to vector<1x32xf32>
    %20 = vector.extract_strided_slice %4 {offsets = [0, 0, 0], sizes = [1, 32, 32], strides = [1, 1, 1]} : vector<3x32x32xf32> to vector<1x32x32xf32>
    %21 = vector.shape_cast %20 : vector<1x32x32xf32> to vector<32x32xf32>
    %cst = arith.constant dense<0.000000e+00> : vector<16x32xf32>
    %22 = tpu.matmul %0, %21, %cst {dimension_numbers = #tpu.dot_dimension_numbers<[1], [0], [0], [1], [0, 0, 1, 1], [], []>} : vector<16x32xf32>, vector<32x32xf32>, vector<16x32xf32> -> vector<16x32xf32>
    %23 = vector.extract_strided_slice %4 {offsets = [1, 0, 0], sizes = [1, 32, 32], strides = [1, 1, 1]} : vector<3x32x32xf32> to vector<1x32x32xf32>
    %24 = vector.shape_cast %23 : vector<1x32x32xf32> to vector<32x32xf32>
    %cst_25 = arith.constant dense<0.000000e+00> : vector<16x32xf32>
    %25 = tpu.matmul %0, %24, %cst_25 {dimension_numbers = #tpu.dot_dimension_numbers<[1], [0], [0], [1], [0, 0, 1, 1], [], []>} : vector<16x32xf32>, vector<32x32xf32>, vector<16x32xf32> -> vector<16x32xf32>
    %26 = vector.extract_strided_slice %4 {offsets = [2, 0, 0], sizes = [1, 32, 32], strides = [1, 1, 1]} : vector<3x32x32xf32> to vector<1x32x32xf32>
    %27 = vector.shape_cast %26 : vector<1x32x32xf32> to vector<32x32xf32>
    %cst_26 = arith.constant dense<0.000000e+00> : vector<16x32xf32>
    %28 = tpu.matmul %0, %27, %cst_26 {dimension_numbers = #tpu.dot_dimension_numbers<[1], [0], [0], [1], [0, 0, 1, 1], [], []>} : vector<16x32xf32>, vector<32x32xf32>, vector<16x32xf32> -> vector<16x32xf32>
    %29 = vector.extract_strided_slice %22 {offsets = [0, 0], sizes = [16, 8], strides = [1, 1]} : vector<16x32xf32> to vector<16x8xf32>
    %30 = vector.shape_cast %29 : vector<16x8xf32> to vector<2x8x8xf32>
    %31 = vector.extract_strided_slice %22 {offsets = [0, 8], sizes = [16, 8], strides = [1, 1]} : vector<16x32xf32> to vector<16x8xf32>
    %32 = vector.shape_cast %31 : vector<16x8xf32> to vector<2x8x8xf32>
    %33 = vector.extract_strided_slice %22 {offsets = [0, 16], sizes = [16, 8], strides = [1, 1]} : vector<16x32xf32> to vector<16x8xf32>
    %34 = vector.shape_cast %33 : vector<16x8xf32> to vector<2x8x8xf32>
    %35 = vector.extract_strided_slice %22 {offsets = [0, 24], sizes = [16, 8], strides = [1, 1]} : vector<16x32xf32> to vector<16x8xf32>
    %36 = vector.shape_cast %35 : vector<16x8xf32> to vector<2x8x8xf32>
    %37 = tpu.concatenate %30, %32, %34, %36 in 0 : vector<2x8x8xf32>, vector<2x8x8xf32>, vector<2x8x8xf32>, vector<2x8x8xf32> -> vector<8x8x8xf32>
    %38 = vector.extract_strided_slice %25 {offsets = [0, 0], sizes = [16, 8], strides = [1, 1]} : vector<16x32xf32> to vector<16x8xf32>
    %39 = vector.shape_cast %38 : vector<16x8xf32> to vector<2x8x8xf32>
    %40 = vector.extract_strided_slice %25 {offsets = [0, 8], sizes = [16, 8], strides = [1, 1]} : vector<16x32xf32> to vector<16x8xf32>
    %41 = vector.shape_cast %40 : vector<16x8xf32> to vector<2x8x8xf32>
    %42 = vector.extract_strided_slice %25 {offsets = [0, 16], sizes = [16, 8], strides = [1, 1]} : vector<16x32xf32> to vector<16x8xf32>
    %43 = vector.shape_cast %42 : vector<16x8xf32> to vector<2x8x8xf32>
    %44 = vector.extract_strided_slice %25 {offsets = [0, 24], sizes = [16, 8], strides = [1, 1]} : vector<16x32xf32> to vector<16x8xf32>
    %45 = vector.shape_cast %44 : vector<16x8xf32> to vector<2x8x8xf32>
    %46 = tpu.concatenate %39, %41, %43, %45 in 0 : vector<2x8x8xf32>, vector<2x8x8xf32>, vector<2x8x8xf32>, vector<2x8x8xf32> -> vector<8x8x8xf32>
    %47 = vector.extract_strided_slice %28 {offsets = [0, 0], sizes = [16, 8], strides = [1, 1]} : vector<16x32xf32> to vector<16x8xf32>
    %48 = vector.shape_cast %47 : vector<16x8xf32> to vector<2x8x8xf32>
    %49 = vector.extract_strided_slice %28 {offsets = [0, 8], sizes = [16, 8], strides = [1, 1]} : vector<16x32xf32> to vector<16x8xf32>
    %50 = vector.shape_cast %49 : vector<16x8xf32> to vector<2x8x8xf32>
    %51 = vector.extract_strided_slice %28 {offsets = [0, 16], sizes = [16, 8], strides = [1, 1]} : vector<16x32xf32> to vector<16x8xf32>
    %52 = vector.shape_cast %51 : vector<16x8xf32> to vector<2x8x8xf32>
    %53 = vector.extract_strided_slice %28 {offsets = [0, 24], sizes = [16, 8], strides = [1, 1]} : vector<16x32xf32> to vector<16x8xf32>
    %54 = vector.shape_cast %53 : vector<16x8xf32> to vector<2x8x8xf32>
    %55 = tpu.concatenate %48, %50, %52, %54 in 0 : vector<2x8x8xf32>, vector<2x8x8xf32>, vector<2x8x8xf32>, vector<2x8x8xf32> -> vector<8x8x8xf32>
    "tpu.trace_start"() <{level = 10 : i32, message = "bqd,bkd->bqk"}> : () -> ()
    %cst_27 = arith.constant dense<0.000000e+00> : vector<8x8x8xf32>
    %56 = tpu.matmul %37, %46, %cst_27 {dimension_numbers = #tpu.dot_dimension_numbers<[2], [2], [1], [1], [0, 0, 0, 1, 1, 1], [0], [0]>} : vector<8x8x8xf32>, vector<8x8x8xf32>, vector<8x8x8xf32> -> vector<8x8x8xf32>
    "tpu.trace_stop"() : () -> ()
    %cst_28 = arith.constant dense<0xFF800000> : vector<8x8xf32>
    %57 = vector.multi_reduction <maximumf>, %56, %cst_28 [2] : vector<8x8x8xf32> to vector<8x8xf32>
    %58 = vector.shape_cast %57 : vector<8x8xf32> to vector<8x8x1xf32>
    %59 = vector.broadcast %58 : vector<8x8x1xf32> to vector<8x8x8xf32>
    %60 = arith.subf %56, %59 : vector<8x8x8xf32>
    %61 = math.exp %60 : vector<8x8x8xf32>
    %cst_29 = arith.constant dense<0.000000e+00> : vector<8x8xf32>
    %62 = vector.multi_reduction <add>, %61, %cst_29 [2] : vector<8x8x8xf32> to vector<8x8xf32>
    %63 = vector.shape_cast %62 : vector<8x8xf32> to vector<8x8x1xf32>
    %64 = tpu.reciprocal %63 {approx = true} : vector<8x8x1xf32> -> vector<8x8x1xf32>
    %65 = vector.broadcast %64 : vector<8x8x1xf32> to vector<8x8x8xf32>
    %66 = arith.mulf %61, %65 : vector<8x8x8xf32>
    "tpu.trace_start"() <{level = 10 : i32, message = "bqk,bkd->bqd"}> : () -> ()
    %cst_30 = arith.constant dense<0.000000e+00> : vector<8x8x8xf32>
    %67 = tpu.matmul %66, %55, %cst_30 {dimension_numbers = #tpu.dot_dimension_numbers<[2], [1], [1], [2], [0, 0, 0, 1, 1, 2], [0], [0]>} : vector<8x8x8xf32>, vector<8x8x8xf32>, vector<8x8x8xf32> -> vector<8x8x8xf32>
    "tpu.trace_stop"() : () -> ()
    %68 = vector.extract_strided_slice %67 {offsets = [0, 0, 0], sizes = [2, 8, 8], strides = [1, 1, 1]} : vector<8x8x8xf32> to vector<2x8x8xf32>
    %69 = vector.shape_cast %68 : vector<2x8x8xf32> to vector<16x8xf32>
    %70 = vector.extract_strided_slice %67 {offsets = [2, 0, 0], sizes = [2, 8, 8], strides = [1, 1, 1]} : vector<8x8x8xf32> to vector<2x8x8xf32>
    %71 = vector.shape_cast %70 : vector<2x8x8xf32> to vector<16x8xf32>
    %72 = vector.extract_strided_slice %67 {offsets = [4, 0, 0], sizes = [2, 8, 8], strides = [1, 1, 1]} : vector<8x8x8xf32> to vector<2x8x8xf32>
    %73 = vector.shape_cast %72 : vector<2x8x8xf32> to vector<16x8xf32>
    %74 = vector.extract_strided_slice %67 {offsets = [6, 0, 0], sizes = [2, 8, 8], strides = [1, 1, 1]} : vector<8x8x8xf32> to vector<2x8x8xf32>
    %75 = vector.shape_cast %74 : vector<2x8x8xf32> to vector<16x8xf32>
    %76 = tpu.concatenate %69, %71, %73, %75 in 1 : vector<16x8xf32>, vector<16x8xf32>, vector<16x8xf32>, vector<16x8xf32> -> vector<16x32xf32>
    %cst_31 = arith.constant dense<0.000000e+00> : vector<16x32xf32>
    %77 = tpu.matmul %76, %7, %cst_31 {dimension_numbers = #tpu.dot_dimension_numbers<[1], [0], [0], [1], [0, 0, 1, 1], [], []>} : vector<16x32xf32>, vector<32x32xf32>, vector<16x32xf32> -> vector<16x32xf32>
    %78 = arith.addf %0, %77 : vector<16x32xf32>
    %79 = vector.extract_strided_slice %9 {offsets = [0, 0], sizes = [1, 32], strides = [1, 1]} : vector<4x32xf32> to vector<1x32xf32>
    %80 = vector.extract_strided_slice %9 {offsets = [1, 0], sizes = [1, 32], strides = [1, 1]} : vector<4x32xf32> to vector<1x32xf32>
    %cst_32 = arith.constant dense<0.000000e+00> : vector<16xf32>
    %81 = vector.multi_reduction <add>, %78, %cst_32 [1] : vector<16x32xf32> to vector<16xf32>
    %82 = vector.shape_cast %81 : vector<16xf32> to vector<16x1xf32>
    %cst_33 = arith.constant 3.200000e+01 : f32
    %83 = vector.broadcast %cst_33 : f32 to vector<16x1xf32>
    %84 = arith.divf %82, %83 : vector<16x1xf32>
    %85 = vector.broadcast %84 : vector<16x1xf32> to vector<16x32xf32>
    %86 = arith.subf %78, %85 : vector<16x32xf32>
    %87 = arith.mulf %86, %86 : vector<16x32xf32>
    %cst_34 = arith.constant dense<0.000000e+00> : vector<16xf32>
    %88 = vector.multi_reduction <add>, %87, %cst_34 [1] : vector<16x32xf32> to vector<16xf32>
    %89 = vector.shape_cast %88 : vector<16xf32> to vector<16x1xf32>
    %cst_35 = arith.constant 3.200000e+01 : f32
    %90 = vector.broadcast %cst_35 : f32 to vector<16x1xf32>
    %91 = arith.divf %89, %90 : vector<16x1xf32>
    %92 = vector.broadcast %84 : vector<16x1xf32> to vector<16x32xf32>
    %93 = arith.subf %78, %92 : vector<16x32xf32>
    %cst_36 = arith.constant 9.99999974E-6 : f32
    %94 = vector.broadcast %cst_36 : f32 to vector<16x1xf32>
    %95 = arith.addf %91, %94 : vector<16x1xf32>
    %96 = math.rsqrt %95 : vector<16x1xf32>
    %97 = vector.broadcast %96 : vector<16x1xf32> to vector<16x32xf32>
    %98 = arith.mulf %93, %97 : vector<16x32xf32>
    %99 = vector.broadcast %79 : vector<1x32xf32> to vector<16x32xf32>
    %100 = arith.mulf %98, %99 : vector<16x32xf32>
    %101 = vector.broadcast %80 : vector<1x32xf32> to vector<16x32xf32>
    %102 = arith.addf %100, %101 : vector<16x32xf32>
    %cst_37 = arith.constant dense<0.000000e+00> : vector<16x128xf32>
    %103 = tpu.matmul %102, %12, %cst_37 {dimension_numbers = #tpu.dot_dimension_numbers<[1], [0], [0], [1], [0, 0, 1, 1], [], []>} : vector<16x32xf32>, vector<32x128xf32>, vector<16x128xf32> -> vector<16x128xf32>
    %104 = vector.broadcast %14 : vector<1x128xf32> to vector<16x128xf32>
    %105 = arith.addf %103, %104 : vector<16x128xf32>
    %cst_38 = arith.constant 0.000000e+00 : f32
    %106 = vector.broadcast %cst_38 : f32 to vector<16x128xf32>
    %107 = arith.cmpf ogt, %105, %106 : vector<16x128xf32>
    %cst_39 = arith.constant 0.00999999977 : f32
    %108 = vector.broadcast %cst_39 : f32 to vector<16x128xf32>
    %109 = arith.mulf %108, %105 : vector<16x128xf32>
    %110 = arith.select %107, %105, %109 : vector<16x128xi1>, vector<16x128xf32>
    %cst_40 = arith.constant dense<0.000000e+00> : vector<16x32xf32>
    %111 = tpu.matmul %110, %17, %cst_40 {dimension_numbers = #tpu.dot_dimension_numbers<[1], [0], [0], [1], [0, 0, 1, 1], [], []>} : vector<16x128xf32>, vector<128x32xf32>, vector<16x32xf32> -> vector<16x32xf32>
    %112 = vector.broadcast %19 : vector<1x32xf32> to vector<16x32xf32>
    %113 = arith.addf %111, %112 : vector<16x32xf32>
    %114 = arith.addf %102, %113 : vector<16x32xf32>
    %115 = vector.extract_strided_slice %9 {offsets = [2, 0], sizes = [1, 32], strides = [1, 1]} : vector<4x32xf32> to vector<1x32xf32>
    %116 = vector.extract_strided_slice %9 {offsets = [3, 0], sizes = [1, 32], strides = [1, 1]} : vector<4x32xf32> to vector<1x32xf32>
    %cst_41 = arith.constant dense<0.000000e+00> : vector<16xf32>
    %117 = vector.multi_reduction <add>, %114, %cst_41 [1] : vector<16x32xf32> to vector<16xf32>
    %118 = vector.shape_cast %117 : vector<16xf32> to vector<16x1xf32>
    %cst_42 = arith.constant 3.200000e+01 : f32
    %119 = vector.broadcast %cst_42 : f32 to vector<16x1xf32>
    %120 = arith.divf %118, %119 : vector<16x1xf32>
    %121 = vector.broadcast %120 : vector<16x1xf32> to vector<16x32xf32>
    %122 = arith.subf %114, %121 : vector<16x32xf32>
    %123 = arith.mulf %122, %122 : vector<16x32xf32>
    %cst_43 = arith.constant dense<0.000000e+00> : vector<16xf32>
    %124 = vector.multi_reduction <add>, %123, %cst_43 [1] : vector<16x32xf32> to vector<16xf32>
    %125 = vector.shape_cast %124 : vector<16xf32> to vector<16x1xf32>
    %cst_44 = arith.constant 3.200000e+01 : f32
    %126 = vector.broadcast %cst_44 : f32 to vector<16x1xf32>
    %127 = arith.divf %125, %126 : vector<16x1xf32>
    %128 = vector.broadcast %120 : vector<16x1xf32> to vector<16x32xf32>
    %129 = arith.subf %114, %128 : vector<16x32xf32>
    %cst_45 = arith.constant 9.99999974E-6 : f32
    %130 = vector.broadcast %cst_45 : f32 to vector<16x1xf32>
    %131 = arith.addf %127, %130 : vector<16x1xf32>
    %132 = math.rsqrt %131 : vector<16x1xf32>
    %133 = vector.broadcast %132 : vector<16x1xf32> to vector<16x32xf32>
    %134 = arith.mulf %129, %133 : vector<16x32xf32>
    %135 = vector.broadcast %115 : vector<1x32xf32> to vector<16x32xf32>
    %136 = arith.mulf %134, %135 : vector<16x32xf32>
    %137 = vector.broadcast %116 : vector<1x32xf32> to vector<16x32xf32>
    %138 = arith.addf %136, %137 : vector<16x32xf32>
    %c1 = arith.constant 1 : index
    %c0_46 = arith.constant 0 : index
    %c0_47 = arith.constant 0 : index
    %c0_48 = arith.constant 0 : index
    %139 = vector.load %arg2[%c1, %c0_46, %c0_47, %c0_48] : memref<3x3x32x32xbf16, #tpu.memory_space<vmem>>, vector<1x3x32x32xbf16>
    %140 = vector.shape_cast %139 : vector<1x3x32x32xbf16> to vector<3x32x32xbf16>
    %141 = arith.extf %140 : vector<3x32x32xbf16> to vector<3x32x32xf32>
    %c1_49 = arith.constant 1 : index
    %c0_50 = arith.constant 0 : index
    %c0_51 = arith.constant 0 : index
    %142 = vector.load %arg3[%c1_49, %c0_50, %c0_51] : memref<3x32x32xbf16, #tpu.memory_space<vmem>>, vector<1x32x32xbf16>
    %143 = vector.shape_cast %142 : vector<1x32x32xbf16> to vector<32x32xbf16>
    %144 = arith.extf %143 : vector<32x32xbf16> to vector<32x32xf32>
    %c1_52 = arith.constant 1 : index
    %c0_53 = arith.constant 0 : index
    %c0_54 = arith.constant 0 : index
    %145 = vector.load %arg4[%c1_52, %c0_53, %c0_54] : memref<3x4x32xf32, #tpu.memory_space<vmem>>, vector<1x4x32xf32>
    %146 = vector.shape_cast %145 : vector<1x4x32xf32> to vector<4x32xf32>
    %c1_55 = arith.constant 1 : index
    %c0_56 = arith.constant 0 : index
    %c0_57 = arith.constant 0 : index
    %147 = vector.load %arg5[%c1_55, %c0_56, %c0_57] : memref<3x32x128xbf16, #tpu.memory_space<vmem>>, vector<1x32x128xbf16>
    %148 = vector.shape_cast %147 : vector<1x32x128xbf16> to vector<32x128xbf16>
    %149 = arith.extf %148 : vector<32x128xbf16> to vector<32x128xf32>
    %c1_58 = arith.constant 1 : index
    %c0_59 = arith.constant 0 : index
    %c0_60 = arith.constant 0 : index
    %150 = vector.load %arg6[%c1_58, %c0_59, %c0_60] : memref<3x1x128xf32, #tpu.memory_space<vmem>>, vector<1x1x128xf32>
    %151 = vector.shape_cast %150 : vector<1x1x128xf32> to vector<1x128xf32>
    %c1_61 = arith.constant 1 : index
    %c0_62 = arith.constant 0 : index
    %c0_63 = arith.constant 0 : index
    %152 = vector.load %arg7[%c1_61, %c0_62, %c0_63] : memref<3x128x32xbf16, #tpu.memory_space<vmem>>, vector<1x128x32xbf16>
    %153 = vector.shape_cast %152 : vector<1x128x32xbf16> to vector<128x32xbf16>
    %154 = arith.extf %153 : vector<128x32xbf16> to vector<128x32xf32>
    %c1_64 = arith.constant 1 : index
    %c0_65 = arith.constant 0 : index
    %c0_66 = arith.constant 0 : index
    %155 = vector.load %arg8[%c1_64, %c0_65, %c0_66] : memref<3x1x32xf32, #tpu.memory_space<vmem>>, vector<1x1x32xf32>
    %156 = vector.shape_cast %155 : vector<1x1x32xf32> to vector<1x32xf32>
    %157 = vector.extract_strided_slice %141 {offsets = [0, 0, 0], sizes = [1, 32, 32], strides = [1, 1, 1]} : vector<3x32x32xf32> to vector<1x32x32xf32>
    %158 = vector.shape_cast %157 : vector<1x32x32xf32> to vector<32x32xf32>
    %cst_67 = arith.constant dense<0.000000e+00> : vector<32x32xf32>
    %159 = tpu.matmul %1, %158, %cst_67 {dimension_numbers = #tpu.dot_dimension_numbers<[1], [0], [0], [1], [0, 0, 1, 1], [], []>} : vector<32x32xf32>, vector<32x32xf32>, vector<32x32xf32> -> vector<32x32xf32>
    %160 = vector.extract_strided_slice %141 {offsets = [1, 0, 0], sizes = [1, 32, 32], strides = [1, 1, 1]} : vector<3x32x32xf32> to vector<1x32x32xf32>
    %161 = vector.shape_cast %160 : vector<1x32x32xf32> to vector<32x32xf32>
    %cst_68 = arith.constant dense<0.000000e+00> : vector<32x32xf32>
    %162 = tpu.matmul %1, %161, %cst_68 {dimension_numbers = #tpu.dot_dimension_numbers<[1], [0], [0], [1], [0, 0, 1, 1], [], []>} : vector<32x32xf32>, vector<32x32xf32>, vector<32x32xf32> -> vector<32x32xf32>
    %163 = vector.extract_strided_slice %141 {offsets = [2, 0, 0], sizes = [1, 32, 32], strides = [1, 1, 1]} : vector<3x32x32xf32> to vector<1x32x32xf32>
    %164 = vector.shape_cast %163 : vector<1x32x32xf32> to vector<32x32xf32>
    %cst_69 = arith.constant dense<0.000000e+00> : vector<32x32xf32>
    %165 = tpu.matmul %1, %164, %cst_69 {dimension_numbers = #tpu.dot_dimension_numbers<[1], [0], [0], [1], [0, 0, 1, 1], [], []>} : vector<32x32xf32>, vector<32x32xf32>, vector<32x32xf32> -> vector<32x32xf32>
    %166 = vector.extract_strided_slice %159 {offsets = [0, 0], sizes = [32, 8], strides = [1, 1]} : vector<32x32xf32> to vector<32x8xf32>
    %167 = vector.shape_cast %166 : vector<32x8xf32> to vector<2x16x8xf32>
    %168 = vector.extract_strided_slice %159 {offsets = [0, 8], sizes = [32, 8], strides = [1, 1]} : vector<32x32xf32> to vector<32x8xf32>
    %169 = vector.shape_cast %168 : vector<32x8xf32> to vector<2x16x8xf32>
    %170 = vector.extract_strided_slice %159 {offsets = [0, 16], sizes = [32, 8], strides = [1, 1]} : vector<32x32xf32> to vector<32x8xf32>
    %171 = vector.shape_cast %170 : vector<32x8xf32> to vector<2x16x8xf32>
    %172 = vector.extract_strided_slice %159 {offsets = [0, 24], sizes = [32, 8], strides = [1, 1]} : vector<32x32xf32> to vector<32x8xf32>
    %173 = vector.shape_cast %172 : vector<32x8xf32> to vector<2x16x8xf32>
    %174 = tpu.concatenate %167, %169, %171, %173 in 0 : vector<2x16x8xf32>, vector<2x16x8xf32>, vector<2x16x8xf32>, vector<2x16x8xf32> -> vector<8x16x8xf32>
    %175 = vector.extract_strided_slice %162 {offsets = [0, 0], sizes = [32, 8], strides = [1, 1]} : vector<32x32xf32> to vector<32x8xf32>
    %176 = vector.shape_cast %175 : vector<32x8xf32> to vector<2x16x8xf32>
    %177 = vector.extract_strided_slice %162 {offsets = [0, 8], sizes = [32, 8], strides = [1, 1]} : vector<32x32xf32> to vector<32x8xf32>
    %178 = vector.shape_cast %177 : vector<32x8xf32> to vector<2x16x8xf32>
    %179 = vector.extract_strided_slice %162 {offsets = [0, 16], sizes = [32, 8], strides = [1, 1]} : vector<32x32xf32> to vector<32x8xf32>
    %180 = vector.shape_cast %179 : vector<32x8xf32> to vector<2x16x8xf32>
    %181 = vector.extract_strided_slice %162 {offsets = [0, 24], sizes = [32, 8], strides = [1, 1]} : vector<32x32xf32> to vector<32x8xf32>
    %182 = vector.shape_cast %181 : vector<32x8xf32> to vector<2x16x8xf32>
    %183 = tpu.concatenate %176, %178, %180, %182 in 0 : vector<2x16x8xf32>, vector<2x16x8xf32>, vector<2x16x8xf32>, vector<2x16x8xf32> -> vector<8x16x8xf32>
    %184 = vector.extract_strided_slice %165 {offsets = [0, 0], sizes = [32, 8], strides = [1, 1]} : vector<32x32xf32> to vector<32x8xf32>
    %185 = vector.shape_cast %184 : vector<32x8xf32> to vector<2x16x8xf32>
    %186 = vector.extract_strided_slice %165 {offsets = [0, 8], sizes = [32, 8], strides = [1, 1]} : vector<32x32xf32> to vector<32x8xf32>
    %187 = vector.shape_cast %186 : vector<32x8xf32> to vector<2x16x8xf32>
    %188 = vector.extract_strided_slice %165 {offsets = [0, 16], sizes = [32, 8], strides = [1, 1]} : vector<32x32xf32> to vector<32x8xf32>
    %189 = vector.shape_cast %188 : vector<32x8xf32> to vector<2x16x8xf32>
    %190 = vector.extract_strided_slice %165 {offsets = [0, 24], sizes = [32, 8], strides = [1, 1]} : vector<32x32xf32> to vector<32x8xf32>
    %191 = vector.shape_cast %190 : vector<32x8xf32> to vector<2x16x8xf32>
    %192 = tpu.concatenate %185, %187, %189, %191 in 0 : vector<2x16x8xf32>, vector<2x16x8xf32>, vector<2x16x8xf32>, vector<2x16x8xf32> -> vector<8x16x8xf32>
    "tpu.trace_start"() <{level = 10 : i32, message = "bqd,bkd->bqk"}> : () -> ()
    %cst_70 = arith.constant dense<0.000000e+00> : vector<8x16x16xf32>
    %193 = tpu.matmul %174, %183, %cst_70 {dimension_numbers = #tpu.dot_dimension_numbers<[2], [2], [1], [1], [0, 0, 0, 1, 1, 1], [0], [0]>} : vector<8x16x8xf32>, vector<8x16x8xf32>, vector<8x16x16xf32> -> vector<8x16x16xf32>
    "tpu.trace_stop"() : () -> ()
    %cst_71 = arith.constant dense<0xFF800000> : vector<8x16xf32>
    %194 = vector.multi_reduction <maximumf>, %193, %cst_71 [2] : vector<8x16x16xf32> to vector<8x16xf32>
    %195 = vector.shape_cast %194 : vector<8x16xf32> to vector<8x16x1xf32>
    %196 = vector.broadcast %195 : vector<8x16x1xf32> to vector<8x16x16xf32>
    %197 = arith.subf %193, %196 : vector<8x16x16xf32>
    %198 = math.exp %197 : vector<8x16x16xf32>
    %cst_72 = arith.constant dense<0.000000e+00> : vector<8x16xf32>
    %199 = vector.multi_reduction <add>, %198, %cst_72 [2] : vector<8x16x16xf32> to vector<8x16xf32>
    %200 = vector.shape_cast %199 : vector<8x16xf32> to vector<8x16x1xf32>
    %201 = tpu.reciprocal %200 {approx = true} : vector<8x16x1xf32> -> vector<8x16x1xf32>
    %202 = vector.broadcast %201 : vector<8x16x1xf32> to vector<8x16x16xf32>
    %203 = arith.mulf %198, %202 : vector<8x16x16xf32>
    "tpu.trace_start"() <{level = 10 : i32, message = "bqk,bkd->bqd"}> : () -> ()
    %cst_73 = arith.constant dense<0.000000e+00> : vector<8x16x8xf32>
    %204 = tpu.matmul %203, %192, %cst_73 {dimension_numbers = #tpu.dot_dimension_numbers<[2], [1], [1], [2], [0, 0, 0, 1, 1, 2], [0], [0]>} : vector<8x16x16xf32>, vector<8x16x8xf32>, vector<8x16x8xf32> -> vector<8x16x8xf32>
    "tpu.trace_stop"() : () -> ()
    %205 = vector.extract_strided_slice %204 {offsets = [0, 0, 0], sizes = [2, 16, 8], strides = [1, 1, 1]} : vector<8x16x8xf32> to vector<2x16x8xf32>
    %206 = vector.shape_cast %205 : vector<2x16x8xf32> to vector<32x8xf32>
    %207 = vector.extract_strided_slice %204 {offsets = [2, 0, 0], sizes = [2, 16, 8], strides = [1, 1, 1]} : vector<8x16x8xf32> to vector<2x16x8xf32>
    %208 = vector.shape_cast %207 : vector<2x16x8xf32> to vector<32x8xf32>
    %209 = vector.extract_strided_slice %204 {offsets = [4, 0, 0], sizes = [2, 16, 8], strides = [1, 1, 1]} : vector<8x16x8xf32> to vector<2x16x8xf32>
    %210 = vector.shape_cast %209 : vector<2x16x8xf32> to vector<32x8xf32>
    %211 = vector.extract_strided_slice %204 {offsets = [6, 0, 0], sizes = [2, 16, 8], strides = [1, 1, 1]} : vector<8x16x8xf32> to vector<2x16x8xf32>
    %212 = vector.shape_cast %211 : vector<2x16x8xf32> to vector<32x8xf32>
    %213 = tpu.concatenate %206, %208, %210, %212 in 1 : vector<32x8xf32>, vector<32x8xf32>, vector<32x8xf32>, vector<32x8xf32> -> vector<32x32xf32>
    %cst_74 = arith.constant dense<0.000000e+00> : vector<32x32xf32>
    %214 = tpu.matmul %213, %144, %cst_74 {dimension_numbers = #tpu.dot_dimension_numbers<[1], [0], [0], [1], [0, 0, 1, 1], [], []>} : vector<32x32xf32>, vector<32x32xf32>, vector<32x32xf32> -> vector<32x32xf32>
    %215 = arith.addf %1, %214 : vector<32x32xf32>
    %216 = vector.extract_strided_slice %146 {offsets = [0, 0], sizes = [1, 32], strides = [1, 1]} : vector<4x32xf32> to vector<1x32xf32>
    %217 = vector.extract_strided_slice %146 {offsets = [1, 0], sizes = [1, 32], strides = [1, 1]} : vector<4x32xf32> to vector<1x32xf32>
    %cst_75 = arith.constant dense<0.000000e+00> : vector<32xf32>
    %218 = vector.multi_reduction <add>, %215, %cst_75 [1] : vector<32x32xf32> to vector<32xf32>
    %219 = vector.shape_cast %218 : vector<32xf32> to vector<32x1xf32>
    %cst_76 = arith.constant 3.200000e+01 : f32
    %220 = vector.broadcast %cst_76 : f32 to vector<32x1xf32>
    %221 = arith.divf %219, %220 : vector<32x1xf32>
    %222 = vector.broadcast %221 : vector<32x1xf32> to vector<32x32xf32>
    %223 = arith.subf %215, %222 : vector<32x32xf32>
    %224 = arith.mulf %223, %223 : vector<32x32xf32>
    %cst_77 = arith.constant dense<0.000000e+00> : vector<32xf32>
    %225 = vector.multi_reduction <add>, %224, %cst_77 [1] : vector<32x32xf32> to vector<32xf32>
    %226 = vector.shape_cast %225 : vector<32xf32> to vector<32x1xf32>
    %cst_78 = arith.constant 3.200000e+01 : f32
    %227 = vector.broadcast %cst_78 : f32 to vector<32x1xf32>
    %228 = arith.divf %226, %227 : vector<32x1xf32>
    %229 = vector.broadcast %221 : vector<32x1xf32> to vector<32x32xf32>
    %230 = arith.subf %215, %229 : vector<32x32xf32>
    %cst_79 = arith.constant 9.99999974E-6 : f32
    %231 = vector.broadcast %cst_79 : f32 to vector<32x1xf32>
    %232 = arith.addf %228, %231 : vector<32x1xf32>
    %233 = math.rsqrt %232 : vector<32x1xf32>
    %234 = vector.broadcast %233 : vector<32x1xf32> to vector<32x32xf32>
    %235 = arith.mulf %230, %234 : vector<32x32xf32>
    %236 = vector.broadcast %216 : vector<1x32xf32> to vector<32x32xf32>
    %237 = arith.mulf %235, %236 : vector<32x32xf32>
    %238 = vector.broadcast %217 : vector<1x32xf32> to vector<32x32xf32>
    %239 = arith.addf %237, %238 : vector<32x32xf32>
    %cst_80 = arith.constant dense<0.000000e+00> : vector<32x128xf32>
    %240 = tpu.matmul %239, %149, %cst_80 {dimension_numbers = #tpu.dot_dimension_numbers<[1], [0], [0], [1], [0, 0, 1, 1], [], []>} : vector<32x32xf32>, vector<32x128xf32>, vector<32x128xf32> -> vector<32x128xf32>
    %241 = vector.broadcast %151 : vector<1x128xf32> to vector<32x128xf32>
    %242 = arith.addf %240, %241 : vector<32x128xf32>
    %cst_81 = arith.constant 0.000000e+00 : f32
    %243 = vector.broadcast %cst_81 : f32 to vector<32x128xf32>
    %244 = arith.cmpf ogt, %242, %243 : vector<32x128xf32>
    %cst_82 = arith.constant 0.00999999977 : f32
    %245 = vector.broadcast %cst_82 : f32 to vector<32x128xf32>
    %246 = arith.mulf %245, %242 : vector<32x128xf32>
    %247 = arith.select %244, %242, %246 : vector<32x128xi1>, vector<32x128xf32>
    %cst_83 = arith.constant dense<0.000000e+00> : vector<32x32xf32>
    %248 = tpu.matmul %247, %154, %cst_83 {dimension_numbers = #tpu.dot_dimension_numbers<[1], [0], [0], [1], [0, 0, 1, 1], [], []>} : vector<32x128xf32>, vector<128x32xf32>, vector<32x32xf32> -> vector<32x32xf32>
    %249 = vector.broadcast %156 : vector<1x32xf32> to vector<32x32xf32>
    %250 = arith.addf %248, %249 : vector<32x32xf32>
    %251 = arith.addf %239, %250 : vector<32x32xf32>
    %252 = vector.extract_strided_slice %146 {offsets = [2, 0], sizes = [1, 32], strides = [1, 1]} : vector<4x32xf32> to vector<1x32xf32>
    %253 = vector.extract_strided_slice %146 {offsets = [3, 0], sizes = [1, 32], strides = [1, 1]} : vector<4x32xf32> to vector<1x32xf32>
    %cst_84 = arith.constant dense<0.000000e+00> : vector<32xf32>
    %254 = vector.multi_reduction <add>, %251, %cst_84 [1] : vector<32x32xf32> to vector<32xf32>
    %255 = vector.shape_cast %254 : vector<32xf32> to vector<32x1xf32>
    %cst_85 = arith.constant 3.200000e+01 : f32
    %256 = vector.broadcast %cst_85 : f32 to vector<32x1xf32>
    %257 = arith.divf %255, %256 : vector<32x1xf32>
    %258 = vector.broadcast %257 : vector<32x1xf32> to vector<32x32xf32>
    %259 = arith.subf %251, %258 : vector<32x32xf32>
    %260 = arith.mulf %259, %259 : vector<32x32xf32>
    %cst_86 = arith.constant dense<0.000000e+00> : vector<32xf32>
    %261 = vector.multi_reduction <add>, %260, %cst_86 [1] : vector<32x32xf32> to vector<32xf32>
    %262 = vector.shape_cast %261 : vector<32xf32> to vector<32x1xf32>
    %cst_87 = arith.constant 3.200000e+01 : f32
    %263 = vector.broadcast %cst_87 : f32 to vector<32x1xf32>
    %264 = arith.divf %262, %263 : vector<32x1xf32>
    %265 = vector.broadcast %257 : vector<32x1xf32> to vector<32x32xf32>
    %266 = arith.subf %251, %265 : vector<32x32xf32>
    %cst_88 = arith.constant 9.99999974E-6 : f32
    %267 = vector.broadcast %cst_88 : f32 to vector<32x1xf32>
    %268 = arith.addf %264, %267 : vector<32x1xf32>
    %269 = math.rsqrt %268 : vector<32x1xf32>
    %270 = vector.broadcast %269 : vector<32x1xf32> to vector<32x32xf32>
    %271 = arith.mulf %266, %270 : vector<32x32xf32>
    %272 = vector.broadcast %252 : vector<1x32xf32> to vector<32x32xf32>
    %273 = arith.mulf %271, %272 : vector<32x32xf32>
    %274 = vector.broadcast %253 : vector<1x32xf32> to vector<32x32xf32>
    %275 = arith.addf %273, %274 : vector<32x32xf32>
    %c2 = arith.constant 2 : index
    %c0_89 = arith.constant 0 : index
    %c0_90 = arith.constant 0 : index
    %c0_91 = arith.constant 0 : index
    %276 = vector.load %arg2[%c2, %c0_89, %c0_90, %c0_91] : memref<3x3x32x32xbf16, #tpu.memory_space<vmem>>, vector<1x3x32x32xbf16>
    %277 = vector.shape_cast %276 : vector<1x3x32x32xbf16> to vector<3x32x32xbf16>
    %278 = arith.extf %277 : vector<3x32x32xbf16> to vector<3x32x32xf32>
    %c2_92 = arith.constant 2 : index
    %c0_93 = arith.constant 0 : index
    %c0_94 = arith.constant 0 : index
    %279 = vector.load %arg3[%c2_92, %c0_93, %c0_94] : memref<3x32x32xbf16, #tpu.memory_space<vmem>>, vector<1x32x32xbf16>
    %280 = vector.shape_cast %279 : vector<1x32x32xbf16> to vector<32x32xbf16>
    %281 = arith.extf %280 : vector<32x32xbf16> to vector<32x32xf32>
    %c2_95 = arith.constant 2 : index
    %c0_96 = arith.constant 0 : index
    %c0_97 = arith.constant 0 : index
    %282 = vector.load %arg4[%c2_95, %c0_96, %c0_97] : memref<3x4x32xf32, #tpu.memory_space<vmem>>, vector<1x4x32xf32>
    %283 = vector.shape_cast %282 : vector<1x4x32xf32> to vector<4x32xf32>
    %c2_98 = arith.constant 2 : index
    %c0_99 = arith.constant 0 : index
    %c0_100 = arith.constant 0 : index
    %284 = vector.load %arg5[%c2_98, %c0_99, %c0_100] : memref<3x32x128xbf16, #tpu.memory_space<vmem>>, vector<1x32x128xbf16>
    %285 = vector.shape_cast %284 : vector<1x32x128xbf16> to vector<32x128xbf16>
    %286 = arith.extf %285 : vector<32x128xbf16> to vector<32x128xf32>
    %c2_101 = arith.constant 2 : index
    %c0_102 = arith.constant 0 : index
    %c0_103 = arith.constant 0 : index
    %287 = vector.load %arg6[%c2_101, %c0_102, %c0_103] : memref<3x1x128xf32, #tpu.memory_space<vmem>>, vector<1x1x128xf32>
    %288 = vector.shape_cast %287 : vector<1x1x128xf32> to vector<1x128xf32>
    %c2_104 = arith.constant 2 : index
    %c0_105 = arith.constant 0 : index
    %c0_106 = arith.constant 0 : index
    %289 = vector.load %arg7[%c2_104, %c0_105, %c0_106] : memref<3x128x32xbf16, #tpu.memory_space<vmem>>, vector<1x128x32xbf16>
    %290 = vector.shape_cast %289 : vector<1x128x32xbf16> to vector<128x32xbf16>
    %291 = arith.extf %290 : vector<128x32xbf16> to vector<128x32xf32>
    %c2_107 = arith.constant 2 : index
    %c0_108 = arith.constant 0 : index
    %c0_109 = arith.constant 0 : index
    %292 = vector.load %arg8[%c2_107, %c0_108, %c0_109] : memref<3x1x32xf32, #tpu.memory_space<vmem>>, vector<1x1x32xf32>
    %293 = vector.shape_cast %292 : vector<1x1x32xf32> to vector<1x32xf32>
    %294 = vector.extract_strided_slice %278 {offsets = [0, 0, 0], sizes = [1, 32, 32], strides = [1, 1, 1]} : vector<3x32x32xf32> to vector<1x32x32xf32>
    %295 = vector.shape_cast %294 : vector<1x32x32xf32> to vector<32x32xf32>
    %cst_110 = arith.constant dense<0.000000e+00> : vector<16x32xf32>
    %296 = tpu.matmul %138, %295, %cst_110 {dimension_numbers = #tpu.dot_dimension_numbers<[1], [0], [0], [1], [0, 0, 1, 1], [], []>} : vector<16x32xf32>, vector<32x32xf32>, vector<16x32xf32> -> vector<16x32xf32>
    %297 = vector.extract_strided_slice %278 {offsets = [1, 0, 0], sizes = [1, 32, 32], strides = [1, 1, 1]} : vector<3x32x32xf32> to vector<1x32x32xf32>
    %298 = vector.shape_cast %297 : vector<1x32x32xf32> to vector<32x32xf32>
    %cst_111 = arith.constant dense<0.000000e+00> : vector<32x32xf32>
    %299 = tpu.matmul %275, %298, %cst_111 {dimension_numbers = #tpu.dot_dimension_numbers<[1], [0], [0], [1], [0, 0, 1, 1], [], []>} : vector<32x32xf32>, vector<32x32xf32>, vector<32x32xf32> -> vector<32x32xf32>
    %300 = vector.extract_strided_slice %278 {offsets = [2, 0, 0], sizes = [1, 32, 32], strides = [1, 1, 1]} : vector<3x32x32xf32> to vector<1x32x32xf32>
    %301 = vector.shape_cast %300 : vector<1x32x32xf32> to vector<32x32xf32>
    %cst_112 = arith.constant dense<0.000000e+00> : vector<32x32xf32>
    %302 = tpu.matmul %275, %301, %cst_112 {dimension_numbers = #tpu.dot_dimension_numbers<[1], [0], [0], [1], [0, 0, 1, 1], [], []>} : vector<32x32xf32>, vector<32x32xf32>, vector<32x32xf32> -> vector<32x32xf32>
    %303 = vector.extract_strided_slice %296 {offsets = [0, 0], sizes = [16, 8], strides = [1, 1]} : vector<16x32xf32> to vector<16x8xf32>
    %304 = vector.shape_cast %303 : vector<16x8xf32> to vector<2x8x8xf32>
    %305 = vector.extract_strided_slice %296 {offsets = [0, 8], sizes = [16, 8], strides = [1, 1]} : vector<16x32xf32> to vector<16x8xf32>
    %306 = vector.shape_cast %305 : vector<16x8xf32> to vector<2x8x8xf32>
    %307 = vector.extract_strided_slice %296 {offsets = [0, 16], sizes = [16, 8], strides = [1, 1]} : vector<16x32xf32> to vector<16x8xf32>
    %308 = vector.shape_cast %307 : vector<16x8xf32> to vector<2x8x8xf32>
    %309 = vector.extract_strided_slice %296 {offsets = [0, 24], sizes = [16, 8], strides = [1, 1]} : vector<16x32xf32> to vector<16x8xf32>
    %310 = vector.shape_cast %309 : vector<16x8xf32> to vector<2x8x8xf32>
    %311 = tpu.concatenate %304, %306, %308, %310 in 0 : vector<2x8x8xf32>, vector<2x8x8xf32>, vector<2x8x8xf32>, vector<2x8x8xf32> -> vector<8x8x8xf32>
    %312 = vector.extract_strided_slice %299 {offsets = [0, 0], sizes = [32, 8], strides = [1, 1]} : vector<32x32xf32> to vector<32x8xf32>
    %313 = vector.shape_cast %312 : vector<32x8xf32> to vector<2x16x8xf32>
    %314 = vector.extract_strided_slice %299 {offsets = [0, 8], sizes = [32, 8], strides = [1, 1]} : vector<32x32xf32> to vector<32x8xf32>
    %315 = vector.shape_cast %314 : vector<32x8xf32> to vector<2x16x8xf32>
    %316 = vector.extract_strided_slice %299 {offsets = [0, 16], sizes = [32, 8], strides = [1, 1]} : vector<32x32xf32> to vector<32x8xf32>
    %317 = vector.shape_cast %316 : vector<32x8xf32> to vector<2x16x8xf32>
    %318 = vector.extract_strided_slice %299 {offsets = [0, 24], sizes = [32, 8], strides = [1, 1]} : vector<32x32xf32> to vector<32x8xf32>
    %319 = vector.shape_cast %318 : vector<32x8xf32> to vector<2x16x8xf32>
    %320 = tpu.concatenate %313, %315, %317, %319 in 0 : vector<2x16x8xf32>, vector<2x16x8xf32>, vector<2x16x8xf32>, vector<2x16x8xf32> -> vector<8x16x8xf32>
    %321 = vector.extract_strided_slice %302 {offsets = [0, 0], sizes = [32, 8], strides = [1, 1]} : vector<32x32xf32> to vector<32x8xf32>
    %322 = vector.shape_cast %321 : vector<32x8xf32> to vector<2x16x8xf32>
    %323 = vector.extract_strided_slice %302 {offsets = [0, 8], sizes = [32, 8], strides = [1, 1]} : vector<32x32xf32> to vector<32x8xf32>
    %324 = vector.shape_cast %323 : vector<32x8xf32> to vector<2x16x8xf32>
    %325 = vector.extract_strided_slice %302 {offsets = [0, 16], sizes = [32, 8], strides = [1, 1]} : vector<32x32xf32> to vector<32x8xf32>
    %326 = vector.shape_cast %325 : vector<32x8xf32> to vector<2x16x8xf32>
    %327 = vector.extract_strided_slice %302 {offsets = [0, 24], sizes = [32, 8], strides = [1, 1]} : vector<32x32xf32> to vector<32x8xf32>
    %328 = vector.shape_cast %327 : vector<32x8xf32> to vector<2x16x8xf32>
    %329 = tpu.concatenate %322, %324, %326, %328 in 0 : vector<2x16x8xf32>, vector<2x16x8xf32>, vector<2x16x8xf32>, vector<2x16x8xf32> -> vector<8x16x8xf32>
    "tpu.trace_start"() <{level = 10 : i32, message = "bqd,bkd->bqk"}> : () -> ()
    %cst_113 = arith.constant dense<0.000000e+00> : vector<8x8x16xf32>
    %330 = tpu.matmul %311, %320, %cst_113 {dimension_numbers = #tpu.dot_dimension_numbers<[2], [2], [1], [1], [0, 0, 0, 1, 1, 1], [0], [0]>} : vector<8x8x8xf32>, vector<8x16x8xf32>, vector<8x8x16xf32> -> vector<8x8x16xf32>
    "tpu.trace_stop"() : () -> ()
    %cst_114 = arith.constant dense<0xFF800000> : vector<8x8xf32>
    %331 = vector.multi_reduction <maximumf>, %330, %cst_114 [2] : vector<8x8x16xf32> to vector<8x8xf32>
    %332 = vector.shape_cast %331 : vector<8x8xf32> to vector<8x8x1xf32>
    %333 = vector.broadcast %332 : vector<8x8x1xf32> to vector<8x8x16xf32>
    %334 = arith.subf %330, %333 : vector<8x8x16xf32>
    %335 = math.exp %334 : vector<8x8x16xf32>
    %cst_115 = arith.constant dense<0.000000e+00> : vector<8x8xf32>
    %336 = vector.multi_reduction <add>, %335, %cst_115 [2] : vector<8x8x16xf32> to vector<8x8xf32>
    %337 = vector.shape_cast %336 : vector<8x8xf32> to vector<8x8x1xf32>
    %338 = tpu.reciprocal %337 {approx = true} : vector<8x8x1xf32> -> vector<8x8x1xf32>
    %339 = vector.broadcast %338 : vector<8x8x1xf32> to vector<8x8x16xf32>
    %340 = arith.mulf %335, %339 : vector<8x8x16xf32>
    "tpu.trace_start"() <{level = 10 : i32, message = "bqk,bkd->bqd"}> : () -> ()
    %cst_116 = arith.constant dense<0.000000e+00> : vector<8x8x8xf32>
    %341 = tpu.matmul %340, %329, %cst_116 {dimension_numbers = #tpu.dot_dimension_numbers<[2], [1], [1], [2], [0, 0, 0, 1, 1, 2], [0], [0]>} : vector<8x8x16xf32>, vector<8x16x8xf32>, vector<8x8x8xf32> -> vector<8x8x8xf32>
    "tpu.trace_stop"() : () -> ()
    %342 = vector.extract_strided_slice %341 {offsets = [0, 0, 0], sizes = [2, 8, 8], strides = [1, 1, 1]} : vector<8x8x8xf32> to vector<2x8x8xf32>
    %343 = vector.shape_cast %342 : vector<2x8x8xf32> to vector<16x8xf32>
    %344 = vector.extract_strided_slice %341 {offsets = [2, 0, 0], sizes = [2, 8, 8], strides = [1, 1, 1]} : vector<8x8x8xf32> to vector<2x8x8xf32>
    %345 = vector.shape_cast %344 : vector<2x8x8xf32> to vector<16x8xf32>
    %346 = vector.extract_strided_slice %341 {offsets = [4, 0, 0], sizes = [2, 8, 8], strides = [1, 1, 1]} : vector<8x8x8xf32> to vector<2x8x8xf32>
    %347 = vector.shape_cast %346 : vector<2x8x8xf32> to vector<16x8xf32>
    %348 = vector.extract_strided_slice %341 {offsets = [6, 0, 0], sizes = [2, 8, 8], strides = [1, 1, 1]} : vector<8x8x8xf32> to vector<2x8x8xf32>
    %349 = vector.shape_cast %348 : vector<2x8x8xf32> to vector<16x8xf32>
    %350 = tpu.concatenate %343, %345, %347, %349 in 1 : vector<16x8xf32>, vector<16x8xf32>, vector<16x8xf32>, vector<16x8xf32> -> vector<16x32xf32>
    %cst_117 = arith.constant dense<0.000000e+00> : vector<16x32xf32>
    %351 = tpu.matmul %350, %281, %cst_117 {dimension_numbers = #tpu.dot_dimension_numbers<[1], [0], [0], [1], [0, 0, 1, 1], [], []>} : vector<16x32xf32>, vector<32x32xf32>, vector<16x32xf32> -> vector<16x32xf32>
    %352 = arith.addf %138, %351 : vector<16x32xf32>
    %353 = vector.extract_strided_slice %283 {offsets = [0, 0], sizes = [1, 32], strides = [1, 1]} : vector<4x32xf32> to vector<1x32xf32>
    %354 = vector.extract_strided_slice %283 {offsets = [1, 0], sizes = [1, 32], strides = [1, 1]} : vector<4x32xf32> to vector<1x32xf32>
    %cst_118 = arith.constant dense<0.000000e+00> : vector<16xf32>
    %355 = vector.multi_reduction <add>, %352, %cst_118 [1] : vector<16x32xf32> to vector<16xf32>
    %356 = vector.shape_cast %355 : vector<16xf32> to vector<16x1xf32>
    %cst_119 = arith.constant 3.200000e+01 : f32
    %357 = vector.broadcast %cst_119 : f32 to vector<16x1xf32>
    %358 = arith.divf %356, %357 : vector<16x1xf32>
    %359 = vector.broadcast %358 : vector<16x1xf32> to vector<16x32xf32>
    %360 = arith.subf %352, %359 : vector<16x32xf32>
    %361 = arith.mulf %360, %360 : vector<16x32xf32>
    %cst_120 = arith.constant dense<0.000000e+00> : vector<16xf32>
    %362 = vector.multi_reduction <add>, %361, %cst_120 [1] : vector<16x32xf32> to vector<16xf32>
    %363 = vector.shape_cast %362 : vector<16xf32> to vector<16x1xf32>
    %cst_121 = arith.constant 3.200000e+01 : f32
    %364 = vector.broadcast %cst_121 : f32 to vector<16x1xf32>
    %365 = arith.divf %363, %364 : vector<16x1xf32>
    %366 = vector.broadcast %358 : vector<16x1xf32> to vector<16x32xf32>
    %367 = arith.subf %352, %366 : vector<16x32xf32>
    %cst_122 = arith.constant 9.99999974E-6 : f32
    %368 = vector.broadcast %cst_122 : f32 to vector<16x1xf32>
    %369 = arith.addf %365, %368 : vector<16x1xf32>
    %370 = math.rsqrt %369 : vector<16x1xf32>
    %371 = vector.broadcast %370 : vector<16x1xf32> to vector<16x32xf32>
    %372 = arith.mulf %367, %371 : vector<16x32xf32>
    %373 = vector.broadcast %353 : vector<1x32xf32> to vector<16x32xf32>
    %374 = arith.mulf %372, %373 : vector<16x32xf32>
    %375 = vector.broadcast %354 : vector<1x32xf32> to vector<16x32xf32>
    %376 = arith.addf %374, %375 : vector<16x32xf32>
    %cst_123 = arith.constant dense<0.000000e+00> : vector<16x128xf32>
    %377 = tpu.matmul %376, %286, %cst_123 {dimension_numbers = #tpu.dot_dimension_numbers<[1], [0], [0], [1], [0, 0, 1, 1], [], []>} : vector<16x32xf32>, vector<32x128xf32>, vector<16x128xf32> -> vector<16x128xf32>
    %378 = vector.broadcast %288 : vector<1x128xf32> to vector<16x128xf32>
    %379 = arith.addf %377, %378 : vector<16x128xf32>
    %cst_124 = arith.constant 0.000000e+00 : f32
    %380 = vector.broadcast %cst_124 : f32 to vector<16x128xf32>
    %381 = arith.cmpf ogt, %379, %380 : vector<16x128xf32>
    %cst_125 = arith.constant 0.00999999977 : f32
    %382 = vector.broadcast %cst_125 : f32 to vector<16x128xf32>
    %383 = arith.mulf %382, %379 : vector<16x128xf32>
    %384 = arith.select %381, %379, %383 : vector<16x128xi1>, vector<16x128xf32>
    %cst_126 = arith.constant dense<0.000000e+00> : vector<16x32xf32>
    %385 = tpu.matmul %384, %291, %cst_126 {dimension_numbers = #tpu.dot_dimension_numbers<[1], [0], [0], [1], [0, 0, 1, 1], [], []>} : vector<16x128xf32>, vector<128x32xf32>, vector<16x32xf32> -> vector<16x32xf32>
    %386 = vector.broadcast %293 : vector<1x32xf32> to vector<16x32xf32>
    %387 = arith.addf %385, %386 : vector<16x32xf32>
    %388 = arith.addf %376, %387 : vector<16x32xf32>
    %389 = vector.extract_strided_slice %283 {offsets = [2, 0], sizes = [1, 32], strides = [1, 1]} : vector<4x32xf32> to vector<1x32xf32>
    %390 = vector.extract_strided_slice %283 {offsets = [3, 0], sizes = [1, 32], strides = [1, 1]} : vector<4x32xf32> to vector<1x32xf32>
    %cst_127 = arith.constant dense<0.000000e+00> : vector<16xf32>
    %391 = vector.multi_reduction <add>, %388, %cst_127 [1] : vector<16x32xf32> to vector<16xf32>
    %392 = vector.shape_cast %391 : vector<16xf32> to vector<16x1xf32>
    %cst_128 = arith.constant 3.200000e+01 : f32
    %393 = vector.broadcast %cst_128 : f32 to vector<16x1xf32>
    %394 = arith.divf %392, %393 : vector<16x1xf32>
    %395 = vector.broadcast %394 : vector<16x1xf32> to vector<16x32xf32>
    %396 = arith.subf %388, %395 : vector<16x32xf32>
    %397 = arith.mulf %396, %396 : vector<16x32xf32>
    %cst_129 = arith.constant dense<0.000000e+00> : vector<16xf32>
    %398 = vector.multi_reduction <add>, %397, %cst_129 [1] : vector<16x32xf32> to vector<16xf32>
    %399 = vector.shape_cast %398 : vector<16xf32> to vector<16x1xf32>
    %cst_130 = arith.constant 3.200000e+01 : f32
    %400 = vector.broadcast %cst_130 : f32 to vector<16x1xf32>
    %401 = arith.divf %399, %400 : vector<16x1xf32>
    %402 = vector.broadcast %394 : vector<16x1xf32> to vector<16x32xf32>
    %403 = arith.subf %388, %402 : vector<16x32xf32>
    %cst_131 = arith.constant 9.99999974E-6 : f32
    %404 = vector.broadcast %cst_131 : f32 to vector<16x1xf32>
    %405 = arith.addf %401, %404 : vector<16x1xf32>
    %406 = math.rsqrt %405 : vector<16x1xf32>
    %407 = vector.broadcast %406 : vector<16x1xf32> to vector<16x32xf32>
    %408 = arith.mulf %403, %407 : vector<16x32xf32>
    %409 = vector.broadcast %389 : vector<1x32xf32> to vector<16x32xf32>
    %410 = arith.mulf %408, %409 : vector<16x32xf32>
    %411 = vector.broadcast %390 : vector<1x32xf32> to vector<16x32xf32>
    %412 = arith.addf %410, %411 : vector<16x32xf32>
    %c0_132 = arith.constant 0 : index
    %c0_133 = arith.constant 0 : index
    %413 = vector.load %arg9[%c0_132, %c0_133] : memref<16x32xf32, #tpu.memory_space<vmem>>, vector<16x32xf32>
    tpu.vector_store %arg9[%c0_132, %c0_133], %412 {strides = array<i32>} : memref<16x32xf32, #tpu.memory_space<vmem>>, vector<16x32xf32>,
    return
  }
}

</mosaic_0001>

<bundles_post_ra>
// kernel: stacked_co_attention.1
= control target key start
LH: loop header
LB: loop body
LE: loop exit
PB: predicated region body
PF: predicated region fallthrough
CT: control target
= control target key end

     0   :  { %14 = vsyncpa [#allocation3], 0  ;;  %s9454_s0 = inlined_call_operand.vmem [shape: f32[16,32], index: 0, kind: input, shape index: {}]   ;;  %s9455_s1 = inlined_call_operand.hbm [shape: f32[32,32], index: 1, kind: input, shape index: {}]   ;;  %s9456_s2 = inlined_call_operand.vmem [shape: bf16[3,3,32,32], index: 2, kind: input, shape index: {}]   ;;  %s9457_s3 = inlined_call_operand.vmem [shape: bf16[3,32,32], index: 3, kind: input, shape index: {}]   ;;  %s9458_s4 = inlined_call_operand.hbm [shape: f32[3,4,32], index: 4, kind: input, shape index: {}]   ;;  %s9459_s5 = inlined_call_operand.vmem [shape: bf16[3,32,128], index: 5, kind: input, shape index: {}]   ;;  %s9460_s6 = inlined_call_operand.hbm [shape: f32[3,1,128], index: 6, kind: input, shape index: {}]   ;;  %s9461_s7 = inlined_call_operand.vmem [shape: bf16[3,128,32], index: 7, kind: input, shape index: {}]   ;;  %s9462_s8 = inlined_call_operand.hbm [shape: f32[3,1,32], index: 8, kind: input, shape index: {}]   ;;  %s9463_s9 = inlined_call_operand.vmem [shape: f32[16,32], index: 9, kind: output, shape index: {}]  }
   0x1   :  { %15 = vsyncpa [#allocation5], 0 }
   0x2   :  { %16 = vsyncpa [#allocation8], 0  ;;  %s8263_s30 = smov [#allocation4]  }
   0x3   :  { %s40_s10 = sshll.u32 %s8263_s30, 4  ;;  %s41_s10 = int_to_ptr.vmem [resolvable:$true] %s40_s10 }
   0x4   :  { %s8185_s11 = scalar_lea.vmem %s41_s10, 192  ;;  %p8190_p1 = scmp.lt.s32.totalorder %s41_s10, %s41_s10 }
   0x5   :  { %p8186_p0 = scmp.ne.s32.totalorder %s41_s10, %s8185_s11  ;;  %p8191_p2 = scmp.lt.s32.totalorder %s8185_s11, %s8185_s11 }
   0x7   :  { %p8192_p3 = por %p8191_p2, %p8190_p1 }
   0x9   :  { %p8193_p4 = pnand %p8192_p3, %p8186_p0 }
   0xb   :  { %8196 = shalt.err (!%p8193_p4)
}
   0xc   :  { %s8264_s12 = smov 64   ;;  %s8265_s13 = smov 4  }
   0xd   :  { %46 = dma.hbm_to_vmem [thread:$0]  %s9458_s4, 192, %s41_s10, [#allocation5], %s8264_s12, %s8264_s12, %s8265_s13  }
   0xe   :  { %s8266_s16 = smov [#allocation2]  }
   0xf   :  { %s24_s17 = sshll.u32 %s8266_s16, 4  ;;  %s25_s17 = int_to_ptr.vmem [resolvable:$true] %s24_s17 }
  0x10   :  { %s8205_s18 = scalar_lea.vmem %s25_s17, 512  ;;  %p8210_p6 = scmp.lt.s32.totalorder %s25_s17, %s25_s17 }
  0x11   :  { %p8206_p5 = scmp.ne.s32.totalorder %s25_s17, %s8205_s18  ;;  %p8211_p7 = scmp.lt.s32.totalorder %s8205_s18, %s8205_s18 }
  0x13   :  { %p8212_p8 = por %p8211_p7, %p8210_p6 }
  0x15   :  { %p8213_p9 = pnand %p8212_p8, %p8206_p5 }
  0x17   :  { %8216 = shalt.err (!%p8213_p9)
}
  0x18   :  { %s8267_s19 = smov 128   ;;  %s8268_s20 = smov 8  }
  0x19   :  { %30 = dma.hbm_to_vmem [thread:$0]  %s9455_s1, 512, %s25_s17, [#allocation3], %s8267_s19, %s8267_s19, %s8268_s20  }
  0x1a   :  { %s8269_s23 = smov [#allocation6]  }
  0x1b   :  { %s54_s24 = sshll.u32 %s8269_s23, 4  ;;  %s55_s24 = int_to_ptr.vmem [resolvable:$true] %s54_s24 }
  0x1c   :  { %s8225_s4 = scalar_lea.vmem %s55_s24, 48  ;;  %s8229_s25 = scalar_lea.vmem %s55_s24, 64 }
  0x1d   :  { %p8226_p10 = scmp.ne.s32.totalorder %s55_s24, %s8225_s4  ;;  %p8230_p11 = scmp.lt.s32.totalorder %s55_s24, %s55_s24 }
  0x1e   :  { %p8231_p12 = scmp.lt.s32.totalorder %s8229_s25, %s8225_s4 }
  0x20   :  { %p8232_p13 = por %p8231_p12, %p8230_p11 }
  0x22   :  { %p8233_p0 = pnand %p8232_p13, %p8226_p10 }
  0x24   :  { %8236 = shalt.err (!%p8233_p0)
}
  0x25   :  { %s8270_s26 = smov 16   ;;  %s8271_s27 = smov 1  }
  0x26   :  { %60 = dma.hbm_to_vmem [thread:$0]  %s9460_s6, 48, %s55_s24, [#allocation5], %s8270_s26, %s8270_s26, %s8271_s27  }
  0x27   :  { %s8272_s1 = smov [#allocation7]  }
  0x28   :  { %s68_s30 = sshll.u32 %s8272_s1, 4  ;;  %s69_s30 = int_to_ptr.vmem [resolvable:$true] %s68_s30 }
  0x29   :  { %s8245_s10 = scalar_lea.vmem %s69_s30, 48  ;;  %s8249_s11 = scalar_lea.vmem %s69_s30, 64 }
  0x2a   :  { %p8246_p1 = scmp.ne.s32.totalorder %s69_s30, %s8245_s10  ;;  %p8250_p2 = scmp.lt.s32.totalorder %s69_s30, %s69_s30 }
  0x2b   :  { %p8251_p3 = scmp.lt.s32.totalorder %s8249_s11, %s8245_s10 }
  0x2d   :  { %p8252_p4 = por %p8251_p3, %p8250_p2 }
  0x2f   :  { %p8253_p5 = pnand %p8252_p4, %p8246_p1 }
  0x31   :  { %8256 = shalt.err (!%p8253_p5)
}
  0x32   :  { %74 = dma.hbm_to_vmem [thread:$0]  %s9462_s8, 48, %s69_s30, [#allocation8], %s8270_s26, %s8270_s26, %s8271_s27  }
  0x33   :  { %8257 = dma.done.wait [#allocation3], 512  }
  0x34   :  { %8258 = vsyncadd [#allocation3], 4294966784 }
  0x35   :  { %8259 = dma.done.wait [#allocation5], 240  }
  0x36   :  { %8260 = vsyncadd [#allocation5], 4294967056 }
  0x37   :  { %8261 = dma.done.wait [#allocation8], 48  }
  0x38   :  { %8262 = vsyncadd [#allocation8], 4294967248  ;;  %vm168_vm0 = vcmask 261120   ;;  %v7044_v0 = vld [vmem:[%s9456_s2 + $0x8] sm:$0xff]   ;;  %v6829_v1 = vld [vmem:[%s9456_s2] sm:$0xff]   ;;  %v8273_v20 = vmov 0.0  }
  0x39   :  { %v8355_v2 = vld [vmem:[%s9454_s0] sm:$0xff]  ;;  %v6834_v3 = vunpack.c.l.bf16 %v7044_v0  ;;  %v6835_v4 = vunpack.c.h.bf16 %v7044_v0  ;;  %v6831_v5 = vunpack.c.h.bf16 %v6829_v1  ;;  %v7046_v6 = vld [vmem:[%s9456_s2 + $0x18] sm:$0xff]   ;;  %v6830_v7 = vunpack.c.l.bf16 %v6829_v1  ;;  %v8365_v9 = vld [vmem:[%s9454_s0 + $0x8] sm:$0xff]  ;;  %7441 = vmatprep.subr.mxu0 %v8273_v20  ;;  %s8275_s28 = smov 120   ;;  %s8276_s29 = smov 112  }
  0x3a   :  { %7406 = vmatprep.mubr.msk.f32.mxu1 %vm168_vm0, %v8355_v2  ;;  %v6843_v8 = vunpack.c.h.bf16 %v7046_v6  ;;  %v7045_v10 = vld [vmem:[%s9456_s2 + $0x10] sm:$0xff]   ;;  %v6842_v11 = vunpack.c.l.bf16 %v7046_v6  ;;  %v7048_v14 = vld [vmem:[%s9456_s2 + $0x28] sm:$0xff]   ;;  %v7047_v17 = vld [vmem:[%s9456_s2 + $0x20] sm:$0xff]   ;;  %vm8274_vm1 = vmmov 0   ;;  %vm448_vm2 = vcmask 64512   ;;  %s8277_s1 = smov 104  }
  0x3b   :  { %7398 = vmatprep.subr.mxu1 %v6835_v4  ;;  %v6839_v12 = vunpack.c.h.bf16 %v7045_v10  ;;  %v6838_v13 = vunpack.c.l.bf16 %v7045_v10  ;;  %v6851_v15 = vunpack.c.h.bf16 %v7048_v14  ;;  %v6850_v16 = vunpack.c.l.bf16 %v7048_v14  ;;  %7443 = vmatprep.mubr.msk.f32.mxu0 %vm8274_vm1, %v8273_v20  ;;  %s8278_s13 = smov 24  }
  0x3c   :  { %7399 = vmatpush3.msra.mxu1 %v6835_v4  ;;  %v6847_v18 = vunpack.c.h.bf16 %v7047_v17  ;;  %v6846_v19 = vunpack.c.l.bf16 %v7047_v17  ;;  %vm1739_vm3 = vcmask 130048   ;;  %vm1742_vm4 = vcmask 195584  }
  0x3d   :  { %7400 = vmatprep.subr.mxu1 %v6834_v3 }
  0x3e   :  { %7401 = vmatpush3.msra.mxu1 %v6834_v3 }
  0x3f   :  { %7402 = vmatprep.subr.mxu1 %v6831_v5 }
  0x40   :  { %7403 = vmatpush3.msra.mxu1 %v6831_v5 }
  0x41   :  { %7404 = vmatprep.subr.mxu1 %v6830_v7 }
  0x42   :  { %7405 = vmatpush3.msra.mxu1 %v6830_v7 }
  0x43   :  { %7407 = vmatmul.mubr.msk.f32.vlgmr.msra.gmra.mxu1 %vm168_vm0, %v8365_v9  ;;  %7409 = vmatprep.subr.mxu1 %v6843_v8 }
  0x44   :  { %7410 = vmatpush3.msra.mxu1 %v6843_v8  ;;  %7417 = vmatprep.mubr.msk.f32.mxu1 %vm168_vm0, %v8355_v2 }
  0x45   :  { %7411 = vmatprep.subr.mxu1 %v6842_v11 }
  0x46   :  { %7412 = vmatpush3.msra.mxu1 %v6842_v11 }
  0x47   :  { %7413 = vmatprep.subr.mxu1 %v6839_v12 }
  0x48   :  { %7414 = vmatpush3.msra.mxu1 %v6839_v12 }
  0x49   :  { %7415 = vmatprep.subr.mxu1 %v6838_v13 }
  0x4a   :  { %7416 = vmatpush3.msra.mxu1 %v6838_v13 }
  0x4b   :  { %7418 = vmatmul.mubr.msk.f32.vlgmr.msra.gmra.mxu1 %vm168_vm0, %v8365_v9  ;;  %7420 = vmatprep.subr.mxu1 %v6851_v15 }
  0x4c   :  { %7428 = vmatprep.mubr.msk.f32.mxu1 %vm168_vm0, %v8355_v2  ;;  %7421 = vmatpush3.msra.mxu1 %v6851_v15 }
  0x4d   :  { %7422 = vmatprep.subr.mxu1 %v6850_v16 }
  0x4e   :  { %7423 = vmatpush3.msra.mxu1 %v6850_v16 }
  0x4f   :  { %7424 = vmatprep.subr.mxu1 %v6847_v18 }
  0x50   :  { %7425 = vmatpush3.msra.mxu1 %v6847_v18 }
  0x51   :  { %7426 = vmatprep.subr.mxu1 %v6846_v19 }
  0x52   :  { %7427 = vmatpush3.msra.mxu1 %v6846_v19 }
  0x53   :  { %7429 = vmatmul.mubr.msk.f32.vlgmr.msra.gmra.mxu1 %vm168_vm0, %v8365_v9  ;;  %7431 = vmatprep.subr.mxu1 %v8273_v20 }
  0x54   :  { %7433 = vmatprep.mubr.msk.f32.mxu1 %vm8274_vm1, %v8273_v20 }
 0x103   :  { %v7408_v21 = vpop.f32.mrf.mxu1 }
 0x104   :  { %404 = vrot.lane.b32.xlu1 %v7408_v21, %s8275_s28 }
 0x105   :  { %v241_v22 = vpop.f32.mrf.mxu1 }
 0x106   :  { %406 = vrot.lane.b32.xlu0 %v241_v22, %s8276_s29 }
 0x108   :  { %408 = vrot.lane.b32.xlu1 %v7408_v21, %s8276_s29 }
 0x10b   :  { %v7419_v23 = vpop.f32.mrf.mxu1 }
 0x10c   :  { %402 = vrot.lane.b32.xlu1 %v241_v22, %s8275_s28  ;;  %418 = vrot.lane.b32.xlu0 %v7419_v23, %s8275_s28 }
 0x10d   :  { %v316_v24 = vpop.f32.mrf.mxu1 }
 0x10e   :  { %7432 = vmatpush3.xpose.msk.msra.mxu1 %vm448_vm2, %v316_v24 }
 0x10f   :  { %7436 = vmatprep.subr.mxu1 %v8273_v20 }
 0x110   :  { %422 = vrot.lane.b32.xlu1 %v7419_v23, %s8276_s29  ;;  %416 = vrot.lane.b32.xlu0 %v316_v24, %s8275_s28 }
 0x111   :  { %7434 = vmatmul.mubr.msk.f32.vlgmr.msra.gmra.mxu1 %vm448_vm2, %v241_v22 }
 0x112   :  { %7437 = vmatpush3.xpose.msk.msra.mxu1 %vm448_vm2, %v7419_v23  ;;  %7438 = vmatprep.mubr.msk.f32.mxu1 %vm8274_vm1, %v8273_v20 }
 0x113   :  { %7446 = vmatprep.subr.mxu1 %v8273_v20  ;;  %v8436_v36 = vpop.f32.mrf.mxu1 }
 0x114   :  { %426 = vrot.lane.b32.xlu1 %v7419_v23, %s8277_s1  ;;  %420 = vrot.lane.b32.xlu0 %v316_v24, %s8276_s29 }
 0x115   :  { %7439 = vmatmul.mubr.msk.f32.vlgmr.msra.gmra.mxu1 %vm448_vm2, %v7408_v21  ;;  %v8446_v38 = vpop.f32.mrf.mxu1 }
 0x116   :  { %7448 = vmatprep.mubr.msk.f32.mxu1 %vm8274_vm1, %v8273_v20 }
 0x118   :  { %412 = vrot.lane.b32.xlu1 %v7408_v21, %s8277_s1  ;;  %424 = vrot.lane.b32.xlu0 %v316_v24, %s8277_s1 }
 0x11c   :  { %410 = vrot.lane.b32.xlu0 %v241_v22, %s8277_s1 }
 0x176   :  { %v405_v25 = vpop.permute.xlu1 %404 }
 0x178   :  { %v407_v26 = vpop.permute.xlu0 %406 }
 0x17a   :  { %v409_v27 = vpop.permute.xlu1 %408 }
 0x17e   :  { %v403_v28 = vpop.permute.xlu1 %402  ;;  %v419_v29 = vpop.permute.xlu0 %418 }
 0x17f   :  { %7447 = vmatpush3.xpose.msk.msra.mxu1 %vm448_vm2, %v419_v29 }
 0x180   :  { %7456 = vmatprep.subr.mxu1 %v8273_v20 }
 0x182   :  { %v423_v30 = vpop.permute.xlu1 %422  ;;  %v417_v31 = vpop.permute.xlu0 %416  ;;  %7449 = vmatmul.mubr.msk.f32.vlgmr.msra.gmra.mxu1 %vm448_vm2, %v405_v25 }
 0x183   :  { %7442 = vmatpush3.xpose.msk.msra.mxu0 %vm448_vm2, %v417_v31  ;;  %7457 = vmatpush3.xpose.msk.msra.mxu1 %vm448_vm2, %v423_v30 }
 0x184   :  { %7458 = vmatprep.mubr.msk.f32.mxu1 %vm8274_vm1, %v8273_v20  ;;  %7451 = vmatprep.subr.mxu0 %v8273_v20 }
 0x185   :  { %7466 = vmatprep.subr.mxu1 %v8273_v20 }
 0x186   :  { %v427_v32 = vpop.permute.xlu1 %426  ;;  %7444 = vmatmul.mubr.msk.f32.vlgmr.msra.gmra.mxu0 %vm448_vm2, %v403_v28  ;;  %v421_v33 = vpop.permute.xlu0 %420  ;;  %7459 = vmatmul.mubr.msk.f32.vlgmr.msra.gmra.mxu1 %vm448_vm2, %v409_v27 }
 0x187   :  { %7452 = vmatpush3.xpose.msk.msra.mxu0 %vm448_vm2, %v421_v33  ;;  %7467 = vmatpush3.xpose.msk.msra.mxu1 %vm448_vm2, %v427_v32 }
 0x188   :  { %7453 = vmatprep.mubr.msk.f32.mxu0 %vm8274_vm1, %v8273_v20  ;;  %7461 = vmatprep.subr.mxu0 %v8273_v20 }
 0x189   :  { %7468 = vmatprep.mubr.msk.f32.mxu1 %vm8274_vm1, %v8273_v20  ;;  %7476 = vmatprep.subr.mxu1 %v8273_v20 }
 0x18a   :  { %v413_v34 = vpop.permute.xlu1 %412  ;;  %7454 = vmatmul.mubr.msk.f32.vlgmr.msra.gmra.mxu0 %vm448_vm2, %v407_v26  ;;  %v425_v35 = vpop.permute.xlu0 %424 }
 0x18b   :  { %7462 = vmatpush3.xpose.msk.msra.mxu0 %vm448_vm2, %v425_v35  ;;  %7469 = vmatmul.mubr.msk.f32.vlgmr.msra.gmra.mxu1 %vm448_vm2, %v413_v34 }
 0x18c   :  { %7463 = vmatprep.mubr.msk.f32.mxu0 %vm8274_vm1, %v8273_v20  ;;  %7471 = vmatprep.subr.mxu0 %v8273_v20 }
 0x18d   :  { %7477 = vmatpush3.msra.mxu1 %v8436_v36  ;;  %7478 = vmatprep.mubr.msk.f32.mxu1 %vm8274_vm1, %v8273_v20 }
 0x18e   :  { %v411_v37 = vpop.permute.xlu0 %410  ;;  %7486 = vmatprep.subr.mxu1 %v8273_v20 }
 0x18f   :  { %7464 = vmatmul.mubr.msk.f32.vlgmr.msra.gmra.mxu0 %vm448_vm2, %v411_v37 }
 0x190   :  { %7472 = vmatpush3.msra.mxu0 %v8446_v38  ;;  %7473 = vmatprep.mubr.msk.f32.mxu0 %vm8274_vm1, %v8273_v20 }
 0x191   :  { %7481 = vmatprep.subr.mxu0 %v8273_v20 }
 0x1d1   :  { %v519_v39 = vpop.f32.mrf.mxu1 }
 0x1d2   :  { %v1041_v40 = vsel %vm448_vm2, %v519_v39, -inf }
 0x1d3   :  { %1042 = vmax.xlane.f32.xlu0 %v1041_v40  ;;  %v7435_v41 = vpop.f32.mrf.mxu1 }
 0x1d5   :  { %v593_v42 = vpop.f32.mrf.mxu1 }
 0x1d6   :  { %v1044_v43 = vsel %vm448_vm2, %v593_v42, -inf }
 0x1d7   :  { %1045 = vmax.xlane.f32.xlu1 %v1044_v43  ;;  %v7440_v44 = vpop.f32.mrf.mxu1 }
 0x242   :  { %v741_v45 = vpop.f32.mrf.mxu1 }
 0x243   :  { %v1050_v55 = vsel %vm448_vm2, %v741_v45, -inf }
 0x244   :  { %v7450_v46 = vpop.f32.mrf.mxu1 }
 0x246   :  { %v667_v47 = vpop.f32.mrf.mxu0  ;;  %v889_v48 = vpop.f32.mrf.mxu1 }
 0x247   :  { %v1047_v49 = vsel %vm448_vm2, %v667_v47, -inf  ;;  %v1056_v59 = vsel %vm448_vm2, %v889_v48, -inf }
 0x248   :  { %v7445_v50 = vpop.f32.mrf.mxu0  ;;  %1048 = vmax.xlane.f32.xlu0 %v1047_v49  ;;  %v7460_v51 = vpop.f32.mrf.mxu1 }
 0x24a   :  { %v815_v52 = vpop.f32.mrf.mxu0 }
 0x24b   :  { %v1037_v53 = vpop.f32.mrf.mxu1  ;;  %v1053_v54 = vsel %vm448_vm2, %v815_v52, -inf }
 0x24c   :  { %v7455_v56 = vpop.f32.mrf.mxu0  ;;  %1054 = vmax.xlane.f32.xlu1 %v1053_v54  ;;  %1051 = vmax.xlane.f32.xlu0 %v1050_v55  ;;  %v1062_v62 = vsel %vm448_vm2, %v1037_v53, -inf }
 0x24d   :  { %v7470_v57 = vpop.f32.mrf.mxu1 }
 0x24f   :  { %v963_v58 = vpop.f32.mrf.mxu0 }
 0x250   :  { %1057 = vmax.xlane.f32.xlu0 %v1056_v59  ;;  %v1059_v60 = vsel %vm448_vm2, %v963_v58, -inf }
 0x251   :  { %v7465_v61 = vpop.f32.mrf.mxu0  ;;  %1060 = vmax.xlane.f32.xlu1 %v1059_v60 }
 0x254   :  { %1063 = vmax.xlane.f32.xlu0 %v1062_v62 }
 0x25c   :  { %v1043_v1 = vpop.xlane.xlu0 %1042 }
 0x25d   :  { %v1065_v4 = vsub.f32 %v519_v39, %v1043_v1 }
 0x25f   :  { %v1073_v5 = vmul.f32 1.442695, %v1065_v4 }
 0x260   :  { %v1046_v63 = vpop.xlane.xlu1 %1045 }
 0x261   :  { %v1066_v0 = vsub.f32 %v593_v42, %v1046_v63 }
 0x262   :  { %430 = vrot.lane.b32.xlu1 %v8446_v38, %s8275_s28 }
 0x263   :  { %v1075_v3 = vmul.f32 1.442695, %v1066_v0 }
 0x265   :  { %8012 = vpow2.f32 %v1075_v3 }
 0x266   :  { %436 = vrot.lane.b32.xlu1 %v8446_v38, %s8276_s29  ;;  %8014 = vpow2.f32 %v1073_v5 }
 0x26a   :  { %438 = vrot.lane.b32.xlu1 %v8436_v36, %s8276_s29  ;;  %432 = vrot.lane.b32.xlu0 %v8436_v36, %s8275_s28 }
 0x272   :  { %v8013_v6 = vpop.eup %8012 }
 0x273   :  { %v1092_v7 = vsel %vm448_vm2, %v8013_v6, 0.0  ;;  %v8015_v8 = vpop.eup %8014 }
 0x274   :  { %v1089_v10 = vsel %vm448_vm2, %v8015_v8, 0.0 }
 0x289   :  { %1093 = vadd.xlane.f32.xlu0 %v1092_v7 }
 0x28e   :  { %1090 = vadd.xlane.f32.xlu1 %v1089_v10 }
 0x2d1   :  { %v1049_v11 = vpop.xlane.xlu0 %1048 }
 0x2d2   :  { %v1067_v12 = vsub.f32 %v667_v47, %v1049_v11 }
 0x2d4   :  { %v1077_v13 = vmul.f32 1.442695, %v1067_v12 }
 0x2d5   :  { %v1055_v14 = vpop.xlane.xlu1 %1054  ;;  %v1052_v15 = vpop.xlane.xlu0 %1051 }
 0x2d6   :  { %8016 = vpow2.f32 %v1077_v13  ;;  %v1069_v16 = vsub.f32 %v815_v52, %v1055_v14  ;;  %v1068_v17 = vsub.f32 %v741_v45, %v1052_v15  ;;  %v7049_v14 = vld [vmem:[%s9457_s3 + $0x8] sm:$0xff]  }
 0x2d7   :  { %v6859_v15 = vunpack.c.h.bf16 %v7049_v14 }
 0x2d8   :  { %v1081_v18 = vmul.f32 1.442695, %v1069_v16  ;;  %v1079_v19 = vmul.f32 1.442695, %v1068_v17  ;;  %v6858_v16 = vunpack.c.l.bf16 %v7049_v14  ;;  %v6853_v17 = vld [vmem:[%s9457_s3] sm:$0xff]  }
 0x2d9   :  { %v1058_v21 = vpop.xlane.xlu0 %1057 }
 0x2da   :  { %8018 = vpow2.f32 %v1081_v18  ;;  %v1070_v22 = vsub.f32 %v889_v48, %v1058_v21  ;;  %v1061_v23 = vpop.xlane.xlu1 %1060  ;;  %v6855_v18 = vunpack.c.h.bf16 %v6853_v17 }
 0x2db   :  { %8020 = vpow2.f32 %v1079_v19  ;;  %v1071_v24 = vsub.f32 %v963_v58, %v1061_v23  ;;  %v6854_v19 = vunpack.c.l.bf16 %v6853_v17 }
 0x2dc   :  { %v1083_v25 = vmul.f32 1.442695, %v1070_v22 }
 0x2dd   :  { %v1085_v26 = vmul.f32 1.442695, %v1071_v24  ;;  %v1064_v27 = vpop.xlane.xlu0 %1063 }
 0x2de   :  { %8022 = vpow2.f32 %v1083_v25  ;;  %v1072_v28 = vsub.f32 %v1037_v53, %v1064_v27  ;;  %v431_v44 = vpop.permute.xlu1 %430 }
 0x2df   :  { %8024 = vpow2.f32 %v1085_v26 }
 0x2e0   :  { %v1087_v29 = vmul.f32 1.442695, %v1072_v28 }
 0x2e1   :  { %v433_v46 = vpop.permute.xlu0 %432 }
 0x2e2   :  { %8026 = vpow2.f32 %v1087_v29  ;;  %v437_v45 = vpop.permute.xlu1 %436 }
 0x2e3   :  { %v8017_v30 = vpop.eup %8016 }
 0x2e4   :  { %v1095_v31 = vsel %vm448_vm2, %v8017_v30, 0.0 }
 0x2e5   :  { %1096 = vadd.xlane.f32.xlu1 %v1095_v31 }
 0x2e6   :  { %v439_v48 = vpop.permute.xlu1 %438 }
 0x2e7   :  { %v8019_v32 = vpop.eup %8018 }
 0x2e8   :  { %v8021_v33 = vpop.eup %8020  ;;  %v1101_v34 = vsel %vm448_vm2, %v8019_v32, 0.0 }
 0x2e9   :  { %1102 = vadd.xlane.f32.xlu1 %v1101_v34  ;;  %v1098_v35 = vsel %vm448_vm2, %v8021_v33, 0.0 }
 0x2ea   :  { %1099 = vadd.xlane.f32.xlu0 %v1098_v35 }
 0x2eb   :  { %v8023_v37 = vpop.eup %8022 }
 0x2ec   :  { %v8473_v39 = vpop.eup %8024  ;;  %v1104_v40 = vsel %vm448_vm2, %v8023_v37, 0.0 }
 0x2ed   :  { %v1107_v41 = vsel %vm448_vm2, %v8473_v39, 0.0 }
 0x2ee   :  { %1105 = vadd.xlane.f32.xlu0 %v1104_v40  ;;  %1108 = vadd.xlane.f32.xlu1 %v1107_v41 }
 0x2ef   :  { %v8478_v42 = vpop.eup %8026 }
 0x2f0   :  { %v1110_v43 = vsel %vm448_vm2, %v8478_v42, 0.0 }
 0x2f2   :  { %1111 = vadd.xlane.f32.xlu0 %v1110_v43 }
 0x2ff   :  { %444 = vrot.lane.b32.xlu1 %v8436_v36, %s8277_s1 }
 0x308   :  { %442 = vrot.lane.b32.xlu0 %v8446_v38, %s8277_s1 }
 0x312   :  { %v1094_v47 = vpop.xlane.xlu0 %1093 }
 0x313   :  { %8028 = vrcp.f32 %v1094_v47 }
 0x317   :  { %v1091_v49 = vpop.xlane.xlu1 %1090 }
 0x318   :  { %8030 = vrcp.f32 %v1091_v49 }
 0x320   :  { %v8029_v50 = vpop.eup %8028 }
 0x321   :  { %v1122_v51 = vmul.f32 %v8029_v50, %v8013_v6 }
 0x323   :  { %7479 = vmatmul.mubr.msk.f32.vlgmr.msra.gmra.mxu1 %vm448_vm2, %v1122_v51 }
 0x324   :  { %7487 = vmatpush3.msra.mxu1 %v433_v46  ;;  %7488 = vmatprep.mubr.msk.f32.mxu1 %vm8274_vm1, %v8273_v20 }
 0x325   :  { %v8031_v36 = vpop.eup %8030  ;;  %7496 = vmatprep.subr.mxu1 %v8273_v20 }
 0x326   :  { %v1121_v52 = vmul.f32 %v8031_v36, %v8015_v8 }
 0x328   :  { %7474 = vmatmul.mubr.msk.f32.vlgmr.msra.gmra.mxu0 %vm448_vm2, %v1121_v52 }
 0x329   :  { %7482 = vmatpush3.msra.mxu0 %v431_v44  ;;  %7483 = vmatprep.mubr.msk.f32.mxu0 %vm8274_vm1, %v8273_v20 }
 0x32a   :  { %7491 = vmatprep.subr.mxu0 %v8273_v20 }
 0x36e   :  { %v1097_v38 = vpop.xlane.xlu1 %1096 }
 0x36f   :  { %8032 = vrcp.f32 %v1097_v38 }
 0x372   :  { %v1103_v53 = vpop.xlane.xlu1 %1102 }
 0x373   :  { %8034 = vrcp.f32 %v1103_v53  ;;  %v1100_v54 = vpop.xlane.xlu0 %1099 }
 0x374   :  { %8036 = vrcp.f32 %v1100_v54 }
 0x377   :  { %v1106_v55 = vpop.xlane.xlu0 %1105  ;;  %v1109_v56 = vpop.xlane.xlu1 %1108 }
 0x378   :  { %8038 = vrcp.f32 %v1106_v55 }
 0x379   :  { %8040 = vrcp.f32 %v1109_v56 }
 0x37b   :  { %v1112_v57 = vpop.xlane.xlu0 %1111  ;;  %v445_v6 = vpop.permute.xlu1 %444 }
 0x37c   :  { %v8033_v58 = vpop.eup %8032  ;;  %8042 = vrcp.f32 %v1112_v57 }
 0x37d   :  { %v1123_v59 = vmul.f32 %v8033_v58, %v8017_v30 }
 0x37f   :  { %7484 = vmatmul.mubr.msk.f32.vlgmr.msra.gmra.mxu0 %vm448_vm2, %v1123_v59  ;;  %v443_v0 = vpop.permute.xlu0 %442  ;;  %v7050_v59 = vld [vmem:[%s9459_s5 + $0x8] sm:$0xff]  }
 0x380   :  { %v8035_v60 = vpop.eup %8034  ;;  %7492 = vmatpush3.msra.mxu0 %v437_v45  ;;  %7493 = vmatprep.mubr.msk.f32.mxu0 %vm8274_vm1, %v8273_v20 }
 0x381   :  { %v8037_v61 = vpop.eup %8036  ;;  %7501 = vmatprep.subr.mxu0 %v8273_v20  ;;  %v1125_v62 = vmul.f32 %v8035_v60, %v8019_v32  ;;  %v6861_v60 = vld [vmem:[%s9459_s5] sm:$0xff]  }
 0x382   :  { %v1124_v63 = vmul.f32 %v8037_v61, %v8021_v33  ;;  %v6867_v61 = vunpack.c.h.bf16 %v7050_v59 }
 0x383   :  { %7494 = vmatmul.mubr.msk.f32.vlgmr.msra.gmra.mxu0 %vm448_vm2, %v1125_v62  ;;  %v6866_v62 = vunpack.c.l.bf16 %v7050_v59  ;;  %v7062_v59 = vld [vmem:[%s9456_s2 + $0x50] sm:$0xff]  }
 0x384   :  { %7489 = vmatmul.mubr.msk.f32.vlgmr.msra.gmra.mxu1 %vm448_vm2, %v1124_v63  ;;  %7502 = vmatpush3.msra.mxu0 %v443_v0  ;;  %v6863_v63 = vunpack.c.h.bf16 %v6861_v60  ;;  %v6862_v0 = vunpack.c.l.bf16 %v6861_v60 }
 0x385   :  { %v8039_v1 = vpop.eup %8038  ;;  %7497 = vmatpush3.msra.mxu1 %v439_v48  ;;  %7498 = vmatprep.mubr.msk.f32.mxu1 %vm8274_vm1, %v8273_v20 }
 0x386   :  { %v8041_v3 = vpop.eup %8040  ;;  %7506 = vmatprep.subr.mxu1 %v8273_v20  ;;  %v1126_v4 = vmul.f32 %v8039_v1, %v8023_v37  ;;  %7503 = vmatprep.mubr.msk.f32.mxu0 %vm8274_vm1, %v8273_v20  ;;  %v8555_v1 = vld [vmem:[%s9456_s2 + $0x38] sm:$0xff]  }
 0x387   :  { %v1127_v5 = vmul.f32 %v8041_v3, %v8473_v39  ;;  %7511 = vmatprep.subr.mxu0 %v6859_v15  ;;  %v6907_v3 = vunpack.c.h.bf16 %v8555_v1 }
 0x388   :  { %7499 = vmatmul.mubr.msk.f32.vlgmr.msra.gmra.mxu1 %vm448_vm2, %v1126_v4  ;;  %v7057_v4 = vld [vmem:[%s9461_s7 + $0x38] sm:$0xff]  }
 0x389   :  { %v8043_v7 = vpop.eup %8042  ;;  %7507 = vmatpush3.msra.mxu1 %v445_v6  ;;  %7504 = vmatmul.mubr.msk.f32.vlgmr.msra.gmra.mxu0 %vm448_vm2, %v1127_v5  ;;  %v6899_v5 = vunpack.c.h.bf16 %v7057_v4  ;;  %v6898_v6 = vunpack.c.l.bf16 %v7057_v4 }
 0x38a   :  { %7508 = vmatprep.mubr.msk.f32.mxu1 %vm8274_vm1, %v8273_v20  ;;  %v1128_v8 = vmul.f32 %v8043_v7, %v8478_v42  ;;  %7512 = vmatpush3.msra.mxu0 %v6859_v15  ;;  %v7056_v7 = vld [vmem:[%s9461_s7 + $0x30] sm:$0xff]  }
 0x38b   :  { %7513 = vmatprep.subr.mxu0 %v6858_v16  ;;  %7522 = vmatprep.subr.mxu1 %v6867_v61 }
 0x38c   :  { %7509 = vmatmul.mubr.msk.f32.vlgmr.msra.gmra.mxu1 %vm448_vm2, %v1128_v8  ;;  %7514 = vmatpush3.msra.mxu0 %v6858_v16  ;;  %v6895_v8 = vunpack.c.h.bf16 %v7056_v7  ;;  %v7053_v16 = vld [vmem:[%s9461_s7 + $0x18] sm:$0xff]  }
 0x38d   :  { %7515 = vmatprep.subr.mxu0 %v6855_v18  ;;  %7523 = vmatpush3.msra.mxu1 %v6867_v61  ;;  %v6919_v61 = vunpack.c.h.bf16 %v7062_v59 }
 0x38e   :  { %7516 = vmatpush3.msra.mxu0 %v6855_v18  ;;  %7524 = vmatprep.subr.mxu1 %v6866_v62  ;;  %v6883_v18 = vunpack.c.h.bf16 %v7053_v16 }
 0x38f   :  { %7517 = vmatprep.subr.mxu0 %v6854_v19  ;;  %7525 = vmatpush3.msra.mxu1 %v6866_v62  ;;  %v6918_v62 = vunpack.c.l.bf16 %v7062_v59 }
 0x390   :  { %7518 = vmatpush3.msra.mxu0 %v6854_v19  ;;  %7526 = vmatprep.subr.mxu1 %v6863_v63  ;;  %v7052_v19 = vld [vmem:[%s9461_s7 + $0x10] sm:$0xff]  }
 0x391   :  { %7527 = vmatpush3.msra.mxu1 %v6863_v63  ;;  %7533 = vmatprep.subr.mxu0 %v6899_v5  ;;  %v7051_v63 = vld [vmem:[%s9461_s7 + $0x8] sm:$0xff]  }
 0x392   :  { %7528 = vmatprep.subr.mxu1 %v6862_v0 }
 0x393   :  { %7529 = vmatpush3.msra.mxu1 %v6862_v0  ;;  %v6875_v0 = vunpack.c.h.bf16 %v7051_v63 }
 0x394   :  { %7568 = vmatprep.subr.mxu1 %v6907_v3 }
 0x3e3   :  { %v1271_v10 = vpop.f32.mrf.mxu1 }
 0x3e5   :  { %v7480_v11 = vpop.f32.mrf.mxu1 }
 0x3e6   :  { %v6894_v11 = vunpack.c.l.bf16 %v7056_v7 }
 0x3e8   :  { %v1198_v12 = vpop.f32.mrf.mxu0 }
 0x3ea   :  { %v7475_v13 = vpop.f32.mrf.mxu0 }
 0x3eb   :  { %v7054_v13 = vld [vmem:[%s9461_s7 + $0x20] sm:$0xff]  }
 0x3ec   :  { %v6887_v15 = vunpack.c.h.bf16 %v7054_v13  ;;  %v6886_v17 = vunpack.c.l.bf16 %v7054_v13 }
 0x43f   :  { %v1344_v21 = vpop.f32.mrf.mxu0 }
 0x440   :  { %1715 = vrot.lane.b32.xlu0 %v1344_v21, %s8268_s20  ;;  %v6882_v21 = vunpack.c.l.bf16 %v7053_v16 }
 0x441   :  { %v7485_v22 = vpop.f32.mrf.mxu0 }
 0x442   :  { %v6879_v22 = vunpack.c.h.bf16 %v7052_v19 }
 0x443   :  { %v1490_v23 = vpop.f32.mrf.mxu0 }
 0x444   :  { %v1417_v24 = vpop.f32.mrf.mxu1  ;;  %1723 = vrot.lane.b32.xlu0 %v1490_v23, %s8270_s26  ;;  %v6878_v23 = vunpack.c.l.bf16 %v7052_v19 }
 0x445   :  { %1717 = vrot.lane.b32.xlu1 %v1417_v24, %s8268_s20  ;;  %v7495_v25 = vpop.f32.mrf.mxu0 }
 0x446   :  { %v7490_v26 = vpop.f32.mrf.mxu1 }
 0x448   :  { %v1563_v27 = vpop.f32.mrf.mxu1 }
 0x449   :  { %v1636_v28 = vpop.f32.mrf.mxu0  ;;  %1725 = vrot.lane.b32.xlu1 %v1563_v27, %s8270_s26 }
 0x44a   :  { %1731 = vrot.lane.b32.xlu0 %v1636_v28, %s8278_s13  ;;  %v7500_v29 = vpop.f32.mrf.mxu1 }
 0x44b   :  { %v7505_v30 = vpop.f32.mrf.mxu0  ;;  %v1855_v29 = vlaneseq }
 0x44c   :  { %v1709_v31 = vpop.f32.mrf.mxu1 }
 0x44d   :  { %1733 = vrot.lane.b32.xlu1 %v1709_v31, %s8278_s13  ;;  %v8578_v31 = vshrl.u32 %v1855_v29, 7 }
 0x44e   :  { %v7510_v32 = vpop.f32.mrf.mxu1 }
 0x44f   :  { %v8581_v32 = vsub.s32 0, %v8578_v31 }
 0x4b2   :  { %v1716_v33 = vpop.permute.xlu0 %1715 }
 0x4b3   :  { %v1737_v37 = vsel %vm448_vm2, %v1198_v12, %v1716_v33  ;;  %v125_v33 = vld [vmem:[#allocation4] sm:$0xf] }
 0x4b6   :  { %v1724_v34 = vpop.permute.xlu0 %1723 }
 0x4b7   :  { %v1718_v35 = vpop.permute.xlu1 %1717  ;;  %v1740_v40 = vsel %vm1739_vm3, %v1737_v37, %v1724_v34  ;;  %v8584_v34 = vsub.s32 1, %v8578_v31 }
 0x4b8   :  { %v1738_v43 = vsel %vm448_vm2, %v1271_v10, %v1718_v35  ;;  %v7055_v10 = vld [vmem:[%s9461_s7 + $0x28] sm:$0xff]   ;;  %v1858_v35 = vrot.slane %v125_v33, %v8581_v32 }
 0x4b9   :  { %v6891_v12 = vunpack.c.h.bf16 %v7055_v10  ;;  %v6890_v14 = vunpack.c.l.bf16 %v7055_v10 }
 0x4bb   :  { %v1726_v39 = vpop.permute.xlu1 %1725 }
 0x4bc   :  { %v1732_v41 = vpop.permute.xlu0 %1731  ;;  %v1741_v44 = vsel %vm1739_vm3, %v1738_v43, %v1726_v39 }
 0x4bd   :  { %v1743_v42 = vsel %vm1742_vm4, %v1740_v40, %v1732_v41  ;;  %v1864_v40 = vrot.slane %v125_v33, %v8584_v34 }
 0x4be   :  { %7519 = vmatprep.mubr.msk.f32.mxu0 %vm168_vm0, %v1743_v42 }
 0x4bf   :  { %v1734_v45 = vpop.permute.xlu1 %1733 }
 0x4c0   :  { %v1744_v46 = vsel %vm1742_vm4, %v1741_v44, %v1734_v45 }
 0x4c1   :  { %7520 = vmatmul.mubr.msk.f32.vlgmr.msra.gmra.mxu0 %vm168_vm0, %v1744_v46  ;;  %v7058_v46 = vld [vmem:[%s9456_s2 + $0x30] sm:$0xff]  }
 0x4c2   :  { %7534 = vmatpush3.msra.mxu0 %v6899_v5 }
 0x4c3   :  { %7535 = vmatprep.subr.mxu0 %v6898_v6 }
 0x4c4   :  { %7536 = vmatpush3.msra.mxu0 %v6898_v6  ;;  %v6634_v6 = vld [vmem:[#allocation6] ss:$0 sm:$0xff] }
 0x4c5   :  { %7537 = vmatprep.subr.mxu0 %v6895_v8 }
 0x4c6   :  { %7538 = vmatpush3.msra.mxu0 %v6895_v8 }
 0x4c7   :  { %7539 = vmatprep.subr.mxu0 %v6894_v11 }
 0x4c8   :  { %7540 = vmatpush3.msra.mxu0 %v6894_v11 }
 0x4c9   :  { %7541 = vmatprep.subr.mxu0 %v6891_v12 }
 0x4ca   :  { %7542 = vmatpush3.msra.mxu0 %v6891_v12 }
 0x4cb   :  { %7543 = vmatprep.subr.mxu0 %v6890_v14 }
 0x4cc   :  { %7544 = vmatpush3.msra.mxu0 %v6890_v14 }
 0x4cd   :  { %7545 = vmatprep.subr.mxu0 %v6887_v15 }
 0x4ce   :  { %7546 = vmatpush3.msra.mxu0 %v6887_v15 }
 0x4cf   :  { %7547 = vmatprep.subr.mxu0 %v6886_v17 }
 0x4d0   :  { %7548 = vmatpush3.msra.mxu0 %v6886_v17 }
 0x4d1   :  { %7549 = vmatprep.subr.mxu0 %v6883_v18 }
 0x4d2   :  { %7550 = vmatpush3.msra.mxu0 %v6883_v18 }
 0x4d3   :  { %7551 = vmatprep.subr.mxu0 %v6882_v21 }
 0x4d4   :  { %7552 = vmatpush3.msra.mxu0 %v6882_v21 }
 0x4d5   :  { %7553 = vmatprep.subr.mxu0 %v6879_v22 }
 0x4d6   :  { %7554 = vmatpush3.msra.mxu0 %v6879_v22 }
 0x4d7   :  { %7555 = vmatprep.subr.mxu0 %v6878_v23 }
 0x4d8   :  { %7556 = vmatpush3.msra.mxu0 %v6878_v23 }
 0x4d9   :  { %7557 = vmatprep.subr.mxu0 %v6875_v0 }
 0x4da   :  { %7558 = vmatpush3.msra.mxu0 %v6875_v0 }
 0x581   :  { %v7521_v47 = vpop.f32.mrf.mxu0 }
 0x582   :  { %v1827_v48 = vadd.f32 %v7521_v47, %v8365_v9 }
 0x583   :  { %v1817_v49 = vpop.f32.mrf.mxu0 }
 0x584   :  { %v1826_v50 = vadd.f32 %v1817_v49, %v8355_v2  ;;  %v1831_v51 = vsel %vm168_vm0, %v1827_v48, 0.0  ;;  %v89_v49 = vld [vmem:[#allocation2] sm:$0xff] }
 0x585   :  { %1832 = vadd.xlane.f32.xlu1 %v1831_v51  ;;  %v7061_v51 = vld [vmem:[%s9456_s2 + $0x48] sm:$0xff]  }
 0x586   :  { %v1828_v36 = vsel %vm168_vm0, %v1826_v50, 0.0 }
 0x587   :  { %1829 = vadd.xlane.f32.xlu0 %v1828_v36  ;;  %v6902_v36 = vunpack.c.l.bf16 %v7058_v46 }
 0x60e   :  { %v1833_v52 = vpop.xlane.xlu1 %1832 }
 0x60f   :  { %v1836_v38 = vmul.f32 0.03125, %v1833_v52  ;;  %v6915_v52 = vunpack.c.h.bf16 %v7061_v51 }
 0x610   :  { %v1830_v53 = vpop.xlane.xlu0 %1829 }
 0x611   :  { %v1835_v54 = vmul.f32 0.03125, %v1830_v53  ;;  %v8536_v55 = vsub.f32 %v1827_v48, %v1836_v38  ;;  %v6906_v48 = vunpack.c.l.bf16 %v8555_v1  ;;  %v90_v38 = vld [vmem:[#allocation2 + $0x8] sm:$0xff]  ;;  %v7060_v53 = vld [vmem:[%s9456_s2 + $0x40] sm:$0xff]   ;;  %v6874_v1 = vunpack.c.l.bf16 %v7051_v63 }
 0x613   :  { %v8538_v56 = vsub.f32 %v1826_v50, %v1835_v54  ;;  %v1840_v2 = vmul.f32 %v8536_v55, %v8536_v55  ;;  %v6903_v50 = vunpack.c.h.bf16 %v7058_v46  ;;  %v6914_v54 = vunpack.c.l.bf16 %v7061_v51  ;;  %7559 = vmatprep.subr.mxu0 %v6874_v1 }
 0x614   :  { %7560 = vmatpush3.msra.mxu0 %v6874_v1 }
 0x615   :  { %v1839_v9 = vmul.f32 %v8538_v56, %v8538_v56  ;;  %v1844_v58 = vsel %vm168_vm0, %v1840_v2, 0.0  ;;  %v6910_v2 = vunpack.c.l.bf16 %v7060_v53 }
 0x617   :  { %v1841_v57 = vsel %vm168_vm0, %v1839_v9, 0.0  ;;  %v92_v9 = vld [vmem:[#allocation2 + $0x18] sm:$0xff] }
 0x618   :  { %1842 = vadd.xlane.f32.xlu0 %v1841_v57  ;;  %v7063_v57 = vld [vmem:[%s9456_s2 + $0x58] sm:$0xff]  }
 0x619   :  { %v6922_v60 = vunpack.c.l.bf16 %v7063_v57 }
 0x61c   :  { %1845 = vadd.xlane.f32.xlu0 %v1844_v58  ;;  %v6923_v58 = vunpack.c.h.bf16 %v7063_v57 }
 0x6a1   :  { %v1843_v24 = vpop.xlane.xlu0 %1842 }
 0x6a2   :  { %v1847_v25 = vmul.f32 0.03125, %v1843_v24 }
 0x6a4   :  { %v1849_v26 = vadd.f32 1e-05, %v1847_v25 }
 0x6a5   :  { %v1846_v27 = vpop.xlane.xlu0 %1845 }
 0x6a6   :  { %8044 = vrsqrt.f32 %v1849_v26  ;;  %v1848_v28 = vmul.f32 0.03125, %v1846_v27 }
 0x6a8   :  { %v1850_v30 = vadd.f32 1e-05, %v1848_v28 }
 0x6aa   :  { %8046 = vrsqrt.f32 %v1850_v30 }
 0x6b3   :  { %v8045_v37 = vpop.eup %8044 }
 0x6b4   :  { %v1853_v39 = vmul.f32 %v8045_v37, %v8538_v56  ;;  %v6911_v56 = vunpack.c.h.bf16 %v7060_v53 }
 0x6b6   :  { %v1859_v41 = vmul.f32 %v1858_v35, %v1853_v39 }
 0x6b7   :  { %v8047_v42 = vpop.eup %8046 }
 0x6b8   :  { %v1854_v43 = vmul.f32 %v8047_v42, %v8536_v55  ;;  %v8590_v44 = vadd.f32 %v1864_v40, %v1859_v41  ;;  %v91_v55 = vld [vmem:[#allocation2 + $0x10] sm:$0xff] }
 0x6ba   :  { %v1860_v45 = vmul.f32 %v1858_v35, %v1854_v43  ;;  %7530 = vmatprep.mubr.msk.f32.mxu1 %vm168_vm0, %v8590_v44 }
 0x6bc   :  { %v8597_v47 = vadd.f32 %v1864_v40, %v1860_v45 }
 0x6be   :  { %7531 = vmatmul.mubr.msk.f32.vlgmr.msra.gmra.mxu1 %vm168_vm0, %v8597_v47 }
 0x6bf   :  { %7569 = vmatpush3.msra.mxu1 %v6907_v3  ;;  %7576 = vmatprep.mubr.msk.f32.mxu1 %vm168_vm0, %v89_v49  ;;  %v6869_v3 = vld [vmem:[%s9461_s7] sm:$0xff]  }
 0x6c0   :  { %7570 = vmatprep.subr.mxu1 %v6906_v48  ;;  %v6871_v4 = vunpack.c.h.bf16 %v6869_v3  ;;  %v6870_v5 = vunpack.c.l.bf16 %v6869_v3 }
 0x6c1   :  { %7571 = vmatpush3.msra.mxu1 %v6906_v48 }
 0x6c2   :  { %7572 = vmatprep.subr.mxu1 %v6903_v50  ;;  %7561 = vmatprep.subr.mxu0 %v6871_v4 }
 0x6c3   :  { %7573 = vmatpush3.msra.mxu1 %v6903_v50  ;;  %7562 = vmatpush3.msra.mxu0 %v6871_v4 }
 0x6c4   :  { %7574 = vmatprep.subr.mxu1 %v6902_v36  ;;  %7563 = vmatprep.subr.mxu0 %v6870_v5 }
 0x6c5   :  { %7575 = vmatpush3.msra.mxu1 %v6902_v36  ;;  %7564 = vmatpush3.msra.mxu0 %v6870_v5 }
 0x6c6   :  { %7577 = vmatmul.mubr.msk.f32.vlgmr.msra.gmra.mxu1 %vm168_vm0, %v90_v38  ;;  %7582 = vmatprep.subr.mxu1 %v6915_v52 }
 0x6c7   :  { %7583 = vmatpush3.msra.mxu1 %v6915_v52  ;;  %7579 = vmatprep.mubr.msk.f32.mxu1 %vm168_vm0, %v91_v55 }
 0x6c8   :  { %7584 = vmatprep.subr.mxu1 %v6914_v54 }
 0x6c9   :  { %7585 = vmatpush3.msra.mxu1 %v6914_v54 }
 0x6ca   :  { %7580 = vmatmul.mubr.msk.f32.gmra.mxu1 %vm168_vm0, %v92_v9  ;;  %7586 = vmatprep.subr.mxu1 %v6911_v56 }
 0x6cb   :  { %7587 = vmatpush3.msra.mxu1 %v6911_v56  ;;  %7590 = vmatprep.mubr.msk.f32.mxu1 %vm168_vm0, %v89_v49 }
 0x6cc   :  { %7588 = vmatprep.subr.mxu1 %v6910_v2 }
 0x6cd   :  { %7589 = vmatpush3.msra.mxu1 %v6910_v2 }
 0x6ce   :  { %7591 = vmatmul.mubr.msk.f32.vlgmr.msra.gmra.mxu1 %vm168_vm0, %v90_v38  ;;  %7596 = vmatprep.subr.mxu1 %v6923_v58 }
 0x6cf   :  { %7593 = vmatprep.mubr.msk.f32.mxu1 %vm168_vm0, %v91_v55  ;;  %7597 = vmatpush3.msra.mxu1 %v6923_v58 }
 0x6d0   :  { %7598 = vmatprep.subr.mxu1 %v6922_v60 }
 0x6d1   :  { %7599 = vmatpush3.msra.mxu1 %v6922_v60 }
 0x6d2   :  { %7594 = vmatmul.mubr.msk.f32.gmra.mxu1 %vm168_vm0, %v92_v9  ;;  %7600 = vmatprep.subr.mxu1 %v6919_v61 }
 0x6d3   :  { %7601 = vmatpush3.msra.mxu1 %v6919_v61  ;;  %7604 = vmatprep.mubr.msk.f32.mxu1 %vm168_vm0, %v89_v49 }
 0x6d4   :  { %7602 = vmatprep.subr.mxu1 %v6918_v62 }
 0x6d5   :  { %7603 = vmatpush3.msra.mxu1 %v6918_v62 }
 0x6d6   :  { %7605 = vmatmul.mubr.msk.f32.vlgmr.msra.gmra.mxu1 %vm168_vm0, %v90_v38 }
 0x6d7   :  { %7607 = vmatprep.mubr.msk.f32.mxu1 %vm168_vm0, %v91_v55 }
 0x6da   :  { %7608 = vmatmul.mubr.msk.f32.gmra.mxu1 %vm168_vm0, %v92_v9 }
 0x77e   :  { %v7532_v7 = vpop.f32.mrf.mxu1 }
 0x77f   :  { %v1951_v8 = vadd.f32 %v7532_v7, %v6634_v6 }
 0x780   :  { %v1945_v10 = vpop.f32.mrf.mxu1 }
 0x781   :  { %v1946_v11 = vadd.f32 %v6634_v6, %v1945_v10  ;;  %v1957_v12 = vmul.f32 0.01, %v1951_v8  ;;  %vm1955_vm5 = vcmp.gt.f32.partialorder %v1951_v8, 0.0 }
 0x783   :  { %v1956_v13 = vmul.f32 0.01, %v1946_v11  ;;  %vm1954_vm6 = vcmp.gt.f32.partialorder %v1946_v11, 0.0  ;;  %v1959_v16 = vsel %vm1955_vm5, %v1951_v8, %v1957_v12 }
 0x785   :  { %v1958_v14 = vsel %vm1954_vm6, %v1946_v11, %v1956_v13 }
 0x786   :  { %v7578_v15 = vpop.f32.mrf.mxu1  ;;  %7565 = vmatprep.mubr.f32.mxu0 %v1958_v14 }
 0x787   :  { %2436 = vrot.lane.b32.xlu0 %v7578_v15, %s8275_s28  ;;  %7566 = vmatmul.mubr.f32.vlgmr.msra.gmra.mxu0 %v1959_v16 }
 0x788   :  { %v2241_v17 = vpop.f32.mrf.mxu1 }
 0x789   :  { %2434 = vrot.lane.b32.xlu1 %v2241_v17, %s8275_s28  ;;  %7614 = vmatprep.mubr.msk.f32.mxu1 %vm448_vm2, %v2241_v17 }
 0x78a   :  { %v7581_v18 = vpop.f32.mrf.mxu1 }
 0x78b   :  { %2444 = vrot.lane.b32.xlu0 %v7578_v15, %s8276_s29 }
 0x78c   :  { %v2251_v19 = vpop.f32.mrf.mxu1 }
 0x78d   :  { %2442 = vrot.lane.b32.xlu1 %v2241_v17, %s8276_s29  ;;  %7621 = vmatprep.mubr.msk.f32.mxu0 %vm448_vm2, %v2251_v19 }
 0x78e   :  { %v7592_v21 = vpop.f32.mrf.mxu1 }
 0x78f   :  { %2440 = vrot.lane.b32.xlu0 %v7581_v18, %s8275_s28  ;;  %7610 = vmatprep.subr.msk.mxu1 %vm448_vm2, %v7592_v21 }
 0x790   :  { %v2326_v22 = vpop.f32.mrf.mxu1  ;;  %7611 = vmatpush3.xpose.msk.msra.mxu1 %vm448_vm2, %v7592_v21 }
 0x791   :  { %2438 = vrot.lane.b32.xlu1 %v2251_v19, %s8275_s28  ;;  %7612 = vmatprep.subr.msk.mxu1 %vm448_vm2, %v2326_v22 }
 0x792   :  { %v7595_v23 = vpop.f32.mrf.mxu1 }
 0x793   :  { %2462 = vrot.lane.b32.xlu0 %v2326_v22, %s8275_s28  ;;  %7617 = vmatprep.subr.msk.mxu0 %vm448_vm2, %v7595_v23 }
 0x794   :  { %7613 = vmatpush3.xpose.msk.msra.mxu1 %vm448_vm2, %v2326_v22  ;;  %7618 = vmatpush3.xpose.msk.msra.mxu0 %vm448_vm2, %v7595_v23  ;;  %v2336_v24 = vpop.f32.mrf.mxu1 }
 0x795   :  { %2464 = vrot.lane.b32.xlu1 %v7592_v21, %s8275_s28  ;;  %7619 = vmatprep.subr.msk.mxu0 %vm448_vm2, %v2336_v24 }
 0x796   :  { %v8666_v25 = vpop.f32.mrf.mxu1 }
 0x797   :  { %2470 = vrot.lane.b32.xlu0 %v2326_v22, %s8276_s29  ;;  %7615 = vmatmul.mubr.msk.f32.vlgmr.msra.gmra.mxu1 %vm448_vm2, %v7578_v15 }
 0x798   :  { %7620 = vmatpush3.xpose.msk.msra.mxu0 %vm448_vm2, %v2336_v24  ;;  %v8669_v26 = vpop.f32.mrf.mxu1 }
 0x799   :  { %2472 = vrot.lane.b32.xlu1 %v7592_v21, %s8276_s29 }
 0x79a   :  { %v8672_v27 = vpop.f32.mrf.mxu1 }
 0x79b   :  { %2466 = vrot.lane.b32.xlu0 %v2336_v24, %s8275_s28  ;;  %7622 = vmatmul.mubr.msk.f32.vlgmr.msra.gmra.mxu0 %vm448_vm2, %v7581_v18 }
 0x79c   :  { %v8676_v28 = vpop.f32.mrf.mxu1 }
 0x79d   :  { %2480 = vrot.lane.b32.xlu1 %v7592_v21, %s8277_s1 }
 0x79f   :  { %2478 = vrot.lane.b32.xlu0 %v2326_v22, %s8277_s1 }
 0x7a1   :  { %2468 = vrot.lane.b32.xlu1 %v7595_v23, %s8275_s28 }
 0x7a3   :  { %2474 = vrot.lane.b32.xlu0 %v2336_v24, %s8276_s29 }
 0x7a5   :  { %2446 = vrot.lane.b32.xlu1 %v2251_v19, %s8276_s29 }
 0x7a7   :  { %2448 = vrot.lane.b32.xlu0 %v7581_v18, %s8276_s29 }
 0x7a9   :  { %2476 = vrot.lane.b32.xlu1 %v7595_v23, %s8276_s29 }
 0x7ab   :  { %2452 = vrot.lane.b32.xlu0 %v7578_v15, %s8277_s1 }
 0x7ad   :  { %2484 = vrot.lane.b32.xlu1 %v7595_v23, %s8277_s1 }
 0x7af   :  { %2454 = vrot.lane.b32.xlu0 %v2251_v19, %s8277_s1 }
 0x7b1   :  { %2450 = vrot.lane.b32.xlu1 %v2241_v17, %s8277_s1 }
 0x7b3   :  { %2490 = vrot.lane.b32.xlu0 %v8669_v26, %s8275_s28 }
 0x7b5   :  { %2482 = vrot.lane.b32.xlu1 %v2336_v24, %s8277_s1 }
 0x7b7   :  { %2494 = vrot.lane.b32.xlu0 %v8676_v28, %s8275_s28 }
 0x7b9   :  { %2456 = vrot.lane.b32.xlu1 %v7581_v18, %s8277_s1 }
 0x7bd   :  { %2492 = vrot.lane.b32.xlu1 %v8666_v25, %s8275_s28 }
 0x7c1   :  { %2504 = vrot.lane.b32.xlu1 %v8666_v25, %s8276_s29 }
 0x7c5   :  { %2502 = vrot.lane.b32.xlu1 %v8669_v26, %s8276_s29 }
 0x7c9   :  { %2496 = vrot.lane.b32.xlu1 %v8672_v27, %s8275_s28 }
 0x7f9   :  { %v2437_v29 = vpop.permute.xlu0 %2436 }
 0x7fb   :  { %v2435_v30 = vpop.permute.xlu1 %2434 }
 0x7fc   :  { %7628 = vmatprep.mubr.msk.f32.mxu1 %vm448_vm2, %v2435_v30 }
 0x7fd   :  { %v2445_v33 = vpop.permute.xlu0 %2444 }
 0x7ff   :  { %v2443_v35 = vpop.permute.xlu1 %2442 }
 0x801   :  { %v2441_v37 = vpop.permute.xlu0 %2440 }
 0x803   :  { %v2439_v39 = vpop.permute.xlu1 %2438 }
 0x804   :  { %7635 = vmatprep.mubr.msk.f32.mxu0 %vm448_vm2, %v2439_v39 }
 0x805   :  { %v2463_v40 = vpop.permute.xlu0 %2462 }
 0x807   :  { %v2465_v41 = vpop.permute.xlu1 %2464 }
 0x808   :  { %7624 = vmatprep.subr.msk.mxu1 %vm448_vm2, %v2465_v41 }
 0x809   :  { %v2471_v42 = vpop.permute.xlu0 %2470  ;;  %7625 = vmatpush3.xpose.msk.msra.mxu1 %vm448_vm2, %v2465_v41 }
 0x80a   :  { %7626 = vmatprep.subr.msk.mxu1 %vm448_vm2, %v2463_v40 }
 0x80b   :  { %v2473_v43 = vpop.permute.xlu1 %2472 }
 0x80d   :  { %7627 = vmatpush3.xpose.msk.msra.mxu1 %vm448_vm2, %v2463_v40  ;;  %v2467_v45 = vpop.permute.xlu0 %2466 }
 0x80e   :  { %7638 = vmatprep.subr.msk.mxu1 %vm448_vm2, %v2473_v43 }
 0x80f   :  { %v2481_v46 = vpop.permute.xlu1 %2480 }
 0x810   :  { %7629 = vmatmul.mubr.msk.f32.vlgmr.msra.gmra.mxu1 %vm448_vm2, %v2437_v29 }
 0x811   :  { %7639 = vmatpush3.xpose.msk.msra.mxu1 %vm448_vm2, %v2473_v43  ;;  %7642 = vmatprep.mubr.msk.f32.mxu1 %vm448_vm2, %v2443_v35  ;;  %v2479_v48 = vpop.permute.xlu0 %2478 }
 0x812   :  { %7640 = vmatprep.subr.msk.mxu1 %vm448_vm2, %v2471_v42 }
 0x813   :  { %v2469_v49 = vpop.permute.xlu1 %2468 }
 0x814   :  { %7631 = vmatprep.subr.msk.mxu0 %vm448_vm2, %v2469_v49 }
 0x815   :  { %7641 = vmatpush3.xpose.msk.msra.mxu1 %vm448_vm2, %v2471_v42  ;;  %v2475_v50 = vpop.permute.xlu0 %2474  ;;  %7632 = vmatpush3.xpose.msk.msra.mxu0 %vm448_vm2, %v2469_v49 }
 0x816   :  { %7633 = vmatprep.subr.msk.mxu0 %vm448_vm2, %v2467_v45  ;;  %7652 = vmatprep.subr.msk.mxu1 %vm448_vm2, %v2481_v46 }
 0x817   :  { %v2447_v51 = vpop.permute.xlu1 %2446 }
 0x818   :  { %7643 = vmatmul.mubr.msk.f32.vlgmr.msra.gmra.mxu1 %vm448_vm2, %v2445_v33 }
 0x819   :  { %7653 = vmatpush3.xpose.msk.msra.mxu1 %vm448_vm2, %v2481_v46  ;;  %v2449_v36 = vpop.permute.xlu0 %2448  ;;  %7634 = vmatpush3.xpose.msk.msra.mxu0 %vm448_vm2, %v2467_v45 }
 0x81a   :  { %7654 = vmatprep.subr.msk.mxu1 %vm448_vm2, %v2479_v48 }
 0x81b   :  { %v2477_v52 = vpop.permute.xlu1 %2476 }
 0x81c   :  { %7636 = vmatmul.mubr.msk.f32.vlgmr.msra.gmra.mxu0 %vm448_vm2, %v2441_v37  ;;  %7645 = vmatprep.subr.msk.mxu0 %vm448_vm2, %v2477_v52 }
 0x81d   :  { %7655 = vmatpush3.xpose.msk.msra.mxu1 %vm448_vm2, %v2479_v48  ;;  %7646 = vmatpush3.xpose.msk.msra.mxu0 %vm448_vm2, %v2477_v52  ;;  %v2453_v38 = vpop.permute.xlu0 %2452 }
 0x81e   :  { %7649 = vmatprep.mubr.msk.f32.mxu0 %vm448_vm2, %v2447_v51  ;;  %7647 = vmatprep.subr.msk.mxu0 %vm448_vm2, %v2475_v50 }
 0x81f   :  { %v2485_v53 = vpop.permute.xlu1 %2484  ;;  %7666 = vmatprep.subr.mxu1 %v8666_v25 }
 0x821   :  { %7648 = vmatpush3.xpose.msk.msra.mxu0 %vm448_vm2, %v2475_v50  ;;  %v2455_v55 = vpop.permute.xlu0 %2454 }
 0x822   :  { %7659 = vmatprep.subr.msk.mxu0 %vm448_vm2, %v2485_v53 }
 0x823   :  { %v2451_v54 = vpop.permute.xlu1 %2450 }
 0x824   :  { %7650 = vmatmul.mubr.msk.f32.vlgmr.msra.gmra.mxu0 %vm448_vm2, %v2449_v36  ;;  %7656 = vmatprep.mubr.msk.f32.mxu1 %vm448_vm2, %v2451_v54 }
 0x825   :  { %7657 = vmatmul.mubr.msk.f32.vlgmr.msra.gmra.mxu1 %vm448_vm2, %v2453_v38  ;;  %7660 = vmatpush3.xpose.msk.msra.mxu0 %vm448_vm2, %v2485_v53  ;;  %v2491_v63 = vpop.permute.xlu0 %2490 }
 0x826   :  { %7663 = vmatprep.mubr.msk.f32.mxu0 %vm448_vm2, %v2455_v55  ;;  %7667 = vmatpush3.msra.mxu1 %v8666_v25 }
 0x827   :  { %v2483_v56 = vpop.permute.xlu1 %2482  ;;  %7668 = vmatprep.subr.mxu1 %v8669_v26 }
 0x828   :  { %7661 = vmatprep.subr.msk.mxu0 %vm448_vm2, %v2483_v56  ;;  %7669 = vmatpush3.msra.mxu1 %v8669_v26 }
 0x829   :  { %7662 = vmatpush3.xpose.msk.msra.mxu0 %vm448_vm2, %v2483_v56  ;;  %7673 = vmatprep.subr.mxu1 %v8672_v27  ;;  %v8815_v49 = vpop.permute.xlu0 %2494 }
 0x82b   :  { %v2457_v9 = vpop.permute.xlu1 %2456 }
 0x82c   :  { %7664 = vmatmul.mubr.msk.f32.vlgmr.msra.gmra.mxu0 %vm448_vm2, %v2457_v9 }
 0x82f   :  { %v2493_v57 = vpop.permute.xlu1 %2492 }
 0x830   :  { %7680 = vmatprep.subr.mxu0 %v2493_v57 }
 0x831   :  { %7681 = vmatpush3.msra.mxu0 %v2493_v57 }
 0x832   :  { %7682 = vmatprep.subr.mxu0 %v2491_v63 }
 0x833   :  { %v8744_v3 = vpop.permute.xlu1 %2504  ;;  %7683 = vmatpush3.msra.mxu0 %v2491_v63 }
 0x834   :  { %7694 = vmatprep.subr.mxu0 %v8744_v3 }
 0x837   :  { %v8797_v39 = vpop.permute.xlu1 %2502 }
 0x83b   :  { %v8801_v40 = vpop.permute.xlu1 %2496 }
 0x847   :  { %v8731_v2 = vpop.f32.mrf.mxu0 }
 0x849   :  { %v8734_v60 = vpop.f32.mrf.mxu0 }
 0x857   :  { %v7616_v58 = vpop.f32.mrf.mxu1 }
 0x858   :  { %v3193_v59 = vsel %vm1739_vm3, %v7616_v58, -inf }
 0x859   :  { %3194 = vmax.xlane.f32.xlu1 %v3193_v59  ;;  %v8736_v61 = vpop.f32.mrf.mxu1 }
 0x85a   :  { %v3190_v62 = vsel %vm1739_vm3, %v8736_v61, -inf }
 0x85b   :  { %3191 = vmax.xlane.f32.xlu0 %v3190_v62  ;;  %v8740_v0 = vpop.f32.mrf.mxu0 }
 0x85c   :  { %v3199_v1 = vsel %vm1739_vm3, %v8740_v0, -inf }
 0x85d   :  { %3200 = vmax.xlane.f32.xlu1 %v3199_v1  ;;  %v8746_v4 = vpop.f32.mrf.mxu0 }
 0x85e   :  { %v3196_v5 = vsel %vm1739_vm3, %v8746_v4, -inf }
 0x85f   :  { %3197 = vmax.xlane.f32.xlu0 %v3196_v5 }
 0x8d0   :  { %v8751_v6 = vpop.f32.mrf.mxu1 }
 0x8d1   :  { %v3205_v7 = vsel %vm1739_vm3, %v8751_v6, -inf }
 0x8d2   :  { %v8755_v8 = vpop.f32.mrf.mxu1  ;;  %3206 = vmax.xlane.f32.xlu0 %v3205_v7 }
 0x8d3   :  { %v3202_v10 = vsel %vm1739_vm3, %v8755_v8, -inf }
 0x8d6   :  { %3203 = vmax.xlane.f32.xlu0 %v3202_v10 }
 0x8d8   :  { %v8759_v11 = vpop.f32.mrf.mxu1 }
 0x8d9   :  { %v3217_v12 = vsel %vm1739_vm3, %v8759_v11, -inf }
 0x8da   :  { %v8763_v13 = vpop.f32.mrf.mxu1  ;;  %3218 = vmax.xlane.f32.xlu0 %v3217_v12 }
 0x8db   :  { %v3214_v15 = vsel %vm1739_vm3, %v8763_v13, -inf }
 0x8dc   :  { %v8765_v14 = vpop.f32.mrf.mxu0 }
 0x8dd   :  { %v3211_v16 = vsel %vm1739_vm3, %v8765_v14, -inf }
 0x8de   :  { %3215 = vmax.xlane.f32.xlu0 %v3214_v15  ;;  %3212 = vmax.xlane.f32.xlu1 %v3211_v16  ;;  %v8771_v17 = vpop.f32.mrf.mxu0 }
 0x8df   :  { %v3208_v18 = vsel %vm1739_vm3, %v8771_v17, -inf }
 0x8e2   :  { %3209 = vmax.xlane.f32.xlu1 %v3208_v18  ;;  %v3195_v41 = vpop.xlane.xlu1 %3194 }
 0x8e3   :  { %v3239_v42 = vsub.f32 %v7616_v58, %v3195_v41 }
 0x8e4   :  { %v8775_v19 = vpop.f32.mrf.mxu0  ;;  %v3192_v50 = vpop.xlane.xlu0 %3191 }
 0x8e5   :  { %v8777_v21 = vpop.f32.mrf.mxu1  ;;  %v3223_v22 = vsel %vm1739_vm3, %v8775_v19, -inf  ;;  %v3256_v43 = vmul.f32 1.442695, %v3239_v42  ;;  %v3238_v51 = vsub.f32 %v8736_v61, %v3192_v50 }
 0x8e6   :  { %3224 = vmax.xlane.f32.xlu1 %v3223_v22  ;;  %v8781_v23 = vpop.f32.mrf.mxu0  ;;  %v3229_v24 = vsel %vm1739_vm3, %v8777_v21, -inf  ;;  %v3201_v36 = vpop.xlane.xlu1 %3200 }
 0x8e7   :  { %v8785_v29 = vpop.f32.mrf.mxu1  ;;  %3230 = vmax.xlane.f32.xlu0 %v3229_v24  ;;  %v3220_v30 = vsel %vm1739_vm3, %v8781_v23, -inf  ;;  %8048 = vpow2.f32 %v3256_v43  ;;  %v3254_v52 = vmul.f32 1.442695, %v3238_v51  ;;  %v3241_v38 = vsub.f32 %v8740_v0, %v3201_v36 }
 0x8e8   :  { %v3226_v33 = vsel %vm1739_vm3, %v8785_v29, -inf  ;;  %v3198_v53 = vpop.xlane.xlu0 %3197 }
 0x8e9   :  { %8050 = vpow2.f32 %v3254_v52  ;;  %v3260_v54 = vmul.f32 1.442695, %v3241_v38  ;;  %v3240_v55 = vsub.f32 %v8746_v4, %v3198_v53 }
 0x8ea   :  { %3221 = vmax.xlane.f32.xlu1 %v3220_v30 }
 0x8eb   :  { %3227 = vmax.xlane.f32.xlu0 %v3226_v33  ;;  %8052 = vpow2.f32 %v3260_v54  ;;  %v3258_v56 = vmul.f32 1.442695, %v3240_v55 }
 0x8ec   :  { %v8791_v35 = vpop.f32.mrf.mxu0 }
 0x8ed   :  { %v3235_v37 = vsel %vm1739_vm3, %v8791_v35, -inf  ;;  %8054 = vpow2.f32 %v3258_v56 }
 0x8ee   :  { %v8805_v45 = vpop.f32.mrf.mxu0 }
 0x8ef   :  { %3236 = vmax.xlane.f32.xlu0 %v3235_v37  ;;  %v3232_v46 = vsel %vm1739_vm3, %v8805_v45, -inf }
 0x8fb   :  { %2516 = vrot.lane.b32.xlu1 %v8666_v25, %s8277_s1  ;;  %v8809_v25 = vpop.eup %8048 }
 0x8fc   :  { %v3289_v48 = vsel %vm1739_vm3, %v8809_v25, 0.0  ;;  %v8820_v9 = vpop.eup %8050 }
 0x8fd   :  { %v8824_v57 = vpop.eup %8052 }
 0x8fe   :  { %v3295_v58 = vsel %vm1739_vm3, %v8824_v57, 0.0  ;;  %v8828_v59 = vpop.eup %8054 }
 0x8ff   :  { %v3292_v62 = vsel %vm1739_vm3, %v8828_v59, 0.0 }
 0x905   :  { %2508 = vrot.lane.b32.xlu0 %v8672_v27, %s8276_s29 }
 0x909   :  { %2506 = vrot.lane.b32.xlu0 %v8676_v28, %s8276_s29 }
 0x91f   :  { %3233 = vmax.xlane.f32.xlu1 %v3232_v46 }
 0x928   :  { %3290 = vadd.xlane.f32.xlu0 %v3289_v48 }
 0x930   :  { %2514 = vrot.lane.b32.xlu1 %v8669_v26, %s8277_s1  ;;  %v3286_v26 = vsel %vm1739_vm3, %v8820_v9, 0.0 }
 0x954   :  { %3287 = vadd.xlane.f32.xlu1 %v3286_v26 }
 0x958   :  { %3296 = vadd.xlane.f32.xlu1 %v3295_v58 }
 0x95b   :  { %v3207_v61 = vpop.xlane.xlu0 %3206 }
 0x95c   :  { %v3243_v63 = vsub.f32 %v8751_v6, %v3207_v61  ;;  %3293 = vadd.xlane.f32.xlu1 %v3292_v62 }
 0x95e   :  { %v3264_v0 = vmul.f32 1.442695, %v3243_v63 }
 0x95f   :  { %v3204_v1 = vpop.xlane.xlu0 %3203 }
 0x960   :  { %8056 = vpow2.f32 %v3264_v0  ;;  %v3242_v4 = vsub.f32 %v8755_v8, %v3204_v1 }
 0x962   :  { %v3262_v5 = vmul.f32 1.442695, %v3242_v4 }
 0x963   :  { %v3219_v7 = vpop.xlane.xlu0 %3218 }
 0x964   :  { %8058 = vpow2.f32 %v3262_v5  ;;  %v3247_v10 = vsub.f32 %v8759_v11, %v3219_v7 }
 0x966   :  { %v3272_v12 = vmul.f32 1.442695, %v3247_v10 }
 0x967   :  { %v3216_v15 = vpop.xlane.xlu0 %3215  ;;  %v3213_v16 = vpop.xlane.xlu1 %3212 }
 0x968   :  { %8060 = vpow2.f32 %v3272_v12  ;;  %v3246_v18 = vsub.f32 %v8763_v13, %v3216_v15  ;;  %v3245_v22 = vsub.f32 %v8765_v14, %v3213_v16 }
 0x96a   :  { %v3270_v6 = vmul.f32 1.442695, %v3246_v18  ;;  %v3268_v24 = vmul.f32 1.442695, %v3245_v22 }
 0x96b   :  { %v3210_v30 = vpop.xlane.xlu1 %3209 }
 0x96c   :  { %8062 = vpow2.f32 %v3270_v6  ;;  %v3244_v33 = vsub.f32 %v8771_v17, %v3210_v30 }
 0x96d   :  { %v8838_v8 = vpop.eup %8056  ;;  %8064 = vpow2.f32 %v3268_v24 }
 0x96e   :  { %v3266_v37 = vmul.f32 1.442695, %v3244_v33  ;;  %v3301_v11 = vsel %vm1739_vm3, %v8838_v8, 0.0 }
 0x96f   :  { %v3225_v41 = vpop.xlane.xlu1 %3224  ;;  %3302 = vadd.xlane.f32.xlu0 %v3301_v11 }
 0x970   :  { %8066 = vpow2.f32 %v3266_v37  ;;  %v3249_v13 = vsub.f32 %v8775_v19, %v3225_v41  ;;  %v3231_v42 = vpop.xlane.xlu0 %3230 }
 0x971   :  { %v8843_v14 = vpop.eup %8058  ;;  %v3251_v43 = vsub.f32 %v8777_v21, %v3231_v42 }
 0x972   :  { %v3276_v46 = vmul.f32 1.442695, %v3249_v13  ;;  %v3298_v17 = vsel %vm1739_vm3, %v8843_v14, 0.0 }
 0x973   :  { %v3280_v48 = vmul.f32 1.442695, %v3251_v43  ;;  %v3222_v50 = vpop.xlane.xlu1 %3221  ;;  %3299 = vadd.xlane.f32.xlu0 %v3298_v17 }
 0x974   :  { %8068 = vpow2.f32 %v3276_v46  ;;  %v3248_v51 = vsub.f32 %v8781_v23, %v3222_v50  ;;  %v3228_v36 = vpop.xlane.xlu0 %3227 }
 0x975   :  { %v8849_v52 = vpop.eup %8060  ;;  %8070 = vpow2.f32 %v3280_v48  ;;  %v3250_v19 = vsub.f32 %v8785_v29, %v3228_v36 }
 0x976   :  { %v3274_v38 = vmul.f32 1.442695, %v3248_v51  ;;  %v3313_v21 = vsel %vm1739_vm3, %v8849_v52, 0.0 }
 0x977   :  { %v3278_v53 = vmul.f32 1.442695, %v3250_v19  ;;  %3314 = vadd.xlane.f32.xlu0 %v3313_v21  ;;  %v8889_v16 = vpop.permute.xlu1 %2516 }
 0x978   :  { %8072 = vpow2.f32 %v3274_v38  ;;  %v3237_v54 = vpop.xlane.xlu0 %3236 }
 0x979   :  { %v8854_v55 = vpop.eup %8062  ;;  %8074 = vpow2.f32 %v3278_v53  ;;  %v3253_v56 = vsub.f32 %v8791_v35, %v3237_v54 }
 0x97a   :  { %v8857_v23 = vpop.eup %8064  ;;  %v3310_v26 = vsel %vm1739_vm3, %v8854_v55, 0.0 }
 0x97b   :  { %v3284_v58 = vmul.f32 1.442695, %v3253_v56  ;;  %3311 = vadd.xlane.f32.xlu0 %v3310_v26  ;;  %v3307_v29 = vsel %vm1739_vm3, %v8857_v23, 0.0 }
 0x97c   :  { %3308 = vadd.xlane.f32.xlu1 %v3307_v29  ;;  %v8898_v33 = vpop.permute.xlu0 %2508 }
 0x97d   :  { %v8863_v61 = vpop.eup %8066  ;;  %8076 = vpow2.f32 %v3284_v58 }
 0x97e   :  { %v3304_v62 = vsel %vm1739_vm3, %v8863_v61, 0.0 }
 0x980   :  { %3305 = vadd.xlane.f32.xlu1 %v3304_v62  ;;  %v8900_v37 = vpop.permute.xlu0 %2506 }
 0x981   :  { %v8867_v63 = vpop.eup %8068 }
 0x982   :  { %v8869_v35 = vpop.eup %8070  ;;  %v3319_v0 = vsel %vm1739_vm3, %v8867_v63, 0.0 }
 0x983   :  { %v3325_v1 = vsel %vm1739_vm3, %v8869_v35, 0.0 }
 0x984   :  { %3320 = vadd.xlane.f32.xlu1 %v3319_v0  ;;  %3326 = vadd.xlane.f32.xlu0 %v3325_v1 }
 0x985   :  { %v8875_v4 = vpop.eup %8072 }
 0x986   :  { %v8877_v5 = vpop.eup %8074  ;;  %v3316_v7 = vsel %vm1739_vm3, %v8875_v4, 0.0 }
 0x987   :  { %v3322_v10 = vsel %vm1739_vm3, %v8877_v5, 0.0 }
 0x988   :  { %3317 = vadd.xlane.f32.xlu1 %v3316_v7  ;;  %3323 = vadd.xlane.f32.xlu0 %v3322_v10 }
 0x98a   :  { %v8883_v12 = vpop.eup %8076 }
 0x98b   :  { %v3331_v15 = vsel %vm1739_vm3, %v8883_v12, 0.0 }
 0x98c   :  { %3332 = vadd.xlane.f32.xlu0 %v3331_v15 }
 0x9a2   :  { %2520 = vrot.lane.b32.xlu0 %v8672_v27, %s8277_s1 }
 0x9a8   :  { %v3234_v18 = vpop.xlane.xlu1 %3233 }
 0x9a9   :  { %v3252_v22 = vsub.f32 %v8805_v45, %v3234_v18 }
 0x9ab   :  { %v3282_v6 = vmul.f32 1.442695, %v3252_v22 }
 0x9ac   :  { %v8902_v11 = vpop.permute.xlu1 %2514 }
 0x9ad   :  { %8078 = vpow2.f32 %v3282_v6 }
 0x9b1   :  { %v3291_v41 = vpop.xlane.xlu0 %3290 }
 0x9b2   :  { %8080 = vrcp.f32 %v3291_v41 }
 0x9ba   :  { %v8892_v24 = vpop.eup %8078 }
 0x9bb   :  { %v3328_v30 = vsel %vm1739_vm3, %v8892_v24, 0.0 }
 0x9bc   :  { %3329 = vadd.xlane.f32.xlu1 %v3328_v30 }
 0x9bf   :  { %v8081_v43 = vpop.eup %8080 }
 0x9c0   :  { %v3351_v48 = vmul.f32 %v8081_v43, %v8809_v25 }
 0x9cd   :  { %2518 = vrot.lane.b32.xlu1 %v8676_v28, %s8277_s1 }
 0x9dd   :  { %v3288_v45 = vpop.xlane.xlu1 %3287 }
 0x9de   :  { %8082 = vrcp.f32 %v3288_v45  ;;  %v7065_v45 = vld [vmem:[%s9457_s3 + $0x18] sm:$0xff]  }
 0x9e1   :  { %v3297_v13 = vpop.xlane.xlu1 %3296 }
 0x9e2   :  { %8084 = vrcp.f32 %v3297_v13 }
 0x9e5   :  { %v3294_v42 = vpop.xlane.xlu1 %3293 }
 0x9e6   :  { %8086 = vrcp.f32 %v3294_v42  ;;  %v7064_v42 = vld [vmem:[%s9457_s3 + $0x10] sm:$0xff]  }
 0x9e7   :  { %v6927_v43 = vunpack.c.h.bf16 %v7064_v42 }
 0x9eb   :  { %v8083_v46 = vpop.eup %8082 }
 0x9ec   :  { %v3350_v17 = vmul.f32 %v8083_v46, %v8820_v9 }
 0x9ee   :  { %7670 = vmatprep.mubr.msk.f32.mxu1 %vm1739_vm3, %v3350_v17  ;;  %v6926_v17 = vunpack.c.l.bf16 %v7064_v42 }
 0x9ef   :  { %7671 = vmatmul.mubr.msk.f32.vlgmr.msra.gmra.mxu1 %vm1739_vm3, %v3351_v48  ;;  %v8085_v50 = vpop.eup %8084 }
 0x9f0   :  { %7674 = vmatpush3.msra.mxu1 %v8672_v27  ;;  %v3353_v9 = vmul.f32 %v8085_v50, %v8824_v57 }
 0x9f1   :  { %7675 = vmatprep.subr.mxu1 %v8676_v28 }
 0x9f2   :  { %7676 = vmatpush3.msra.mxu1 %v8676_v28 }
 0x9f3   :  { %v8087_v51 = vpop.eup %8086  ;;  %7687 = vmatprep.subr.mxu1 %v8801_v40 }
 0x9f4   :  { %v3352_v36 = vmul.f32 %v8087_v51, %v8828_v59 }
 0x9f6   :  { %7677 = vmatprep.mubr.msk.f32.mxu1 %vm1739_vm3, %v3352_v36 }
 0x9f7   :  { %7678 = vmatmul.mubr.msk.f32.vlgmr.msra.gmra.mxu1 %vm1739_vm3, %v3353_v9 }
 0x9f8   :  { %7688 = vmatpush3.msra.mxu1 %v8801_v40  ;;  %v3303_v25 = vpop.xlane.xlu0 %3302 }
 0x9f9   :  { %7689 = vmatprep.subr.mxu1 %v8815_v49  ;;  %8088 = vrcp.f32 %v3303_v25 }
 0x9fa   :  { %7690 = vmatpush3.msra.mxu1 %v8815_v49 }
 0x9fb   :  { %7701 = vmatprep.subr.mxu1 %v8898_v33 }
 0x9fc   :  { %v3300_v27 = vpop.xlane.xlu0 %3299 }
 0x9fd   :  { %8090 = vrcp.f32 %v3300_v27 }
 0xa00   :  { %v3315_v28 = vpop.xlane.xlu0 %3314 }
 0xa01   :  { %8092 = vrcp.f32 %v3315_v28 }
 0xa04   :  { %v3312_v59 = vpop.xlane.xlu0 %3311 }
 0xa05   :  { %8094 = vrcp.f32 %v3312_v59  ;;  %v3309_v57 = vpop.xlane.xlu1 %3308 }
 0xa06   :  { %v8089_v19 = vpop.eup %8088  ;;  %8096 = vrcp.f32 %v3309_v57 }
 0xa07   :  { %v3355_v53 = vmul.f32 %v8089_v19, %v8838_v8 }
 0xa09   :  { %v3306_v38 = vpop.xlane.xlu1 %3305 }
 0xa0a   :  { %v8091_v21 = vpop.eup %8090  ;;  %8098 = vrcp.f32 %v3306_v38 }
 0xa0b   :  { %v3354_v40 = vmul.f32 %v8091_v21, %v8843_v14 }
 0xa0d   :  { %v3321_v49 = vpop.xlane.xlu1 %3320  ;;  %7684 = vmatprep.mubr.msk.f32.mxu0 %vm1739_vm3, %v3354_v40  ;;  %v3327_v54 = vpop.xlane.xlu0 %3326 }
 0xa0e   :  { %7685 = vmatmul.mubr.msk.f32.vlgmr.msra.gmra.mxu0 %vm1739_vm3, %v3355_v53  ;;  %8100 = vrcp.f32 %v3321_v49  ;;  %v8093_v56 = vpop.eup %8092 }
 0xa0f   :  { %7695 = vmatpush3.msra.mxu0 %v8744_v3  ;;  %8102 = vrcp.f32 %v3327_v54  ;;  %v3359_v29 = vmul.f32 %v8093_v56, %v8849_v52 }
 0xa10   :  { %7696 = vmatprep.subr.mxu0 %v8797_v39 }
 0xa11   :  { %7697 = vmatpush3.msra.mxu0 %v8797_v39  ;;  %v3318_v26 = vpop.xlane.xlu1 %3317  ;;  %v3324_v58 = vpop.xlane.xlu0 %3323 }
 0xa12   :  { %v8095_v14 = vpop.eup %8094  ;;  %8104 = vrcp.f32 %v3318_v26  ;;  %7708 = vmatprep.subr.mxu0 %v8889_v16 }
 0xa13   :  { %8106 = vrcp.f32 %v3324_v58  ;;  %v3358_v8 = vmul.f32 %v8095_v14, %v8854_v55  ;;  %v8097_v3 = vpop.eup %8096 }
 0xa14   :  { %v3357_v1 = vmul.f32 %v8097_v3, %v8857_v23 }
 0xa15   :  { %7698 = vmatprep.mubr.msk.f32.mxu0 %vm1739_vm3, %v3358_v8  ;;  %v3333_v39 = vpop.xlane.xlu0 %3332 }
 0xa16   :  { %7699 = vmatmul.mubr.msk.f32.vlgmr.msra.gmra.mxu0 %vm1739_vm3, %v3359_v29  ;;  %8108 = vrcp.f32 %v3333_v39 }
 0xa17   :  { %v8099_v62 = vpop.eup %8098  ;;  %7709 = vmatpush3.msra.mxu0 %v8889_v16 }
 0xa18   :  { %7710 = vmatprep.subr.mxu0 %v8902_v11  ;;  %v3356_v0 = vmul.f32 %v8099_v62, %v8863_v61 }
 0xa19   :  { %7711 = vmatpush3.msra.mxu0 %v8902_v11  ;;  %v2521_v7 = vpop.permute.xlu0 %2520 }
 0xa1a   :  { %7691 = vmatprep.mubr.msk.f32.mxu1 %vm1739_vm3, %v3356_v0 }
 0xa1b   :  { %7692 = vmatmul.mubr.msk.f32.vlgmr.msra.gmra.mxu1 %vm1739_vm3, %v3357_v1  ;;  %v8101_v52 = vpop.eup %8100 }
 0xa1c   :  { %7702 = vmatpush3.msra.mxu1 %v8898_v33  ;;  %v8103_v55 = vpop.eup %8102  ;;  %v3361_v23 = vmul.f32 %v8101_v52, %v8867_v63 }
 0xa1d   :  { %7703 = vmatprep.subr.mxu1 %v8900_v37  ;;  %v3363_v18 = vmul.f32 %v8103_v55, %v8869_v35 }
 0xa1e   :  { %7704 = vmatpush3.msra.mxu1 %v8900_v37 }
 0xa1f   :  { %v8105_v10 = vpop.eup %8104  ;;  %7715 = vmatprep.subr.mxu1 %v2521_v7 }
 0xa20   :  { %v8107_v61 = vpop.eup %8106  ;;  %v3360_v15 = vmul.f32 %v8105_v10, %v8875_v4 }
 0xa21   :  { %v3362_v16 = vmul.f32 %v8107_v61, %v8877_v5 }
 0xa22   :  { %7705 = vmatprep.mubr.msk.f32.mxu1 %vm1739_vm3, %v3360_v15 }
 0xa23   :  { %7706 = vmatmul.mubr.msk.f32.vlgmr.msra.gmra.mxu1 %vm1739_vm3, %v3361_v23  ;;  %7712 = vmatprep.mubr.msk.f32.mxu0 %vm1739_vm3, %v3362_v16  ;;  %v8109_v63 = vpop.eup %8108  ;;  %v8172_v23 = vld [vmem:[#allocation2 + $0x8] sm:$0xff] }
 0xa24   :  { %7716 = vmatpush3.msra.mxu1 %v2521_v7  ;;  %7713 = vmatmul.mubr.msk.f32.vlgmr.msra.gmra.mxu0 %vm1739_vm3, %v3363_v18  ;;  %v3365_v30 = vmul.f32 %v8109_v63, %v8883_v12  ;;  %v6930_v12 = vunpack.c.l.bf16 %v7065_v45 }
 0xa45   :  { %v3330_v22 = vpop.xlane.xlu1 %3329 }
 0xa46   :  { %8110 = vrcp.f32 %v3330_v22  ;;  %v8173_v22 = vld [vmem:[#allocation2] sm:$0xff] }
 0xa49   :  { %v2519_v6 = vpop.permute.xlu1 %2518 }
 0xa4a   :  { %7717 = vmatprep.subr.mxu1 %v2519_v6 }
 0xa4b   :  { %7718 = vmatpush3.msra.mxu1 %v2519_v6 }
 0xa53   :  { %v8111_v4 = vpop.eup %8110 }
 0xa54   :  { %v3364_v5 = vmul.f32 %v8111_v4, %v8892_v24  ;;  %v6931_v24 = vunpack.c.h.bf16 %v7065_v45 }
 0xa56   :  { %7719 = vmatprep.mubr.msk.f32.mxu1 %vm1739_vm3, %v3364_v5  ;;  %7722 = vmatprep.subr.mxu0 %v6931_v24 }
 0xa57   :  { %7720 = vmatmul.mubr.msk.f32.vlgmr.msra.gmra.mxu1 %vm1739_vm3, %v3365_v30  ;;  %7723 = vmatpush3.msra.mxu0 %v6931_v24 }
 0xa58   :  { %7724 = vmatprep.subr.mxu0 %v6930_v12 }
 0xa59   :  { %7725 = vmatpush3.msra.mxu0 %v6930_v12 }
 0xa5a   :  { %7726 = vmatprep.subr.mxu0 %v6927_v43 }
 0xa5b   :  { %7727 = vmatpush3.msra.mxu0 %v6927_v43 }
 0xa5c   :  { %7728 = vmatprep.subr.mxu0 %v6926_v17 }
 0xa5d   :  { %7729 = vmatpush3.msra.mxu0 %v6926_v17 }
 0xaaf   :  { %v7672_v33 = vpop.f32.mrf.mxu1 }
 0xab1   :  { %v3438_v11 = vpop.f32.mrf.mxu1 }
 0xab7   :  { %v7679_v41 = vpop.f32.mrf.mxu1 }
 0xab9   :  { %v3519_v13 = vpop.f32.mrf.mxu1 }
 0xace   :  { %v7686_v35 = vpop.f32.mrf.mxu0 }
 0xacf   :  { %4020 = vrot.lane.b32.xlu1 %v7686_v35, %s8268_s20  ;;  %v8174_v35 = vld [vmem:[#allocation2 + $0x10] sm:$0xff] }
 0xad0   :  { %v3600_v37 = vpop.f32.mrf.mxu0 }
 0xad1   :  { %4018 = vrot.lane.b32.xlu0 %v3600_v37, %s8268_s20  ;;  %v8175_v37 = vld [vmem:[#allocation2 + $0x18] sm:$0xff] }
 0xad6   :  { %v7700_v48 = vpop.f32.mrf.mxu0 }
 0xad8   :  { %v3762_v51 = vpop.f32.mrf.mxu0 }
 0xadb   :  { %v7693_v46 = vpop.f32.mrf.mxu1 }
 0xadc   :  { %4024 = vrot.lane.b32.xlu1 %v7693_v46, %s8268_s20 }
 0xadd   :  { %v3681_v50 = vpop.f32.mrf.mxu1 }
 0xade   :  { %4022 = vrot.lane.b32.xlu0 %v3681_v50, %s8268_s20 }
 0xae0   :  { %4036 = vrot.lane.b32.xlu1 %v7700_v48, %s8270_s26 }
 0xae2   :  { %4034 = vrot.lane.b32.xlu0 %v3762_v51, %s8270_s26 }
 0xae3   :  { %v7707_v36 = vpop.f32.mrf.mxu1 }
 0xae4   :  { %4040 = vrot.lane.b32.xlu1 %v7707_v36, %s8270_s26  ;;  %v7714_v9 = vpop.f32.mrf.mxu0  ;;  %v7067_v36 = vld [vmem:[%s9459_s5 + $0x18] sm:$0xff]  }
 0xae5   :  { %v3843_v25 = vpop.f32.mrf.mxu1 }
 0xae6   :  { %4038 = vrot.lane.b32.xlu0 %v3843_v25, %s8270_s26  ;;  %v3924_v27 = vpop.f32.mrf.mxu0  ;;  %v6938_v25 = vunpack.c.l.bf16 %v7067_v36 }
 0xae8   :  { %4052 = vrot.lane.b32.xlu1 %v7714_v9, %s8278_s13  ;;  %v6939_v9 = vunpack.c.h.bf16 %v7067_v36 }
 0xaea   :  { %4050 = vrot.lane.b32.xlu0 %v3924_v27, %s8278_s13  ;;  %v7066_v27 = vld [vmem:[%s9459_s5 + $0x10] sm:$0xff]   ;;  %7736 = vmatprep.subr.mxu1 %v6939_v9 }
 0xaeb   :  { %7737 = vmatpush3.msra.mxu1 %v6939_v9 }
 0xaec   :  { %7738 = vmatprep.subr.mxu1 %v6938_v25 }
 0xaed   :  { %7739 = vmatpush3.msra.mxu1 %v6938_v25 }
 0xb17   :  { %v7721_v28 = vpop.f32.mrf.mxu1 }
 0xb18   :  { %4056 = vrot.lane.b32.xlu1 %v7721_v28, %s8278_s13  ;;  %v6935_v28 = vunpack.c.h.bf16 %v7066_v27 }
 0xb19   :  { %v4005_v59 = vpop.f32.mrf.mxu1 }
 0xb1a   :  { %4054 = vrot.lane.b32.xlu0 %v4005_v59, %s8278_s13  ;;  %v6934_v59 = vunpack.c.l.bf16 %v7066_v27  ;;  %7740 = vmatprep.subr.mxu1 %v6935_v28 }
 0xb1b   :  { %7741 = vmatpush3.msra.mxu1 %v6935_v28 }
 0xb1c   :  { %7742 = vmatprep.subr.mxu1 %v6934_v59 }
 0xb1d   :  { %7743 = vmatpush3.msra.mxu1 %v6934_v59 }
 0xb41   :  { %v4021_v57 = vpop.permute.xlu1 %4020 }
 0xb42   :  { %v4063_v58 = vsel %vm448_vm2, %v7672_v33, %v4021_v57 }
 0xb43   :  { %v4019_v19 = vpop.permute.xlu0 %4018 }
 0xb44   :  { %v4062_v56 = vsel %vm448_vm2, %v3438_v11, %v4019_v19 }
 0xb4e   :  { %v4025_v38 = vpop.permute.xlu1 %4024 }
 0xb4f   :  { %v4065_v1 = vsel %vm448_vm2, %v7679_v41, %v4025_v38  ;;  %v6637_v38 = vld [vmem:[#allocation7] ss:$0 sm:$0xff] }
 0xb50   :  { %v4023_v21 = vpop.permute.xlu0 %4022 }
 0xb51   :  { %v4064_v39 = vsel %vm448_vm2, %v3519_v13, %v4023_v21  ;;  %v2033_v21 = vadd.f32 %v6637_v38, %v8734_v60 }
 0xb52   :  { %v4037_v40 = vpop.permute.xlu1 %4036 }
 0xb53   :  { %v4067_v29 = vsel %vm1739_vm3, %v4063_v58, %v4037_v40 }
 0xb54   :  { %v4035_v53 = vpop.permute.xlu0 %4034 }
 0xb55   :  { %v4066_v14 = vsel %vm1739_vm3, %v4062_v56, %v4035_v53  ;;  %v2038_v56 = vadd.f32 %v8731_v2, %v6637_v38  ;;  %v7075_v2 = vld [vmem:[%s9461_s7 + $0x78] sm:$0xff]  }
 0xb56   :  { %v4041_v49 = vpop.permute.xlu1 %4040 }
 0xb57   :  { %v4069_v7 = vsel %vm1739_vm3, %v4065_v1, %v4041_v49  ;;  %v7073_v1 = vld [vmem:[%s9461_s7 + $0x68] sm:$0xff]  }
 0xb58   :  { %v4039_v54 = vpop.permute.xlu0 %4038 }
 0xb59   :  { %v4068_v52 = vsel %vm1739_vm3, %v4064_v39, %v4039_v54  ;;  %v6970_v39 = vunpack.c.l.bf16 %v7075_v2 }
 0xb5a   :  { %v4053_v26 = vpop.permute.xlu1 %4052 }
 0xb5b   :  { %v4071_v62 = vsel %vm1742_vm4, %v4067_v29, %v4053_v26  ;;  %v9015_v26 = vadd.f32 %v2033_v21, %v8590_v44 }
 0xb5c   :  { %v4051_v8 = vpop.permute.xlu0 %4050 }
 0xb5d   :  { %v4070_v3 = vsel %vm1742_vm4, %v4066_v14, %v4051_v8  ;;  %v9023_v8 = vadd.f32 %v2038_v56, %v8597_v47  ;;  %v7074_v47 = vld [vmem:[%s9461_s7 + $0x70] sm:$0xff]  }
 0xb5e   :  { %7730 = vmatprep.mubr.msk.f32.mxu0 %vm168_vm0, %v4070_v3  ;;  %v2043_v3 = vsel %vm168_vm0, %v9015_v26, 0.0 }
 0xb5f   :  { %7731 = vmatmul.mubr.msk.f32.vlgmr.msra.gmra.mxu0 %vm168_vm0, %v4071_v62  ;;  %v2046_v44 = vsel %vm168_vm0, %v9023_v8, 0.0  ;;  %v6971_v62 = vunpack.c.h.bf16 %v7075_v2 }
 0xb61   :  { %7750 = vmatprep.subr.mxu0 %v6971_v62 }
 0xb62   :  { %7751 = vmatpush3.msra.mxu0 %v6971_v62 }
 0xb63   :  { %7752 = vmatprep.subr.mxu0 %v6970_v39 }
 0xb64   :  { %7753 = vmatpush3.msra.mxu0 %v6970_v39 }
 0xb8a   :  { %v4057_v0 = vpop.permute.xlu1 %4056 }
 0xb8b   :  { %v4073_v61 = vsel %vm1742_vm4, %v4069_v7, %v4057_v0  ;;  %v6967_v0 = vunpack.c.h.bf16 %v7074_v47  ;;  %v7072_v7 = vld [vmem:[%s9461_s7 + $0x60] sm:$0xff]  }
 0xb8c   :  { %v4055_v55 = vpop.permute.xlu0 %4054 }
 0xb8d   :  { %v4072_v10 = vsel %vm1742_vm4, %v4068_v52, %v4055_v55  ;;  %v6966_v52 = vunpack.c.l.bf16 %v7074_v47  ;;  %7754 = vmatprep.subr.mxu0 %v6967_v0  ;;  %v6963_v55 = vunpack.c.h.bf16 %v7073_v1 }
 0xb8e   :  { %7733 = vmatprep.mubr.msk.f32.mxu0 %vm168_vm0, %v4072_v10  ;;  %7755 = vmatpush3.msra.mxu0 %v6967_v0  ;;  %v6962_v10 = vunpack.c.l.bf16 %v7073_v1 }
 0xb8f   :  { %7734 = vmatmul.mubr.msk.f32.gmra.mxu0 %vm168_vm0, %v4073_v61  ;;  %7756 = vmatprep.subr.mxu0 %v6966_v52  ;;  %v6959_v61 = vunpack.c.h.bf16 %v7072_v7 }
 0xb90   :  { %7757 = vmatpush3.msra.mxu0 %v6966_v52 }
 0xb91   :  { %7758 = vmatprep.subr.mxu0 %v6963_v55 }
 0xb92   :  { %7759 = vmatpush3.msra.mxu0 %v6963_v55 }
 0xb93   :  { %7760 = vmatprep.subr.mxu0 %v6962_v10 }
 0xb94   :  { %7761 = vmatpush3.msra.mxu0 %v6962_v10 }
 0xb95   :  { %7762 = vmatprep.subr.mxu0 %v6959_v61 }
 0xb96   :  { %7763 = vmatpush3.msra.mxu0 %v6959_v61 }
 0xc1f   :  { %v7732_v15 = vpop.f32.mrf.mxu0 }
 0xc20   :  { %v4172_v16 = vadd.f32 %v8172_v23, %v7732_v15  ;;  %v7071_v15 = vld [vmem:[%s9461_s7 + $0x58] sm:$0xff]   ;;  %v6958_v23 = vunpack.c.l.bf16 %v7072_v7 }
 0xc21   :  { %v4152_v18 = vpop.f32.mrf.mxu0 }
 0xc22   :  { %v4171_v6 = vadd.f32 %v8173_v22, %v4152_v18  ;;  %v4178_v63 = vsel %vm168_vm0, %v4172_v16, 0.0  ;;  %v7070_v18 = vld [vmem:[%s9461_s7 + $0x50] sm:$0xff]   ;;  %7764 = vmatprep.subr.mxu0 %v6958_v23  ;;  %v6954_v22 = vunpack.c.l.bf16 %v7071_v15 }
 0xc23   :  { %4179 = vadd.xlane.f32.xlu1 %v4178_v63  ;;  %7765 = vmatpush3.msra.mxu0 %v6958_v23  ;;  %v6950_v63 = vunpack.c.l.bf16 %v7070_v18 }
 0xc24   :  { %v4175_v4 = vsel %vm168_vm0, %v4171_v6, 0.0 }
 0xc25   :  { %4176 = vadd.xlane.f32.xlu0 %v4175_v4 }
 0xc4f   :  { %v7735_v5 = vpop.f32.mrf.mxu0 }
 0xc50   :  { %v4174_v11 = vadd.f32 %v8175_v37, %v7735_v5 }
 0xc51   :  { %v4162_v30 = vpop.f32.mrf.mxu0 }
 0xc52   :  { %v4173_v33 = vadd.f32 %v8174_v35, %v4162_v30  ;;  %v4184_v45 = vsel %vm168_vm0, %v4174_v11, 0.0 }
 0xc54   :  { %v4181_v41 = vsel %vm168_vm0, %v4173_v33, 0.0 }
 0xc55   :  { %4182 = vadd.xlane.f32.xlu0 %v4181_v41 }
 0xc59   :  { %4185 = vadd.xlane.f32.xlu0 %v4184_v45 }
 0xcac   :  { %v4180_v24 = vpop.xlane.xlu1 %4179 }
 0xcad   :  { %v4188_v12 = vmul.f32 0.03125, %v4180_v24 }
 0xcae   :  { %v4177_v13 = vpop.xlane.xlu0 %4176 }
 0xcaf   :  { %v8992_v42 = vsub.f32 %v4172_v16, %v4188_v12  ;;  %v4187_v43 = vmul.f32 0.03125, %v4177_v13  ;;  %v6955_v16 = vunpack.c.h.bf16 %v7071_v15 }
 0xcb1   :  { %v8994_v46 = vsub.f32 %v4171_v6, %v4187_v43  ;;  %v4196_v17 = vmul.f32 %v8992_v42, %v8992_v42  ;;  %7766 = vmatprep.subr.mxu0 %v6955_v16  ;;  %v6951_v6 = vunpack.c.h.bf16 %v7070_v18  ;;  %v6743_v18 = vld [vmem:[#allocation7 + $0x1] ss:$0 sm:$0xff] }
 0xcb2   :  { %7767 = vmatpush3.msra.mxu0 %v6955_v16 }
 0xcb3   :  { %v4202_v48 = vsel %vm168_vm0, %v4196_v17, 0.0  ;;  %v4195_v50 = vmul.f32 %v8994_v46, %v8994_v46  ;;  %7768 = vmatprep.subr.mxu0 %v6954_v22 }
 0xcb4   :  { %4203 = vadd.xlane.f32.xlu0 %v4202_v48  ;;  %7769 = vmatpush3.msra.mxu0 %v6954_v22 }
 0xcb5   :  { %v4199_v51 = vsel %vm168_vm0, %v4195_v50, 0.0  ;;  %7770 = vmatprep.subr.mxu0 %v6951_v6 }
 0xcb6   :  { %4200 = vadd.xlane.f32.xlu1 %v4199_v51  ;;  %7771 = vmatpush3.msra.mxu0 %v6951_v6 }
 0xcb7   :  { %7772 = vmatprep.subr.mxu0 %v6950_v63 }
 0xcb8   :  { %7773 = vmatpush3.msra.mxu0 %v6950_v63 }
 0xcde   :  { %v4183_v57 = vpop.xlane.xlu0 %4182 }
 0xcdf   :  { %v4189_v19 = vmul.f32 0.03125, %v4183_v57 }
 0xce1   :  { %v9009_v40 = vsub.f32 %v4173_v33, %v4189_v19 }
 0xce2   :  { %v4186_v53 = vpop.xlane.xlu0 %4185 }
 0xce3   :  { %v4190_v49 = vmul.f32 0.03125, %v4186_v53  ;;  %v4197_v54 = vmul.f32 %v9009_v40, %v9009_v40 }
 0xce5   :  { %v9017_v58 = vsub.f32 %v4174_v11, %v4190_v49  ;;  %v4205_v14 = vsel %vm168_vm0, %v4197_v54, 0.0  ;;  %v9048_v11 = vld [vmem:[#allocation4 + $0x4] sm:$0xf]  ;;  %v7069_v54 = vld [vmem:[%s9461_s7 + $0x48] sm:$0xff]  }
 0xce6   :  { %4206 = vadd.xlane.f32.xlu1 %v4205_v14  ;;  %v4230_v45 = vrot.slane %v9048_v11, %v8581_v32  ;;  %v4238_v43 = vrot.slane %v9048_v11, %v8584_v34  ;;  %v6946_v56 = vunpack.c.l.bf16 %v7069_v54 }
 0xce7   :  { %v4198_v60 = vmul.f32 %v9017_v58, %v9017_v58 }
 0xce9   :  { %v4208_v29 = vsel %vm168_vm0, %v4198_v60, 0.0 }
 0xcea   :  { %4209 = vadd.xlane.f32.xlu0 %v4208_v29  ;;  %2044 = vadd.xlane.f32.xlu1 %v2043_v3  ;;  %v6738_v29 = vld [vmem:[#allocation6 + $0x1] ss:$0 sm:$0xff] }
 0xcee   :  { %2047 = vadd.xlane.f32.xlu0 %v2046_v44 }
 0xd3d   :  { %v4204_v4 = vpop.xlane.xlu0 %4203 }
 0xd3e   :  { %v4212_v5 = vmul.f32 0.03125, %v4204_v4 }
 0xd3f   :  { %v4201_v30 = vpop.xlane.xlu1 %4200 }
 0xd40   :  { %v4216_v35 = vadd.f32 1e-05, %v4212_v5  ;;  %v4211_v33 = vmul.f32 0.03125, %v4201_v30 }
 0xd42   :  { %8112 = vrsqrt.f32 %v4216_v35  ;;  %v4215_v37 = vadd.f32 1e-05, %v4211_v33 }
 0xd44   :  { %8114 = vrsqrt.f32 %v4215_v37 }
 0xd4f   :  { %v8113_v41 = vpop.eup %8112 }
 0xd50   :  { %v4224_v24 = vmul.f32 %v8113_v41, %v8992_v42 }
 0xd51   :  { %v8115_v12 = vpop.eup %8114 }
 0xd52   :  { %v4223_v13 = vmul.f32 %v8115_v12, %v8994_v46  ;;  %v4232_v17 = vmul.f32 %v4230_v45, %v4224_v24 }
 0xd54   :  { %v4231_v48 = vmul.f32 %v4230_v45, %v4223_v13  ;;  %v9058_v51 = vadd.f32 %v4238_v43, %v4232_v17 }
 0xd56   :  { %v9056_v50 = vadd.f32 %v4238_v43, %v4231_v48 }
 0xd58   :  { %7744 = vmatprep.mubr.msk.f32.mxu1 %vm168_vm0, %v9056_v50 }
 0xd59   :  { %7745 = vmatmul.mubr.msk.f32.vlgmr.msra.gmra.mxu1 %vm168_vm0, %v9058_v51 }
 0xd6f   :  { %v4207_v36 = vpop.xlane.xlu1 %4206 }
 0xd70   :  { %v4213_v42 = vmul.f32 0.03125, %v4207_v36 }
 0xd72   :  { %v4217_v9 = vadd.f32 1e-05, %v4213_v42 }
 0xd73   :  { %v4210_v25 = vpop.xlane.xlu0 %4209  ;;  %v2045_v41 = vpop.xlane.xlu1 %2044 }
 0xd74   :  { %8116 = vrsqrt.f32 %v4217_v9  ;;  %v4214_v46 = vmul.f32 0.03125, %v4210_v25  ;;  %v2049_v24 = vmul.f32 0.03125, %v2045_v41 }
 0xd76   :  { %v4218_v27 = vadd.f32 1e-05, %v4214_v46  ;;  %v9091_v48 = vsub.f32 %v9015_v26, %v2049_v24 }
 0xd77   :  { %v2048_v37 = vpop.xlane.xlu0 %2047 }
 0xd78   :  { %8118 = vrsqrt.f32 %v4218_v27  ;;  %v7077_v27 = vld [vmem:[%s9456_s2 + $0x68] sm:$0xff]  }
 0xd81   :  { %v8117_v28 = vpop.eup %8116 }
 0xd82   :  { %v4225_v59 = vmul.f32 %v8117_v28, %v9009_v40  ;;  %v6947_v40 = vunpack.c.h.bf16 %v7069_v54  ;;  %v7076_v28 = vld [vmem:[%s9456_s2 + $0x60] sm:$0xff]  }
 0xd84   :  { %v4233_v57 = vmul.f32 %v4230_v45, %v4225_v59  ;;  %7774 = vmatprep.subr.mxu0 %v6947_v40  ;;  %v6979_v59 = vunpack.c.h.bf16 %v7077_v27 }
 0xd85   :  { %v8119_v19 = vpop.eup %8118  ;;  %7775 = vmatpush3.msra.mxu0 %v6947_v40 }
 0xd86   :  { %v9065_v38 = vadd.f32 %v4238_v43, %v4233_v57  ;;  %v4226_v21 = vmul.f32 %v8119_v19, %v9017_v58  ;;  %v7068_v58 = vld [vmem:[%s9461_s7 + $0x40] sm:$0xff]   ;;  %7776 = vmatprep.subr.mxu0 %v6946_v56  ;;  %v6978_v57 = vunpack.c.l.bf16 %v7077_v27  ;;  %7788 = vmatprep.subr.mxu1 %v6979_v59  ;;  %v6975_v19 = vunpack.c.h.bf16 %v7076_v28 }
 0xd87   :  { %v6943_v14 = vunpack.c.h.bf16 %v7068_v58  ;;  %7777 = vmatpush3.msra.mxu0 %v6946_v56  ;;  %v6942_v60 = vunpack.c.l.bf16 %v7068_v58  ;;  %7789 = vmatpush3.msra.mxu1 %v6979_v59 }
 0xd88   :  { %7747 = vmatprep.mubr.msk.f32.mxu1 %vm168_vm0, %v9065_v38  ;;  %v4234_v53 = vmul.f32 %v4230_v45, %v4226_v21  ;;  %v2050_v45 = vmul.f32 0.03125, %v2048_v37  ;;  %7790 = vmatprep.subr.mxu1 %v6978_v57 }
 0xd89   :  { %7778 = vmatprep.subr.mxu0 %v6943_v14  ;;  %7791 = vmatpush3.msra.mxu1 %v6978_v57 }
 0xd8a   :  { %v9070_v49 = vadd.f32 %v4238_v43, %v4234_v53  ;;  %7779 = vmatpush3.msra.mxu0 %v6943_v14  ;;  %v9088_v13 = vsub.f32 %v9023_v8, %v2050_v45  ;;  %v2053_v8 = vmul.f32 %v9091_v48, %v9091_v48  ;;  %7792 = vmatprep.subr.mxu1 %v6975_v19 }
 0xd8b   :  { %7780 = vmatprep.subr.mxu0 %v6942_v60  ;;  %7793 = vmatpush3.msra.mxu1 %v6975_v19 }
 0xd8c   :  { %7748 = vmatmul.mubr.msk.f32.gmra.mxu1 %vm168_vm0, %v9070_v49  ;;  %7781 = vmatpush3.msra.mxu0 %v6942_v60  ;;  %v2054_v9 = vmul.f32 %v9088_v13, %v9088_v13  ;;  %v2055_v46 = vsel %vm168_vm0, %v2053_v8, 0.0 }
 0xd8d   :  { %7834 = vmatprep.subr.mxu0 %v8273_v20 }
 0xd8e   :  { %v2058_v26 = vsel %vm168_vm0, %v2054_v9, 0.0 }
 0xe19   :  { %v7746_v3 = vpop.f32.mrf.mxu1 }
 0xe1a   :  { %v4333_v44 = vadd.f32 %v7746_v3, %v6738_v29  ;;  %v7079_v3 = vld [vmem:[%s9456_s2 + $0x78] sm:$0xff]  }
 0xe1b   :  { %v4327_v2 = vpop.f32.mrf.mxu1 }
 0xe1c   :  { %v4328_v47 = vadd.f32 %v6738_v29, %v4327_v2  ;;  %v4351_v62 = vmul.f32 0.01, %v4333_v44  ;;  %vm4347_vm7 = vcmp.gt.f32.partialorder %v4333_v44, 0.0 }
 0xe1e   :  { %v4350_v39 = vmul.f32 0.01, %v4328_v47  ;;  %vm4346_vm8 = vcmp.gt.f32.partialorder %v4328_v47, 0.0  ;;  %v4355_v1 = vsel %vm4347_vm7, %v4333_v44, %v4351_v62  ;;  %v6987_v44 = vunpack.c.h.bf16 %v7079_v3 }
 0xe20   :  { %v4354_v0 = vsel %vm4346_vm8, %v4328_v47, %v4350_v39 }
 0xe21   :  { %7782 = vmatprep.mubr.f32.mxu0 %v4354_v0 }
 0xe22   :  { %7783 = vmatmul.mubr.f32.vlgmr.msra.gmra.mxu0 %v4355_v1 }
 0xe4c   :  { %v7749_v52 = vpop.f32.mrf.mxu1 }
 0xe4d   :  { %v4343_v55 = vadd.f32 %v7749_v52, %v6738_v29 }
 0xe4e   :  { %v4337_v7 = vpop.f32.mrf.mxu1 }
 0xe4f   :  { %v4338_v10 = vadd.f32 %v6738_v29, %v4337_v7  ;;  %v4353_v61 = vmul.f32 0.01, %v4343_v55  ;;  %vm4349_vm10 = vcmp.gt.f32.partialorder %v4343_v55, 0.0 }
 0xe51   :  { %v4352_v15 = vmul.f32 0.01, %v4338_v10  ;;  %vm4348_vm9 = vcmp.gt.f32.partialorder %v4338_v10, 0.0  ;;  %v4357_v16 = vsel %vm4349_vm10, %v4343_v55, %v4353_v61 }
 0xe53   :  { %v4356_v23 = vsel %vm4348_vm9, %v4338_v10, %v4352_v15 }
 0xe54   :  { %7785 = vmatprep.mubr.f32.mxu0 %v4356_v23 }
 0xe55   :  { %7786 = vmatmul.mubr.f32.gmra.mxu0 %v4357_v16 }
 0xe56   :  { %7838 = vmatprep.mubr.msk.f32.mxu0 %vm8274_vm1, %v8273_v20 }
 0xee2   :  { %v7784_v22 = vpop.f32.mrf.mxu0 }
 0xee3   :  { %v4436_v6 = vadd.f32 %v7784_v22, %v6743_v18 }
 0xee4   :  { %v4430_v63 = vpop.f32.mrf.mxu0 }
 0xee5   :  { %v4450_v4 = vadd.f32 %v4436_v6, %v9058_v51  ;;  %v4431_v5 = vadd.f32 %v6743_v18, %v4430_v63  ;;  %v9133_v6 = vsub.s32 2, %v8578_v31 }
 0xee7   :  { %v4449_v30 = vadd.f32 %v4431_v5, %v9056_v50  ;;  %v4456_v35 = vsel %vm168_vm0, %v4450_v4, 0.0  ;;  %v4508_v27 = vrot.slane %v9048_v11, %v9133_v6 }
 0xee8   :  { %4457 = vadd.xlane.f32.xlu0 %v4456_v35 }
 0xee9   :  { %v4453_v33 = vsel %vm168_vm0, %v4449_v30, 0.0 }
 0xeea   :  { %4454 = vadd.xlane.f32.xlu1 %v4453_v33 }
 0xf15   :  { %v7787_v12 = vpop.f32.mrf.mxu0 }
 0xf16   :  { %v4446_v43 = vadd.f32 %v7787_v12, %v6743_v18 }
 0xf17   :  { %v4440_v17 = vpop.f32.mrf.mxu0 }
 0xf18   :  { %v4452_v50 = vadd.f32 %v4446_v43, %v9070_v49  ;;  %v4441_v51 = vadd.f32 %v6743_v18, %v4440_v17  ;;  %v7078_v43 = vld [vmem:[%s9456_s2 + $0x70] sm:$0xff]  }
 0xf1a   :  { %v4451_v36 = vadd.f32 %v4441_v51, %v9065_v38  ;;  %v4462_v42 = vsel %vm168_vm0, %v4452_v50, 0.0  ;;  %v6974_v38 = vunpack.c.l.bf16 %v7076_v28 }
 0xf1b   :  { %4463 = vadd.xlane.f32.xlu0 %v4462_v42 }
 0xf1c   :  { %v4459_v25 = vsel %vm168_vm0, %v4451_v36, 0.0  ;;  %7794 = vmatprep.subr.mxu1 %v6974_v38 }
 0xf1d   :  { %4460 = vadd.xlane.f32.xlu1 %v4459_v25  ;;  %7795 = vmatpush3.msra.mxu1 %v6974_v38 }
 0xf1e   :  { %7799 = vmatprep.subr.mxu1 %v6987_v44 }
 0xf1f   :  { %2059 = vadd.xlane.f32.xlu0 %v2058_v26 }
 0xf21   :  { %2056 = vadd.xlane.f32.xlu1 %v2055_v46 }
 0xf71   :  { %v4458_v21 = vpop.xlane.xlu0 %4457 }
 0xf72   :  { %v4466_v53 = vmul.f32 0.03125, %v4458_v21 }
 0xf73   :  { %v4455_v49 = vpop.xlane.xlu1 %4454 }
 0xf74   :  { %v9109_v54 = vsub.f32 %v4450_v4, %v4466_v53  ;;  %v4465_v40 = vmul.f32 0.03125, %v4455_v49  ;;  %v8176_v4 = vld [vmem:[#allocation4] sm:$0xf] }
 0xf75   :  { %v2072_v5 = vrot.slane %v8176_v4, %v9133_v6  ;;  %v7080_v49 = vld [vmem:[%s9456_s2 + $0x80] sm:$0xff]  }
 0xf76   :  { %v9111_v56 = vsub.f32 %v4449_v30, %v4465_v40  ;;  %v4474_v58 = vmul.f32 %v9109_v54, %v9109_v54  ;;  %v9137_v30 = vsub.s32 3, %v8578_v31  ;;  %v6983_v31 = vunpack.c.h.bf16 %v7078_v43 }
 0xf78   :  { %v4480_v14 = vsel %vm168_vm0, %v4474_v58, 0.0  ;;  %v4473_v60 = vmul.f32 %v9111_v56, %v9111_v56  ;;  %v2078_v45 = vrot.slane %v8176_v4, %v9137_v30  ;;  %v4516_v19 = vrot.slane %v9048_v11, %v9137_v30 }
 0xf79   :  { %4481 = vadd.xlane.f32.xlu0 %v4480_v14 }
 0xf7a   :  { %v4477_v29 = vsel %vm168_vm0, %v4473_v60, 0.0 }
 0xf7b   :  { %4478 = vadd.xlane.f32.xlu1 %v4477_v29 }
 0xfa4   :  { %v4464_v2 = vpop.xlane.xlu0 %4463 }
 0xfa5   :  { %v4468_v47 = vmul.f32 0.03125, %v4464_v2 }
 0xfa6   :  { %v4461_v62 = vpop.xlane.xlu1 %4460 }
 0xfa7   :  { %v9122_v39 = vsub.f32 %v4452_v50, %v4468_v47  ;;  %v4467_v0 = vmul.f32 0.03125, %v4461_v62  ;;  %v6986_v50 = vunpack.c.l.bf16 %v7079_v3 }
 0xfa8   :  { %v2060_v1 = vpop.xlane.xlu0 %2059 }
 0xfa9   :  { %v9124_v52 = vsub.f32 %v4451_v36, %v4467_v0  ;;  %v2062_v55 = vmul.f32 0.03125, %v2060_v1  ;;  %v4476_v7 = vmul.f32 %v9122_v39, %v9122_v39 }
 0xfaa   :  { %v2057_v10 = vpop.xlane.xlu1 %2056 }
 0xfab   :  { %v2064_v61 = vadd.f32 1e-05, %v2062_v55  ;;  %v2061_v15 = vmul.f32 0.03125, %v2057_v10  ;;  %v4486_v23 = vsel %vm168_vm0, %v4476_v7, 0.0  ;;  %v4475_v16 = vmul.f32 %v9124_v52, %v9124_v52 }
 0xfac   :  { %4487 = vadd.xlane.f32.xlu0 %v4486_v23 }
 0xfad   :  { %8120 = vrsqrt.f32 %v2064_v61  ;;  %v2063_v18 = vadd.f32 1e-05, %v2061_v15  ;;  %v4483_v22 = vsel %vm168_vm0, %v4475_v16, 0.0 }
 0xfae   :  { %4484 = vadd.xlane.f32.xlu1 %v4483_v22 }
 0xfaf   :  { %8122 = vrsqrt.f32 %v2063_v18 }
 0xfba   :  { %v8121_v63 = vpop.eup %8120 }
 0xfbb   :  { %v2068_v35 = vmul.f32 %v8121_v63, %v9088_v13  ;;  %v7081_v13 = vld [vmem:[%s9456_s2 + $0x88] sm:$0xff]  }
 0xfbc   :  { %v8123_v33 = vpop.eup %8122  ;;  %v6995_v51 = vunpack.c.h.bf16 %v7081_v13  ;;  %v6994_v58 = vunpack.c.l.bf16 %v7081_v13 }
 0xfbd   :  { %v2067_v37 = vmul.f32 %v8123_v33, %v9091_v48  ;;  %v2074_v41 = vmul.f32 %v2072_v5, %v2068_v35  ;;  %v6982_v48 = vunpack.c.l.bf16 %v7078_v43 }
 0xfbf   :  { %v2073_v24 = vmul.f32 %v2072_v5, %v2067_v37  ;;  %v9147_v17 = vadd.f32 %v2078_v45, %v2074_v41 }
 0xfc1   :  { %v9142_v12 = vadd.f32 %v2078_v45, %v2073_v24 }
 0xfc3   :  { %7796 = vmatprep.mubr.msk.f32.mxu1 %vm168_vm0, %v9142_v12 }
 0xfc4   :  { %7797 = vmatmul.mubr.msk.f32.vlgmr.msra.gmra.mxu1 %vm168_vm0, %v9147_v17 }
 0xfc5   :  { %7800 = vmatpush3.msra.mxu1 %v6987_v44 }
 0xfc6   :  { %7801 = vmatprep.subr.mxu1 %v6986_v50 }
 0xfc7   :  { %7802 = vmatpush3.msra.mxu1 %v6986_v50 }
 0xfc8   :  { %7803 = vmatprep.subr.mxu1 %v6983_v31 }
 0xfc9   :  { %7804 = vmatpush3.msra.mxu1 %v6983_v31 }
 0xfca   :  { %7805 = vmatprep.subr.mxu1 %v6982_v48 }
 0xfcb   :  { %7806 = vmatpush3.msra.mxu1 %v6982_v48 }
 0xfcc   :  { %7813 = vmatprep.subr.mxu1 %v6995_v51 }
0x1002   :  { %v4482_v36 = vpop.xlane.xlu0 %4481 }
0x1003   :  { %v4490_v42 = vmul.f32 0.03125, %v4482_v36 }
0x1004   :  { %v4479_v9 = vpop.xlane.xlu1 %4478 }
0x1005   :  { %v4494_v25 = vadd.f32 1e-05, %v4490_v42  ;;  %v4489_v8 = vmul.f32 0.03125, %v4479_v9 }
0x1007   :  { %8124 = vrsqrt.f32 %v4494_v25  ;;  %v4493_v26 = vadd.f32 1e-05, %v4489_v8 }
0x1009   :  { %8126 = vrsqrt.f32 %v4493_v26 }
0x1014   :  { %v8125_v46 = vpop.eup %8124 }
0x1015   :  { %v4502_v28 = vmul.f32 %v8125_v46, %v9109_v54  ;;  %v6991_v54 = vunpack.c.h.bf16 %v7080_v49 }
0x1016   :  { %v8127_v59 = vpop.eup %8126 }
0x1017   :  { %v4501_v57 = vmul.f32 %v8127_v59, %v9111_v56  ;;  %v4510_v38 = vmul.f32 %v4508_v27, %v4502_v28  ;;  %v6990_v56 = vunpack.c.l.bf16 %v7080_v49 }
0x1019   :  { %v4509_v21 = vmul.f32 %v4508_v27, %v4501_v57  ;;  %v4518_v40 = vadd.f32 %v4516_v19, %v4510_v38 }
0x101b   :  { %v4517_v53 = vadd.f32 %v4516_v19, %v4509_v21 }
0x101d   :  { %7807 = vmatprep.mubr.msk.f32.mxu1 %vm168_vm0, %v4517_v53 }
0x101e   :  { %7808 = vmatmul.mubr.msk.f32.vlgmr.msra.gmra.mxu1 %vm168_vm0, %v4518_v40 }
0x101f   :  { %7814 = vmatpush3.msra.mxu1 %v6995_v51 }
0x1020   :  { %7815 = vmatprep.subr.mxu1 %v6994_v58 }
0x1021   :  { %7816 = vmatpush3.msra.mxu1 %v6994_v58 }
0x1022   :  { %7817 = vmatprep.subr.mxu1 %v6991_v54 }
0x1023   :  { %7818 = vmatpush3.msra.mxu1 %v6991_v54 }
0x1024   :  { %7819 = vmatprep.subr.mxu1 %v6990_v56 }
0x1025   :  { %7820 = vmatpush3.msra.mxu1 %v6990_v56 }
0x1026   :  { %7827 = vmatprep.subr.mxu1 %v8273_v20 }
0x1035   :  { %v4488_v11 = vpop.xlane.xlu0 %4487 }
0x1036   :  { %v4492_v14 = vmul.f32 0.03125, %v4488_v11 }
0x1037   :  { %v4485_v60 = vpop.xlane.xlu1 %4484 }
0x1038   :  { %v4496_v29 = vadd.f32 1e-05, %v4492_v14  ;;  %v4491_v3 = vmul.f32 0.03125, %v4485_v60 }
0x103a   :  { %8128 = vrsqrt.f32 %v4496_v29  ;;  %v4495_v44 = vadd.f32 1e-05, %v4491_v3 }
0x103c   :  { %8130 = vrsqrt.f32 %v4495_v44 }
0x1047   :  { %v8129_v2 = vpop.eup %8128 }
0x1048   :  { %v4504_v47 = vmul.f32 %v8129_v2, %v9122_v39 }
0x1049   :  { %v8131_v62 = vpop.eup %8130 }
0x104a   :  { %v4503_v0 = vmul.f32 %v8131_v62, %v9124_v52  ;;  %v4512_v1 = vmul.f32 %v4508_v27, %v4504_v47 }
0x104c   :  { %v4511_v55 = vmul.f32 %v4508_v27, %v4503_v0  ;;  %v4520_v10 = vadd.f32 %v4516_v19, %v4512_v1 }
0x104e   :  { %v4519_v7 = vadd.f32 %v4516_v19, %v4511_v55 }
0x1050   :  { %7810 = vmatprep.mubr.msk.f32.mxu1 %vm168_vm0, %v4519_v7 }
0x1051   :  { %7811 = vmatmul.mubr.msk.f32.gmra.mxu1 %vm168_vm0, %v4520_v10 }
0x1052   :  { %7821 = vmatprep.mubr.msk.f32.mxu1 %vm168_vm0, %v4517_v53 }
0x1055   :  { %7822 = vmatmul.mubr.msk.f32.vlgmr.msra.gmra.mxu1 %vm168_vm0, %v4518_v40 }
0x1056   :  { %7824 = vmatprep.mubr.msk.f32.mxu1 %vm168_vm0, %v4519_v7 }
0x1059   :  { %7825 = vmatmul.mubr.msk.f32.gmra.mxu1 %vm168_vm0, %v4520_v10 }
0x105a   :  { %7831 = vmatprep.mubr.msk.f32.mxu1 %vm8274_vm1, %v8273_v20 }
0x1084   :  { %v7798_v39 = vpop.f32.mrf.mxu1 }
0x1086   :  { %v4675_v52 = vpop.f32.mrf.mxu1 }
0x1087   :  { %4868 = vrot.lane.b32.xlu0 %v4675_v52, %s8275_s28 }
0x10de   :  { %v7809_v61 = vpop.f32.mrf.mxu1 }
0x10df   :  { %4886 = vrot.lane.b32.xlu1 %v7809_v61, %s8275_s28  ;;  %7828 = vmatpush3.xpose.msk.msra.mxu1 %vm448_vm2, %v7809_v61 }
0x10e0   :  { %7829 = vmatprep.subr.mxu1 %v8273_v20  ;;  %v4762_v15 = vpop.f32.mrf.mxu1 }
0x10e3   :  { %4894 = vrot.lane.b32.xlu1 %v7809_v61, %s8276_s29  ;;  %7830 = vmatpush3.xpose.msk.msra.mxu1 %vm448_vm2, %v4762_v15 }
0x10e4   :  { %7841 = vmatprep.subr.mxu1 %v8273_v20 }
0x10e6   :  { %7832 = vmatmul.mubr.msk.f32.vlgmr.msra.gmra.mxu1 %vm448_vm2, %v4675_v52 }
0x10e7   :  { %4884 = vrot.lane.b32.xlu1 %v4762_v15, %s8275_s28  ;;  %7845 = vmatprep.mubr.msk.f32.mxu1 %vm8274_vm1, %v8273_v20 }
0x10f9   :  { %v4869_v4 = vpop.permute.xlu0 %4868 }
0x1111   :  { %v7812_v23 = vpop.f32.mrf.mxu1 }
0x1112   :  { %4898 = vrot.lane.b32.xlu1 %v7812_v23, %s8276_s29  ;;  %4890 = vrot.lane.b32.xlu0 %v7812_v23, %s8275_s28 }
0x1113   :  { %7835 = vmatpush3.xpose.msk.msra.mxu0 %vm448_vm2, %v7812_v23  ;;  %v4772_v16 = vpop.f32.mrf.mxu1 }
0x1114   :  { %7836 = vmatprep.subr.mxu0 %v8273_v20 }
0x1115   :  { %v7823_v13 = vpop.f32.mrf.mxu1 }
0x1116   :  { %4870 = vrot.lane.b32.xlu0 %v7798_v39, %s8275_s28  ;;  %4888 = vrot.lane.b32.xlu1 %v4772_v16, %s8275_s28 }
0x1117   :  { %7837 = vmatpush3.xpose.msk.msra.mxu0 %vm448_vm2, %v4772_v16  ;;  %v9246_v36 = vpop.f32.mrf.mxu1 }
0x1118   :  { %7848 = vmatprep.subr.mxu0 %v8273_v20 }
0x1119   :  { %v9253_v25 = vpop.f32.mrf.mxu1 }
0x111a   :  { %7839 = vmatmul.mubr.msk.f32.vlgmr.msra.gmra.mxu0 %vm448_vm2, %v7798_v39  ;;  %4892 = vrot.lane.b32.xlu0 %v4762_v15, %s8276_s29 }
0x111b   :  { %4902 = vrot.lane.b32.xlu1 %v7809_v61, %s8277_s1  ;;  %7852 = vmatprep.mubr.msk.f32.mxu0 %vm8274_vm1, %v8273_v20  ;;  %v9259_v8 = vpop.f32.mrf.mxu1 }
0x111e   :  { %4872 = vrot.lane.b32.xlu0 %v4675_v52, %s8276_s29 }
0x111f   :  { %4896 = vrot.lane.b32.xlu1 %v4772_v16, %s8276_s29 }
0x1122   :  { %4874 = vrot.lane.b32.xlu0 %v7798_v39, %s8276_s29 }
0x1123   :  { %4906 = vrot.lane.b32.xlu1 %v7812_v23, %s8277_s1 }
0x1126   :  { %4900 = vrot.lane.b32.xlu0 %v4762_v15, %s8277_s1 }
0x1127   :  { %4904 = vrot.lane.b32.xlu1 %v4772_v16, %s8277_s1 }
0x112a   :  { %4876 = vrot.lane.b32.xlu0 %v4675_v52, %s8277_s1 }
0x112b   :  { %4878 = vrot.lane.b32.xlu1 %v7798_v39, %s8277_s1 }
0x1151   :  { %v4887_v18 = vpop.permute.xlu1 %4886 }
0x1152   :  { %7842 = vmatpush3.xpose.msk.msra.mxu1 %vm448_vm2, %v4887_v18 }
0x1153   :  { %7843 = vmatprep.subr.mxu1 %v8273_v20 }
0x1155   :  { %v4895_v22 = vpop.permute.xlu1 %4894 }
0x1159   :  { %v4885_v63 = vpop.permute.xlu1 %4884 }
0x115a   :  { %7844 = vmatpush3.xpose.msk.msra.mxu1 %vm448_vm2, %v4885_v63 }
0x115b   :  { %7855 = vmatprep.subr.mxu1 %v8273_v20 }
0x115d   :  { %7846 = vmatmul.mubr.msk.f32.vlgmr.msra.gmra.mxu1 %vm448_vm2, %v4869_v4 }
0x115e   :  { %7856 = vmatpush3.xpose.msk.msra.mxu1 %vm448_vm2, %v4895_v22  ;;  %7859 = vmatprep.mubr.msk.f32.mxu1 %vm8274_vm1, %v8273_v20 }
0x115f   :  { %7857 = vmatprep.subr.mxu1 %v8273_v20 }
0x1184   :  { %v4891_v5 = vpop.permute.xlu0 %4890  ;;  %v4899_v35 = vpop.permute.xlu1 %4898 }
0x1185   :  { %7849 = vmatpush3.xpose.msk.msra.mxu0 %vm448_vm2, %v4891_v5 }
0x1186   :  { %7850 = vmatprep.subr.mxu0 %v8273_v20 }
0x1188   :  { %v4871_v33 = vpop.permute.xlu0 %4870  ;;  %v4889_v37 = vpop.permute.xlu1 %4888 }
0x1189   :  { %7851 = vmatpush3.xpose.msk.msra.mxu0 %vm448_vm2, %v4889_v37 }
0x118a   :  { %7862 = vmatprep.subr.mxu0 %v8273_v20 }
0x118c   :  { %v4893_v41 = vpop.permute.xlu0 %4892  ;;  %7853 = vmatmul.mubr.msk.f32.vlgmr.msra.gmra.mxu0 %vm448_vm2, %v4871_v33 }
0x118d   :  { %v4903_v45 = vpop.permute.xlu1 %4902  ;;  %7858 = vmatpush3.xpose.msk.msra.mxu1 %vm448_vm2, %v4893_v41  ;;  %7863 = vmatpush3.xpose.msk.msra.mxu0 %vm448_vm2, %v4899_v35 }
0x118e   :  { %7864 = vmatprep.subr.mxu0 %v8273_v20  ;;  %7869 = vmatprep.subr.mxu1 %v8273_v20 }
0x118f   :  { %7866 = vmatprep.mubr.msk.f32.mxu0 %vm8274_vm1, %v8273_v20 }
0x1190   :  { %v4873_v24 = vpop.permute.xlu0 %4872 }
0x1191   :  { %v4897_v43 = vpop.permute.xlu1 %4896  ;;  %7860 = vmatmul.mubr.msk.f32.vlgmr.msra.gmra.mxu1 %vm448_vm2, %v4873_v24 }
0x1192   :  { %7865 = vmatpush3.xpose.msk.msra.mxu0 %vm448_vm2, %v4897_v43  ;;  %7870 = vmatpush3.xpose.msk.msra.mxu1 %vm448_vm2, %v4903_v45 }
0x1193   :  { %7876 = vmatprep.subr.mxu0 %v8273_v20  ;;  %7871 = vmatprep.subr.mxu1 %v8273_v20 }
0x1194   :  { %v4875_v50 = vpop.permute.xlu0 %4874  ;;  %7873 = vmatprep.mubr.msk.f32.mxu1 %vm8274_vm1, %v8273_v20 }
0x1195   :  { %v4907_v31 = vpop.permute.xlu1 %4906  ;;  %7867 = vmatmul.mubr.msk.f32.vlgmr.msra.gmra.mxu0 %vm448_vm2, %v4875_v50 }
0x1196   :  { %7877 = vmatpush3.xpose.msk.msra.mxu0 %vm448_vm2, %v4907_v31  ;;  %7880 = vmatprep.mubr.msk.f32.mxu0 %vm8274_vm1, %v8273_v20 }
0x1197   :  { %7878 = vmatprep.subr.mxu0 %v8273_v20 }
0x1198   :  { %v4901_v48 = vpop.permute.xlu0 %4900 }
0x1199   :  { %v4905_v51 = vpop.permute.xlu1 %4904  ;;  %7872 = vmatpush3.xpose.msk.msra.mxu1 %vm448_vm2, %v4901_v48 }
0x119a   :  { %7879 = vmatpush3.xpose.msk.msra.mxu0 %vm448_vm2, %v4905_v51  ;;  %7883 = vmatprep.subr.mxu1 %v8273_v20 }
0x119b   :  { %7897 = vmatprep.subr.mxu0 %v8273_v20 }
0x119c   :  { %v4877_v42 = vpop.permute.xlu0 %4876 }
0x119d   :  { %v4879_v9 = vpop.permute.xlu1 %4878  ;;  %7874 = vmatmul.mubr.msk.f32.vlgmr.msra.gmra.mxu1 %vm448_vm2, %v4877_v42 }
0x119e   :  { %7881 = vmatmul.mubr.msk.f32.vlgmr.msra.gmra.mxu0 %vm448_vm2, %v4879_v9  ;;  %7884 = vmatpush3.msra.mxu1 %v7823_v13 }
0x119f   :  { %7885 = vmatprep.subr.mxu1 %v8273_v20  ;;  %7887 = vmatprep.mubr.msk.f32.mxu1 %vm8274_vm1, %v8273_v20 }
0x11a0   :  { %7886 = vmatpush3.msra.mxu1 %v9246_v36  ;;  %7901 = vmatprep.mubr.msk.f32.mxu0 %vm8274_vm1, %v8273_v20 }
0x11a1   :  { %7890 = vmatprep.subr.mxu1 %v8273_v20 }
0x11a6   :  { %v5020_v26 = vpop.f32.mrf.mxu1 }
0x11a7   :  { %v5556_v46 = vsel %vm1739_vm3, %v5020_v26, -inf }
0x11a8   :  { %5557 = vmax.xlane.f32.xlu0 %v5556_v46  ;;  %v7833_v27 = vpop.f32.mrf.mxu1 }
0x11da   :  { %v5096_v28 = vpop.f32.mrf.mxu0 }
0x11db   :  { %v5559_v59 = vsel %vm1739_vm3, %v5096_v28, -inf }
0x11dc   :  { %5560 = vmax.xlane.f32.xlu1 %v5559_v59  ;;  %v7840_v57 = vpop.f32.mrf.mxu0 }
0x121d   :  { %v5172_v19 = vpop.f32.mrf.mxu1 }
0x121e   :  { %v5562_v38 = vsel %vm1739_vm3, %v5172_v19, -inf }
0x121f   :  { %5563 = vmax.xlane.f32.xlu0 %v5562_v38  ;;  %v7847_v21 = vpop.f32.mrf.mxu1 }
0x1231   :  { %v5558_v55 = vpop.xlane.xlu0 %5557 }
0x1232   :  { %v5580_v10 = vsub.f32 %v5020_v26, %v5558_v55 }
0x1234   :  { %v5588_v39 = vmul.f32 1.442695, %v5580_v10 }
0x124c   :  { %v5248_v53 = vpop.f32.mrf.mxu0 }
0x124d   :  { %v5565_v49 = vsel %vm1739_vm3, %v5248_v53, -inf }
0x124e   :  { %5566 = vmax.xlane.f32.xlu0 %v5565_v49  ;;  %v7854_v40 = vpop.f32.mrf.mxu0 }
0x1251   :  { %v5324_v58 = vpop.f32.mrf.mxu1 }
0x1252   :  { %v5568_v54 = vsel %vm1739_vm3, %v5324_v58, -inf }
0x1253   :  { %5569 = vmax.xlane.f32.xlu1 %v5568_v54  ;;  %v7861_v56 = vpop.f32.mrf.mxu1 }
0x1255   :  { %v5400_v11 = vpop.f32.mrf.mxu0 }
0x1256   :  { %v5571_v14 = vsel %vm1739_vm3, %v5400_v11, -inf }
0x1257   :  { %5572 = vmax.xlane.f32.xlu0 %v5571_v14  ;;  %v7868_v60 = vpop.f32.mrf.mxu0 }
0x125d   :  { %v5476_v29 = vpop.f32.mrf.mxu1 }
0x125e   :  { %v5552_v3 = vpop.f32.mrf.mxu0  ;;  %v5574_v44 = vsel %vm1739_vm3, %v5476_v29, -inf }
0x125f   :  { %5575 = vmax.xlane.f32.xlu1 %v5574_v44  ;;  %v7875_v2 = vpop.f32.mrf.mxu1  ;;  %v5577_v47 = vsel %vm1739_vm3, %v5552_v3, -inf }
0x1260   :  { %5578 = vmax.xlane.f32.xlu0 %v5577_v47  ;;  %v7882_v62 = vpop.f32.mrf.mxu0 }
0x1265   :  { %v5561_v0 = vpop.xlane.xlu1 %5560 }
0x1266   :  { %v5581_v1 = vsub.f32 %v5096_v28, %v5561_v0 }
0x1268   :  { %v5590_v7 = vmul.f32 1.442695, %v5581_v1 }
0x126a   :  { %8132 = vpow2.f32 %v5590_v7 }
0x126b   :  { %8134 = vpow2.f32 %v5588_v39 }
0x1270   :  { %4914 = vrot.lane.b32.xlu1 %v7823_v13, %s8275_s28 }
0x1274   :  { %4912 = vrot.lane.b32.xlu1 %v9246_v36, %s8275_s28 }
0x1276   :  { %4918 = vrot.lane.b32.xlu0 %v9253_v25, %s8275_s28 }
0x1277   :  { %v9286_v52 = vpop.eup %8132 }
0x1278   :  { %4916 = vrot.lane.b32.xlu1 %v9259_v8, %s8275_s28  ;;  %v5607_v61 = vsel %vm1739_vm3, %v9286_v52, 0.0  ;;  %v9290_v15 = vpop.eup %8134 }
0x1279   :  { %v5604_v23 = vsel %vm1739_vm3, %v9290_v15, 0.0 }
0x127a   :  { %4926 = vrot.lane.b32.xlu0 %v7823_v13, %s8276_s29 }
0x127c   :  { %4930 = vrot.lane.b32.xlu1 %v9253_v25, %s8276_s29 }
0x127e   :  { %4924 = vrot.lane.b32.xlu0 %v9246_v36, %s8276_s29 }
0x1280   :  { %4928 = vrot.lane.b32.xlu1 %v9259_v8, %s8276_s29 }
0x1282   :  { %4938 = vrot.lane.b32.xlu0 %v7823_v13, %s8277_s1 }
0x1284   :  { %4942 = vrot.lane.b32.xlu1 %v9253_v25, %s8277_s1 }
0x12a1   :  { %5608 = vadd.xlane.f32.xlu0 %v5607_v61 }
0x12a8   :  { %v5564_v16 = vpop.xlane.xlu0 %5563  ;;  %5605 = vadd.xlane.f32.xlu1 %v5604_v23 }
0x12a9   :  { %v5582_v18 = vsub.f32 %v5172_v19, %v5564_v16 }
0x12ab   :  { %v5592_v22 = vmul.f32 1.442695, %v5582_v18 }
0x12ad   :  { %8136 = vpow2.f32 %v5592_v22 }
0x12ba   :  { %v9294_v63 = vpop.eup %8136 }
0x12bb   :  { %v5610_v4 = vsel %vm1739_vm3, %v9294_v63, 0.0 }
0x12bc   :  { %5611 = vadd.xlane.f32.xlu1 %v5610_v4 }
0x12d7   :  { %v5567_v5 = vpop.xlane.xlu0 %5566 }
0x12d8   :  { %v5583_v35 = vsub.f32 %v5248_v53, %v5567_v5 }
0x12da   :  { %v5594_v33 = vmul.f32 1.442695, %v5583_v35 }
0x12dc   :  { %8138 = vpow2.f32 %v5594_v33  ;;  %v5570_v37 = vpop.xlane.xlu1 %5569 }
0x12dd   :  { %v5584_v41 = vsub.f32 %v5324_v58, %v5570_v37 }
0x12df   :  { %v5596_v45 = vmul.f32 1.442695, %v5584_v41 }
0x12e0   :  { %v5573_v24 = vpop.xlane.xlu0 %5572 }
0x12e1   :  { %8140 = vpow2.f32 %v5596_v45  ;;  %v5585_v43 = vsub.f32 %v5400_v11, %v5573_v24 }
0x12e3   :  { %v5598_v50 = vmul.f32 1.442695, %v5585_v43 }
0x12e5   :  { %8142 = vpow2.f32 %v5598_v50 }
0x12e8   :  { %v5576_v31 = vpop.xlane.xlu1 %5575 }
0x12e9   :  { %v9298_v13 = vpop.eup %8138  ;;  %v5579_v48 = vpop.xlane.xlu0 %5578  ;;  %v5586_v51 = vsub.f32 %v5476_v29, %v5576_v31 }
0x12ea   :  { %v5587_v42 = vsub.f32 %v5552_v3, %v5579_v48  ;;  %v5613_v9 = vsel %vm1739_vm3, %v9298_v13, 0.0 }
0x12eb   :  { %v5600_v26 = vmul.f32 1.442695, %v5586_v51  ;;  %5614 = vadd.xlane.f32.xlu0 %v5613_v9 }
0x12ec   :  { %v5602_v46 = vmul.f32 1.442695, %v5587_v42  ;;  %v4915_v27 = vpop.permute.xlu1 %4914 }
0x12ed   :  { %8144 = vpow2.f32 %v5600_v26  ;;  %7898 = vmatpush3.msra.mxu0 %v4915_v27  ;;  %v4919_v58 = vpop.permute.xlu0 %4918 }
0x12ee   :  { %v9302_v28 = vpop.eup %8140  ;;  %8146 = vpow2.f32 %v5602_v46  ;;  %7899 = vmatprep.subr.mxu0 %v8273_v20 }
0x12ef   :  { %v5616_v59 = vsel %vm1739_vm3, %v9302_v28, 0.0 }
0x12f0   :  { %5617 = vadd.xlane.f32.xlu1 %v5616_v59  ;;  %v4913_v57 = vpop.permute.xlu1 %4912 }
0x12f1   :  { %7900 = vmatpush3.msra.mxu0 %v4913_v57  ;;  %v4927_v56 = vpop.permute.xlu0 %4926 }
0x12f2   :  { %v9307_v19 = vpop.eup %8142  ;;  %7911 = vmatprep.subr.mxu0 %v8273_v20 }
0x12f3   :  { %v5619_v38 = vsel %vm1739_vm3, %v9307_v19, 0.0 }
0x12f4   :  { %5620 = vadd.xlane.f32.xlu0 %v5619_v38  ;;  %v4917_v54 = vpop.permute.xlu1 %4916 }
0x12f5   :  { %v4925_v14 = vpop.permute.xlu0 %4924 }
0x12f8   :  { %v4931_v11 = vpop.permute.xlu1 %4930 }
0x12f9   :  { %v4939_v29 = vpop.permute.xlu0 %4938 }
0x12fa   :  { %v9312_v21 = vpop.eup %8144 }
0x12fb   :  { %v9314_v53 = vpop.eup %8146  ;;  %v5622_v49 = vsel %vm1739_vm3, %v9312_v21, 0.0 }
0x12fc   :  { %v5625_v40 = vsel %vm1739_vm3, %v9314_v53, 0.0  ;;  %5623 = vadd.xlane.f32.xlu1 %v5622_v49  ;;  %v4929_v60 = vpop.permute.xlu1 %4928 }
0x12fd   :  { %5626 = vadd.xlane.f32.xlu0 %v5625_v40 }
0x1300   :  { %v4943_v3 = vpop.permute.xlu1 %4942 }
0x130d   :  { %4940 = vrot.lane.b32.xlu1 %v9259_v8, %s8277_s1 }
0x1313   :  { %4936 = vrot.lane.b32.xlu0 %v9246_v36, %s8277_s1 }
0x132a   :  { %v5609_v44 = vpop.xlane.xlu0 %5608 }
0x1331   :  { %v5606_v2 = vpop.xlane.xlu1 %5605 }
0x1332   :  { %8148 = vrcp.f32 %v5606_v2 }
0x1333   :  { %8150 = vrcp.f32 %v5609_v44 }
0x133f   :  { %v8149_v47 = vpop.eup %8148 }
0x1340   :  { %v5636_v62 = vmul.f32 %v8149_v47, %v9290_v15  ;;  %v8151_v0 = vpop.eup %8150 }
0x1341   :  { %v5637_v36 = vmul.f32 %v8151_v0, %v9286_v52 }
0x1342   :  { %7888 = vmatmul.mubr.msk.f32.vlgmr.msra.gmra.mxu1 %vm1739_vm3, %v5636_v62 }
0x1343   :  { %7891 = vmatpush3.msra.mxu1 %v9253_v25  ;;  %7894 = vmatprep.mubr.msk.f32.mxu1 %vm8274_vm1, %v8273_v20 }
0x1344   :  { %7892 = vmatprep.subr.mxu1 %v8273_v20 }
0x1345   :  { %7893 = vmatpush3.msra.mxu1 %v9259_v8  ;;  %v5612_v1 = vpop.xlane.xlu1 %5611 }
0x1346   :  { %8152 = vrcp.f32 %v5612_v1  ;;  %7904 = vmatprep.subr.mxu1 %v8273_v20  ;;  %7895 = vmatmul.mubr.msk.f32.vlgmr.msra.gmra.mxu1 %vm1739_vm3, %v5637_v36 }
0x1347   :  { %7905 = vmatpush3.msra.mxu1 %v4919_v58  ;;  %7908 = vmatprep.mubr.msk.f32.mxu1 %vm8274_vm1, %v8273_v20 }
0x1348   :  { %7906 = vmatprep.subr.mxu1 %v8273_v20 }
0x1349   :  { %7907 = vmatpush3.msra.mxu1 %v4917_v54 }
0x134a   :  { %7918 = vmatprep.subr.mxu1 %v8273_v20 }
0x1353   :  { %v8153_v25 = vpop.eup %8152 }
0x1354   :  { %v5638_v55 = vmul.f32 %v8153_v25, %v9294_v63 }
0x1356   :  { %7902 = vmatmul.mubr.msk.f32.vlgmr.msra.gmra.mxu0 %vm1739_vm3, %v5638_v55 }
0x1357   :  { %7912 = vmatpush3.msra.mxu0 %v4927_v56  ;;  %7915 = vmatprep.mubr.msk.f32.mxu0 %vm8274_vm1, %v8273_v20 }
0x1358   :  { %7913 = vmatprep.subr.mxu0 %v8273_v20 }
0x1359   :  { %7914 = vmatpush3.msra.mxu0 %v4925_v14 }
0x135a   :  { %7925 = vmatprep.subr.mxu0 %v8273_v20 }
0x1374   :  { %v5615_v8 = vpop.xlane.xlu0 %5614 }
0x1375   :  { %8154 = vrcp.f32 %v5615_v8 }
0x1379   :  { %v5618_v7 = vpop.xlane.xlu1 %5617 }
0x137a   :  { %8156 = vrcp.f32 %v5618_v7 }
0x137d   :  { %v5621_v10 = vpop.xlane.xlu0 %5620 }
0x137e   :  { %8158 = vrcp.f32 %v5621_v10 }
0x1382   :  { %v8155_v39 = vpop.eup %8154 }
0x1383   :  { %v5639_v52 = vmul.f32 %v8155_v39, %v9298_v13  ;;  %v7082_v13 = vld [vmem:[%s9457_s3 + $0x20] sm:$0xff]  }
0x1384   :  { %v6999_v9 = vunpack.c.h.bf16 %v7082_v13  ;;  %v6998_v27 = vunpack.c.l.bf16 %v7082_v13  ;;  %v7089_v13 = vld [vmem:[%s9461_s7 + $0x98] sm:$0xff]  }
0x1385   :  { %7909 = vmatmul.mubr.msk.f32.vlgmr.msra.gmra.mxu1 %vm1739_vm3, %v5639_v52  ;;  %v5624_v61 = vpop.xlane.xlu1 %5623 }
0x1386   :  { %v5627_v15 = vpop.xlane.xlu0 %5626  ;;  %7919 = vmatpush3.msra.mxu1 %v4931_v11  ;;  %8160 = vrcp.f32 %v5624_v61  ;;  %7922 = vmatprep.mubr.msk.f32.mxu1 %vm8274_vm1, %v8273_v20 }
0x1387   :  { %v8157_v23 = vpop.eup %8156  ;;  %8162 = vrcp.f32 %v5627_v15  ;;  %7920 = vmatprep.subr.mxu1 %v8273_v20 }
0x1388   :  { %7921 = vmatpush3.msra.mxu1 %v4929_v60  ;;  %v5640_v16 = vmul.f32 %v8157_v23, %v9302_v28  ;;  %v7085_v23 = vld [vmem:[%s9459_s5 + $0x28] sm:$0xff]  }
0x1389   :  { %7932 = vmatprep.subr.mxu1 %v8273_v20  ;;  %v4941_v4 = vpop.permute.xlu1 %4940 }
0x138a   :  { %7916 = vmatmul.mubr.msk.f32.vlgmr.msra.gmra.mxu0 %vm1739_vm3, %v5640_v16  ;;  %v4937_v22 = vpop.permute.xlu0 %4936  ;;  %v7084_v16 = vld [vmem:[%s9459_s5 + $0x20] sm:$0xff]  }
0x138b   :  { %v8159_v18 = vpop.eup %8158  ;;  %7926 = vmatpush3.msra.mxu0 %v4939_v29  ;;  %7929 = vmatprep.mubr.msk.f32.mxu0 %vm8274_vm1, %v8273_v20 }
0x138c   :  { %7927 = vmatprep.subr.mxu0 %v8273_v20  ;;  %v5641_v63 = vmul.f32 %v8159_v18, %v9307_v19  ;;  %v7011_v18 = vunpack.c.h.bf16 %v7085_v23 }
0x138d   :  { %7928 = vmatpush3.msra.mxu0 %v4937_v22  ;;  %v7010_v22 = vunpack.c.l.bf16 %v7085_v23 }
0x138e   :  { %7923 = vmatmul.mubr.msk.f32.vlgmr.msra.gmra.mxu1 %vm1739_vm3, %v5641_v63  ;;  %v7007_v63 = vunpack.c.h.bf16 %v7084_v16 }
0x138f   :  { %7933 = vmatpush3.msra.mxu1 %v4943_v3  ;;  %7936 = vmatprep.mubr.msk.f32.mxu1 %vm8274_vm1, %v8273_v20 }
0x1390   :  { %7934 = vmatprep.subr.mxu1 %v8273_v20  ;;  %v7083_v20 = vld [vmem:[%s9457_s3 + $0x28] sm:$0xff]  }
0x1391   :  { %7935 = vmatpush3.msra.mxu1 %v4941_v4  ;;  %v7003_v48 = vunpack.c.h.bf16 %v7083_v20  ;;  %v7002_v51 = vunpack.c.l.bf16 %v7083_v20  ;;  %v7006_v4 = vunpack.c.l.bf16 %v7084_v16 }
0x1392   :  { %7950 = vmatprep.subr.mxu1 %v7011_v18 }
0x1393   :  { %v8161_v5 = vpop.eup %8160  ;;  %7939 = vmatprep.subr.mxu0 %v7003_v48 }
0x1394   :  { %v8163_v35 = vpop.eup %8162  ;;  %v5642_v33 = vmul.f32 %v8161_v5, %v9312_v21  ;;  %v7093_v5 = vld [vmem:[%s9461_s7 + $0xb8] sm:$0xff]  }
0x1395   :  { %v5643_v37 = vmul.f32 %v8163_v35, %v9314_v53  ;;  %v7092_v35 = vld [vmem:[%s9461_s7 + $0xb0] sm:$0xff]  }
0x1396   :  { %7930 = vmatmul.mubr.msk.f32.vlgmr.msra.gmra.mxu0 %vm1739_vm3, %v5642_v33  ;;  %v7043_v33 = vunpack.c.h.bf16 %v7093_v5 }
0x1397   :  { %7937 = vmatmul.mubr.msk.f32.vlgmr.msra.gmra.mxu1 %vm1739_vm3, %v5643_v37  ;;  %7940 = vmatpush3.msra.mxu0 %v7003_v48  ;;  %v7042_v37 = vunpack.c.l.bf16 %v7093_v5 }
0x1398   :  { %7941 = vmatprep.subr.mxu0 %v7002_v51  ;;  %7951 = vmatpush3.msra.mxu1 %v7011_v18 }
0x1399   :  { %7942 = vmatpush3.msra.mxu0 %v7002_v51  ;;  %7952 = vmatprep.subr.mxu1 %v7010_v22  ;;  %v7027_v51 = vunpack.c.h.bf16 %v7089_v13 }
0x139a   :  { %7943 = vmatprep.subr.mxu0 %v6999_v9  ;;  %7953 = vmatpush3.msra.mxu1 %v7010_v22 }
0x139b   :  { %7944 = vmatpush3.msra.mxu0 %v6999_v9  ;;  %7954 = vmatprep.subr.mxu1 %v7007_v63  ;;  %v7026_v9 = vunpack.c.l.bf16 %v7089_v13 }
0x139c   :  { %7945 = vmatprep.subr.mxu0 %v6998_v27  ;;  %7955 = vmatpush3.msra.mxu1 %v7007_v63 }
0x139d   :  { %7946 = vmatpush3.msra.mxu0 %v6998_v27  ;;  %7956 = vmatprep.subr.mxu1 %v7006_v4 }
0x139e   :  { %7957 = vmatpush3.msra.mxu1 %v7006_v4  ;;  %7961 = vmatprep.subr.mxu0 %v7043_v33 }
0x1402   :  { %v5713_v41 = vpop.f32.mrf.mxu1 }
0x1404   :  { %v7889_v45 = vpop.f32.mrf.mxu1 }
0x1405   :  { %v7091_v45 = vld [vmem:[%s9461_s7 + $0xa8] sm:$0xff]  }
0x1406   :  { %v5786_v24 = vpop.f32.mrf.mxu1 }
0x1408   :  { %v7896_v43 = vpop.f32.mrf.mxu1 }
0x1409   :  { %v7035_v43 = vunpack.c.h.bf16 %v7091_v45 }
0x1416   :  { %v5859_v50 = vpop.f32.mrf.mxu0 }
0x1417   :  { %6230 = vrot.lane.b32.xlu0 %v5859_v50, %s8268_s20  ;;  %v7090_v50 = vld [vmem:[%s9461_s7 + $0xa0] sm:$0xff]  }
0x1418   :  { %v7903_v31 = vpop.f32.mrf.mxu0  ;;  %v7031_v20 = vunpack.c.h.bf16 %v7090_v50  ;;  %v7030_v48 = vunpack.c.l.bf16 %v7090_v50 }
0x1419   :  { %v7034_v31 = vunpack.c.l.bf16 %v7091_v45 }
0x1445   :  { %v5932_v42 = vpop.f32.mrf.mxu1 }
0x1446   :  { %6232 = vrot.lane.b32.xlu1 %v5932_v42, %s8268_s20  ;;  %v7088_v42 = vld [vmem:[%s9461_s7 + $0x90] sm:$0xff]  }
0x1447   :  { %v7910_v26 = vpop.f32.mrf.mxu1 }
0x1448   :  { %v7023_v26 = vunpack.c.h.bf16 %v7088_v42 }
0x144a   :  { %v6005_v46 = vpop.f32.mrf.mxu0 }
0x144b   :  { %6238 = vrot.lane.b32.xlu0 %v6005_v46, %s8270_s26  ;;  %v7022_v46 = vunpack.c.l.bf16 %v7088_v42 }
0x144c   :  { %v7917_v28 = vpop.f32.mrf.mxu0 }
0x144e   :  { %v6078_v59 = vpop.f32.mrf.mxu1 }
0x144f   :  { %6240 = vrot.lane.b32.xlu1 %v6078_v59, %s8270_s26 }
0x1450   :  { %v7924_v57 = vpop.f32.mrf.mxu1 }
0x1456   :  { %v6151_v19 = vpop.f32.mrf.mxu0 }
0x1457   :  { %v6224_v38 = vpop.f32.mrf.mxu1  ;;  %6246 = vrot.lane.b32.xlu0 %v6151_v19, %s8278_s13 }
0x1458   :  { %6248 = vrot.lane.b32.xlu1 %v6224_v38, %s8278_s13  ;;  %v7931_v21 = vpop.f32.mrf.mxu0 }
0x1459   :  { %v7938_v53 = vpop.f32.mrf.mxu1  ;;  %v9422_v21 = vld [vmem:[#allocation4 + $0x8] sm:$0xf] }
0x145a   :  { %v6370_v53 = vrot.slane %v9422_v21, %v8581_v32  ;;  %v7087_v32 = vld [vmem:[%s9461_s7 + $0x88] sm:$0xff]  }
0x1489   :  { %v6231_v49 = vpop.permute.xlu0 %6230 }
0x148a   :  { %v6252_v56 = vsel %vm448_vm2, %v5713_v41, %v6231_v49  ;;  %v7039_v41 = vunpack.c.h.bf16 %v7092_v35 }
0x14b8   :  { %v6233_v40 = vpop.permute.xlu1 %6232 }
0x14b9   :  { %v6253_v11 = vsel %vm448_vm2, %v5786_v24, %v6233_v40  ;;  %v7038_v24 = vunpack.c.l.bf16 %v7092_v35 }
0x14bd   :  { %v6239_v58 = vpop.permute.xlu0 %6238 }
0x14be   :  { %v6254_v14 = vsel %vm1739_vm3, %v6252_v56, %v6239_v58  ;;  %v6376_v58 = vrot.slane %v9422_v21, %v8584_v34  ;;  %v7086_v34 = vld [vmem:[%s9461_s7 + $0x80] sm:$0xff]  }
0x14c1   :  { %v6241_v54 = vpop.permute.xlu1 %6240 }
0x14c2   :  { %v6255_v29 = vsel %vm1739_vm3, %v6253_v11, %v6241_v54 }
0x14c9   :  { %v6247_v60 = vpop.permute.xlu0 %6246 }
0x14ca   :  { %v6256_v3 = vsel %vm1742_vm4, %v6254_v14, %v6247_v60  ;;  %v6249_v44 = vpop.permute.xlu1 %6248 }
0x14cb   :  { %v6257_v2 = vsel %vm1742_vm4, %v6255_v29, %v6249_v44  ;;  %7947 = vmatprep.mubr.msk.f32.mxu0 %vm168_vm0, %v6256_v3  ;;  %v7019_v3 = vunpack.c.h.bf16 %v7087_v32  ;;  %v7018_v44 = vunpack.c.l.bf16 %v7087_v32 }
0x14cc   :  { %7948 = vmatmul.mubr.msk.f32.vlgmr.msra.gmra.mxu0 %vm168_vm0, %v6257_v2  ;;  %v7015_v2 = vunpack.c.h.bf16 %v7086_v34 }
0x14cd   :  { %7962 = vmatpush3.msra.mxu0 %v7043_v33 }
0x14ce   :  { %7963 = vmatprep.subr.mxu0 %v7042_v37 }
0x14cf   :  { %7964 = vmatpush3.msra.mxu0 %v7042_v37 }
0x14d0   :  { %7965 = vmatprep.subr.mxu0 %v7039_v41 }
0x14d1   :  { %7966 = vmatpush3.msra.mxu0 %v7039_v41 }
0x14d2   :  { %7967 = vmatprep.subr.mxu0 %v7038_v24 }
0x14d3   :  { %7968 = vmatpush3.msra.mxu0 %v7038_v24 }
0x14d4   :  { %7969 = vmatprep.subr.mxu0 %v7035_v43 }
0x14d5   :  { %7970 = vmatpush3.msra.mxu0 %v7035_v43 }
0x14d6   :  { %7971 = vmatprep.subr.mxu0 %v7034_v31 }
0x14d7   :  { %7972 = vmatpush3.msra.mxu0 %v7034_v31 }
0x14d8   :  { %7973 = vmatprep.subr.mxu0 %v7031_v20 }
0x14d9   :  { %7974 = vmatpush3.msra.mxu0 %v7031_v20 }
0x14da   :  { %7975 = vmatprep.subr.mxu0 %v7030_v48 }
0x14db   :  { %7976 = vmatpush3.msra.mxu0 %v7030_v48 }
0x14dc   :  { %7977 = vmatprep.subr.mxu0 %v7027_v51 }
0x14dd   :  { %7978 = vmatpush3.msra.mxu0 %v7027_v51  ;;  %v6584_v51 = vrot.slane %v9422_v21, %v9133_v6 }
0x14de   :  { %7979 = vmatprep.subr.mxu0 %v7026_v9 }
0x14df   :  { %7980 = vmatpush3.msra.mxu0 %v7026_v9  ;;  %v6590_v9 = vrot.slane %v9422_v21, %v9137_v30 }
0x14e0   :  { %7981 = vmatprep.subr.mxu0 %v7023_v26 }
0x14e1   :  { %7982 = vmatpush3.msra.mxu0 %v7023_v26 }
0x14e2   :  { %7983 = vmatprep.subr.mxu0 %v7022_v46 }
0x14e3   :  { %7984 = vmatpush3.msra.mxu0 %v7022_v46 }
0x14e4   :  { %7985 = vmatprep.subr.mxu0 %v7019_v3 }
0x14e5   :  { %7986 = vmatpush3.msra.mxu0 %v7019_v3 }
0x14e6   :  { %7987 = vmatprep.subr.mxu0 %v7018_v44 }
0x14e7   :  { %7988 = vmatpush3.msra.mxu0 %v7018_v44 }
0x14e8   :  { %7989 = vmatprep.subr.mxu0 %v7015_v2 }
0x14e9   :  { %7990 = vmatpush3.msra.mxu0 %v7015_v2 }
0x158c   :  { %v7949_v47 = vpop.f32.mrf.mxu0 }
0x158d   :  { %v6340_v62 = vadd.f32 %v7949_v47, %v9147_v17  ;;  %v7014_v47 = vunpack.c.l.bf16 %v7086_v34 }
0x158e   :  { %v6330_v0 = vpop.f32.mrf.mxu0 }
0x158f   :  { %v6339_v36 = vadd.f32 %v6330_v0, %v9142_v12  ;;  %v6344_v1 = vsel %vm168_vm0, %v6340_v62, 0.0  ;;  %7991 = vmatprep.subr.mxu0 %v7014_v47 }
0x1590   :  { %6345 = vadd.xlane.f32.xlu1 %v6344_v1  ;;  %7992 = vmatpush3.msra.mxu0 %v7014_v47 }
0x1591   :  { %v6341_v25 = vsel %vm168_vm0, %v6339_v36, 0.0 }
0x1592   :  { %6342 = vadd.xlane.f32.xlu0 %v6341_v25 }
0x1619   :  { %v6346_v55 = vpop.xlane.xlu1 %6345 }
0x161a   :  { %v6348_v8 = vmul.f32 0.03125, %v6346_v55 }
0x161b   :  { %v6343_v7 = vpop.xlane.xlu0 %6342 }
0x161c   :  { %v6347_v10 = vmul.f32 0.03125, %v6343_v7  ;;  %v9388_v39 = vsub.f32 %v6340_v62, %v6348_v8  ;;  %v6824_v62 = vld [vmem:[#allocation6 + $0x2] ss:$0 sm:$0xff] }
0x161e   :  { %v9390_v52 = vsub.f32 %v6339_v36, %v6347_v10  ;;  %v6352_v12 = vmul.f32 %v9388_v39, %v9388_v39 }
0x1620   :  { %v6351_v17 = vmul.f32 %v9390_v52, %v9390_v52  ;;  %v6356_v15 = vsel %vm168_vm0, %v6352_v12, 0.0 }
0x1622   :  { %v6353_v61 = vsel %vm168_vm0, %v6351_v17, 0.0 }
0x1623   :  { %6354 = vadd.xlane.f32.xlu0 %v6353_v61 }
0x1627   :  { %6357 = vadd.xlane.f32.xlu0 %v6356_v15 }
0x16ac   :  { %v6355_v27 = vpop.xlane.xlu0 %6354 }
0x16ad   :  { %v6359_v28 = vmul.f32 0.03125, %v6355_v27 }
0x16af   :  { %v6361_v59 = vadd.f32 1e-05, %v6359_v28 }
0x16b0   :  { %v6358_v57 = vpop.xlane.xlu0 %6357 }
0x16b1   :  { %8164 = vrsqrt.f32 %v6361_v59  ;;  %v6360_v19 = vmul.f32 0.03125, %v6358_v57 }
0x16b3   :  { %v6362_v38 = vadd.f32 1e-05, %v6360_v19 }
0x16b5   :  { %8166 = vrsqrt.f32 %v6362_v38 }
0x16be   :  { %v8165_v49 = vpop.eup %8164 }
0x16bf   :  { %v6365_v40 = vmul.f32 %v8165_v49, %v9390_v52 }
0x16c1   :  { %v6371_v54 = vmul.f32 %v6370_v53, %v6365_v40 }
0x16c2   :  { %v8167_v56 = vpop.eup %8166 }
0x16c3   :  { %v6366_v11 = vmul.f32 %v8167_v56, %v9388_v39  ;;  %v6377_v14 = vadd.f32 %v6376_v58, %v6371_v54  ;;  %v6827_v39 = vld [vmem:[#allocation7 + $0x2] ss:$0 sm:$0xff] }
0x16c5   :  { %v6372_v60 = vmul.f32 %v6370_v53, %v6366_v11  ;;  %7958 = vmatprep.mubr.msk.f32.mxu1 %vm168_vm0, %v6377_v14 }
0x16c7   :  { %v6378_v29 = vadd.f32 %v6376_v58, %v6372_v60 }
0x16c9   :  { %7959 = vmatmul.mubr.msk.f32.vlgmr.msra.gmra.mxu1 %vm168_vm0, %v6378_v29 }
0x1789   :  { %v7960_v0 = vpop.f32.mrf.mxu1 }
0x178a   :  { %v6463_v36 = vadd.f32 %v7960_v0, %v6824_v62 }
0x178b   :  { %v6457_v1 = vpop.f32.mrf.mxu1 }
0x178c   :  { %v6458_v25 = vadd.f32 %v6824_v62, %v6457_v1  ;;  %v6469_v55 = vmul.f32 0.01, %v6463_v36  ;;  %vm6467_vm11 = vcmp.gt.f32.partialorder %v6463_v36, 0.0 }
0x178e   :  { %v6468_v8 = vmul.f32 0.01, %v6458_v25  ;;  %vm6466_vm12 = vcmp.gt.f32.partialorder %v6458_v25, 0.0  ;;  %v6471_v10 = vsel %vm6467_vm11, %v6463_v36, %v6469_v55 }
0x1790   :  { %v6470_v7 = vsel %vm6466_vm12, %v6458_v25, %v6468_v8 }
0x1791   :  { %7993 = vmatprep.mubr.f32.mxu0 %v6470_v7 }
0x1792   :  { %7994 = vmatmul.mubr.f32.vlgmr.msra.gmra.mxu0 %v6471_v10 }
0x1852   :  { %v7995_v52 = vpop.f32.mrf.mxu0 }
0x1853   :  { %v6550_v17 = vadd.f32 %v7995_v52, %v6827_v39 }
0x1854   :  { %v6544_v61 = vpop.f32.mrf.mxu0 }
0x1855   :  { %v6554_v12 = vadd.f32 %v6550_v17, %v6378_v29  ;;  %v6545_v15 = vadd.f32 %v6827_v39, %v6544_v61 }
0x1857   :  { %v6553_v23 = vadd.f32 %v6545_v15, %v6377_v14  ;;  %v6558_v16 = vsel %vm168_vm0, %v6554_v12, 0.0 }
0x1858   :  { %6559 = vadd.xlane.f32.xlu0 %v6558_v16 }
0x1859   :  { %v6555_v18 = vsel %vm168_vm0, %v6553_v23, 0.0 }
0x185a   :  { %6556 = vadd.xlane.f32.xlu1 %v6555_v18 }
0x18e1   :  { %v6560_v22 = vpop.xlane.xlu0 %6559 }
0x18e2   :  { %v6562_v63 = vmul.f32 0.03125, %v6560_v22 }
0x18e3   :  { %v6557_v4 = vpop.xlane.xlu1 %6556 }
0x18e4   :  { %v6564_v5 = vsub.f32 %v6554_v12, %v6562_v63  ;;  %v6561_v35 = vmul.f32 0.03125, %v6557_v4 }
0x18e6   :  { %v6563_v33 = vsub.f32 %v6553_v23, %v6561_v35  ;;  %v6566_v37 = vmul.f32 %v6564_v5, %v6564_v5 }
0x18e8   :  { %v6570_v41 = vsel %vm168_vm0, %v6566_v37, 0.0  ;;  %v6565_v45 = vmul.f32 %v6563_v33, %v6563_v33 }
0x18e9   :  { %6571 = vadd.xlane.f32.xlu0 %v6570_v41 }
0x18ea   :  { %v6567_v24 = vsel %vm168_vm0, %v6565_v45, 0.0 }
0x18eb   :  { %6568 = vadd.xlane.f32.xlu1 %v6567_v24 }
0x1972   :  { %v6572_v43 = vpop.xlane.xlu0 %6571 }
0x1973   :  { %v6574_v50 = vmul.f32 0.03125, %v6572_v43 }
0x1974   :  { %v6569_v31 = vpop.xlane.xlu1 %6568 }
0x1975   :  { %v6576_v20 = vadd.f32 1e-05, %v6574_v50  ;;  %v6573_v13 = vmul.f32 0.03125, %v6569_v31 }
0x1977   :  { %8168 = vrsqrt.f32 %v6576_v20  ;;  %v6575_v48 = vadd.f32 1e-05, %v6573_v13 }
0x1979   :  { %8170 = vrsqrt.f32 %v6575_v48 }
0x1984   :  { %v8169_v42 = vpop.eup %8168 }
0x1985   :  { %v6580_v26 = vmul.f32 %v8169_v42, %v6564_v5 }
0x1986   :  { %v8171_v46 = vpop.eup %8170 }
0x1987   :  { %v6586_v27 = vmul.f32 %v6584_v51, %v6580_v26  ;;  %v6579_v28 = vmul.f32 %v8171_v46, %v6563_v33 }
0x1989   :  { %v6592_v59 = vadd.f32 %v6590_v9, %v6586_v27  ;;  %v6585_v57 = vmul.f32 %v6584_v51, %v6579_v28 }
0x198b   :  { %6594 = vst.msk [vmem:[%s9463_s9 + $0x8] sm:$0xff] %vm168_vm0, %v6592_v59  ;;  %v6591_v19 = vadd.f32 %v6590_v9, %v6585_v57 }
0x198d   :  { %6593 = vst.msk [vmem:[%s9463_s9] sm:$0xff] %vm168_vm0, %v6591_v19 }
0x198e   :  { %6599 = vsyncpa [#allocation3], 1 }
0x198f   :  { %6600 = vsyncpa [#allocation5], 1 }
0x1990   :  { %6601 = vsyncpa [#allocation8], 1 }

</bundles_post_ra>
